<compile_context>
chip_gen: v7x
topology: tpu7x:2x2x1
jax: 0.10.0
libtpu: 0.0.40
codegen_flags: <defaults>
</compile_context>

<pallas_src>
import functools

import jax
import jax.numpy as jnp
from jax import lax
from jax.experimental import pallas as pl
from jax.experimental.pallas import tpu as pltpu

DIL = 2   # conv2 dilation in detnet_bottleneck
PAD = 2   # conv2 padding (== DIL for a 3x3 kernel -> 'same' spatial output)


# ---------------------------------------------------------------------------
# Fused kernel body (shared by the 'A' and 'B' variants)
# ---------------------------------------------------------------------------

def _block_body(x_ref, w1_ref, s1_ref, b1_ref,
                w2_ref, s2_ref, b2_ref,
                w3_ref, s3_ref, b3_ref,
                ds_refs, o_ref, o1_ref, *, th):
    h = pl.program_id(1)
    _, H, W, Cin = x_ref.shape
    P = w1_ref.shape[1]          # planes
    Cout = w3_ref.shape[1]       # expansion * planes (== planes here)
    n_tiles = H // th
    f32 = jnp.float32
    cdt = o1_ref.dtype           # inter-stage activation dtype (= input dtype)

    # ---- Stage 1: conv1 (1x1) + bn1 + relu for the whole image, computed once
    # per image (h == 0) into a zero-padded VMEM scratch.  The zero border is
    # the dilated conv's padding -> no jnp.pad / extra HBM round-trip.
    @pl.when(h == 0)
    def _():
        o1_ref[...] = jnp.zeros(o1_ref.shape, o1_ref.dtype)
        for c in range(n_tiles):          # static unroll; bounded accumulators
            xt = x_ref[0, c * th:(c + 1) * th, :, :].reshape(th * W, Cin)
            y = jnp.dot(xt, w1_ref[...], preferred_element_type=f32)
            y = jnp.maximum(y * s1_ref[...] + b1_ref[...], 0.0)
            o1_ref[PAD + c * th:PAD + (c + 1) * th, PAD:PAD + W, :] = (
                y.reshape(th, W, P).astype(cdt))

    # ---- Stage 2: dilated 3x3 conv + bn2 + relu for this row tile.
    # 9 taps = 9 MXU matmuls on (th*W, P) operands sliced from the VMEM scratch.
    row0 = pl.multiple_of(h * th, th)
    acc = jnp.zeros((th * W, P), f32)
    for dy in range(3):
        rw = o1_ref[pl.ds(row0 + dy * DIL, th), :, :]       # (th, W+2*PAD, P)
        for dx in range(3):
            patch = rw[:, dx * DIL:dx * DIL + W, :].reshape(th * W, P)
            acc = acc + jnp.dot(patch, w2_ref[dy, dx],
                                preferred_element_type=f32)
    o2 = jnp.maximum(acc * s2_ref[...] + b2_ref[...], 0.0).astype(cdt)

    # ---- Stage 3: conv3 (1x1) + bn3, residual add, relu.
    y3 = jnp.dot(o2, w3_ref[...], preferred_element_type=f32)
    y3 = y3 * s3_ref[...] + b3_ref[...]

    xt = x_ref[0, pl.ds(row0, th), :, :].reshape(th * W, Cin)
    if ds_refs is None:                       # block_type 'A' -> identity
        res = xt.astype(f32)
    else:                                     # block_type 'B' -> 1x1 conv + bn
        wd_ref, sd_ref, bd_ref = ds_refs
        res = jnp.dot(xt, wd_ref[...], preferred_element_type=f32)
        res = res * sd_ref[...] + bd_ref[...]

    out = jnp.maximum(y3 + res, 0.0)
    o_ref[...] = out.reshape(1, th, W, Cout).astype(o_ref.dtype)


def _detnet_kernel_A(x_ref, w1, s1, b1, w2, s2, b2, w3, s3, b3,
                     o_ref, o1_ref, *, th):
    _block_body(x_ref, w1, s1, b1, w2, s2, b2, w3, s3, b3,
                None, o_ref, o1_ref, th=th)


def _detnet_kernel_B(x_ref, w1, s1, b1, w2, s2, b2, w3, s3, b3, wd, sd, bd,
                     o_ref, o1_ref, *, th):
    _block_body(x_ref, w1, s1, b1, w2, s2, b2, w3, s3, b3,
                (wd, sd, bd), o_ref, o1_ref, th=th)


# ---------------------------------------------------------------------------
# pallas_call wrapper: one fused block (NHWC in -> NHWC out)
# ---------------------------------------------------------------------------

def _pick_row_tile(H, W, max_m=2048):
    """Largest divisor of H keeping the per-tile matmul M (= th*W) <= max_m."""
    best = 1
    for th in range(1, H + 1):
        if H % th == 0 and th * W <= max_m:
            best = th
    return best


def detnet_block(x_nhwc, params, *, row_tile=None):
    N, H, W, Cin = x_nhwc.shape
    P = params["w1"].shape[1]
    Cout = params["w3"].shape[1]
    has_ds = "wd" in params
    if not has_ds:
        assert Cin == Cout, "identity residual requires in_planes == planes"
    th = row_tile if row_tile is not None else _pick_row_tile(H, W)
    assert H % th == 0, f"row_tile {th} must divide H={H}"

    cmap2 = lambda n, h: (0, 0)
    cmap4 = lambda n, h: (0, 0, 0, 0)
    in_specs = [
        # Full image per n.  Its block index is constant along the row-tile
        # axis, so Pallas DMAs x once per image and revisits it across tiles.
        pl.BlockSpec((1, H, W, Cin), lambda n, h: (n, 0, 0, 0)),
        pl.BlockSpec((Cin, P), cmap2),
        pl.BlockSpec((1, P), cmap2), pl.BlockSpec((1, P), cmap2),
        pl.BlockSpec((3, 3, P, P), cmap4),
        pl.BlockSpec((1, P), cmap2), pl.BlockSpec((1, P), cmap2),
        pl.BlockSpec((P, Cout), cmap2),
        pl.BlockSpec((1, Cout), cmap2), pl.BlockSpec((1, Cout), cmap2),
    ]
    args = [x_nhwc, params["w1"], params["s1"], params["b1"],
            params["w2"], params["s2"], params["b2"],
            params["w3"], params["s3"], params["b3"]]
    if has_ds:
        in_specs += [pl.BlockSpec((Cin, Cout), cmap2),
                     pl.BlockSpec((1, Cout), cmap2),
                     pl.BlockSpec((1, Cout), cmap2)]
        args += [params["wd"], params["sd"], params["bd"]]
        kernel = functools.partial(_detnet_kernel_B, th=th)
    else:
        kernel = functools.partial(_detnet_kernel_A, th=th)

    return pl.pallas_call(
        kernel,
        out_shape=jax.ShapeDtypeStruct((N, H, W, Cout), x_nhwc.dtype),
        grid=(N, H // th),
        in_specs=in_specs,
        out_specs=pl.BlockSpec((1, th, W, Cout), lambda n, h: (n, h, 0, 0)),
        scratch_shapes=[
            # Zero-padded o1: stays in VMEM across the row-tile axis,
            # never written back to HBM.
            pltpu.VMEM((H + 2 * PAD, W + 2 * PAD, P), x_nhwc.dtype)],
        compiler_params=pltpu.CompilerParams(
            dimension_semantics=("parallel", "arbitrary")),
        # NOTE: for large shapes, set vmem_limit_bytes here explicitly and
        # budget x-block + o1 scratch + resident weights (v7x: 64 MiB VMEM).
    )(*args)


# ---------------------------------------------------------------------------
# The detnet layer (layer5 structure: one 'B' block followed by 'A' blocks).
# NCHW in / NCHW out like the PyTorch module; NHWC internally.
# ---------------------------------------------------------------------------

def detnet_layer_forward(x_nchw, layer_params, row_tile=None):
    x = jnp.transpose(x_nchw, (0, 2, 3, 1))   # single NCHW -> NHWC transpose
    for p in layer_params:
        x = detnet_block(x, p, row_tile=row_tile)
    return jnp.transpose(x, (0, 3, 1, 2))     # back to NCHW at the boundary


# ---------------------------------------------------------------------------
# Pure-JAX reference (XLA convs) for correctness checking
# ---------------------------------------------------------------------------

def detnet_block_reference(x_nhwc, p):
    f32 = jnp.float32
    xf = x_nhwc.astype(f32)
    dn = lax.conv_dimension_numbers(xf.shape, (1, 1, 1, 1),
                                    ("NHWC", "HWIO", "NHWC"))

    def conv1x1(inp, w):
        return lax.conv_general_dilated(inp, w.astype(f32)[None, None],
                                        (1, 1), "VALID", dimension_numbers=dn)

    o = conv1x1(xf, p["w1"])
    o = jnp.maximum(o * p["s1"] + p["b1"], 0.0)
    o = lax.conv_general_dilated(o, p["w2"].astype(f32), (1, 1),
                                 [(PAD, PAD), (PAD, PAD)],
                                 rhs_dilation=(DIL, DIL),
                                 dimension_numbers=dn)
    o = jnp.maximum(o * p["s2"] + p["b2"], 0.0)
    o = conv1x1(o, p["w3"])
    o = o * p["s3"] + p["b3"]
    if "wd" in p:
        r = conv1x1(xf, p["wd"]) * p["sd"] + p["bd"]
    else:
        r = xf
    return jnp.maximum(o + r, 0.0).astype(x_nhwc.dtype)


def detnet_layer_reference(x_nchw, layer_params):
    x = jnp.transpose(x_nchw, (0, 2, 3, 1))
    for p in layer_params:
        x = detnet_block_reference(x, p)
    return jnp.transpose(x, (0, 3, 1, 2))


# ---------------------------------------------------------------------------
# Parameter init (deterministic; BN folded into scale/bias, eps = 1e-5)
# ---------------------------------------------------------------------------

def init_block_params(key, in_planes, planes, block_type, dtype=jnp.float32):
    eps = 1e-5
    ks = list(jax.random.split(key, 20))

    def nxt():
        return ks.pop()

    def bn_fold(c):
        gamma = 1.0 + 0.1 * jax.random.normal(nxt(), (c,), jnp.float32)
        beta = 0.1 * jax.random.normal(nxt(), (c,), jnp.float32)
        mean = 0.1 * jax.random.normal(nxt(), (c,), jnp.float32)
        var = jnp.abs(jax.random.normal(nxt(), (c,), jnp.float32)) + 0.5
        scale = gamma * lax.rsqrt(var + eps)
        bias = beta - mean * scale
        return scale.reshape(1, c), bias.reshape(1, c)

    p = {}
    p["w1"] = (0.1 * jax.random.normal(nxt(), (in_planes, planes),
                                       jnp.float32)).astype(dtype)
    p["s1"], p["b1"] = bn_fold(planes)
    p["w2"] = (0.1 * jax.random.normal(nxt(), (3, 3, planes, planes),
                                       jnp.float32)).astype(dtype)   # HWIO
    p["s2"], p["b2"] = bn_fold(planes)
    p["w3"] = (0.1 * jax.random.normal(nxt(), (planes, planes),
                                       jnp.float32)).astype(dtype)
    p["s3"], p["b3"] = bn_fold(planes)
    if block_type == "B" or in_planes != planes:   # downsample branch
        p["wd"] = (0.1 * jax.random.normal(nxt(), (in_planes, planes),
                                           jnp.float32)).astype(dtype)
        p["sd"], p["bd"] = bn_fold(planes)
    return p


# ---------------------------------------------------------------------------

if __name__ == "__main__":
    # Small shapes: batch=2, in_planes=16, planes=8, spatial 16x16.
    # Layer structure mirrors _make_detnet_layer: one 'B' block then two 'A'.
    N, in_planes, planes, H, W = 2, 16, 8, 16, 16

    key = jax.random.PRNGKey(0)
    kx, k0, k1, k2 = jax.random.split(key, 4)
    x = jax.random.normal(kx, (N, in_planes, H, W), jnp.float32)  # NCHW input
    layer_params = [
        init_block_params(k0, in_planes, planes, "B"),
        init_block_params(k1, planes, planes, "A"),
        init_block_params(k2, planes, planes, "A"),
    ]

    # row_tile=8 -> 2 row tiles per image: exercises the h>0 path that reuses
    # the VMEM-resident o1 computed at h==0.
    fwd = jax.jit(lambda inp: detnet_layer_forward(inp, layer_params,
                                                   row_tile=8))
    out = jax.block_until_ready(fwd(x))

    ref = jax.block_until_ready(detnet_layer_reference(x, layer_params))
    assert out.shape == (N, planes, H, W)
    assert jnp.allclose(out, ref, atol=1e-3, rtol=1e-3), "mismatch vs reference"

    print("KERNEL_OK")
</pallas_src>

<mosaic_0001>
module attributes {stable_mosaic.version = 11 : i64} {
  func.func @_detnet_kernel_B(%arg0: i32, %arg1: i32, %arg2: memref<1x16x16x16xf32, #tpu.memory_space<vmem>>, %arg3: memref<16x8xf32, #tpu.memory_space<vmem>>, %arg4: memref<1x8xf32, #tpu.memory_space<vmem>>, %arg5: memref<1x8xf32, #tpu.memory_space<vmem>>, %arg6: memref<3x3x8x8xf32, #tpu.memory_space<vmem>>, %arg7: memref<1x8xf32, #tpu.memory_space<vmem>>, %arg8: memref<1x8xf32, #tpu.memory_space<vmem>>, %arg9: memref<8x8xf32, #tpu.memory_space<vmem>>, %arg10: memref<1x8xf32, #tpu.memory_space<vmem>>, %arg11: memref<1x8xf32, #tpu.memory_space<vmem>>, %arg12: memref<16x8xf32, #tpu.memory_space<vmem>>, %arg13: memref<1x8xf32, #tpu.memory_space<vmem>>, %arg14: memref<1x8xf32, #tpu.memory_space<vmem>>, %arg15: memref<1x8x16x8xf32, #tpu.memory_space<vmem>>, %arg16: memref<20x20x8xf32, #tpu.memory_space<vmem>>) attributes {dimension_semantics = [#tpu.dimension_semantics<parallel>, #tpu.dimension_semantics<arbitrary>], iteration_bounds = array<i64: 2, 2>, scalar_prefetch = 0 : i64, scratch_operands = 1 : i64, tpu.core_type = #tpu.core_type<tc>, window_params = [{transform_indices = @transform_0, window_bounds = array<i64: 1, 16, 16, 16>}, {pipeline_mode = #tpu.pipeline_mode<synchronous>, transform_indices = @transform_1, window_bounds = array<i64: 16, 8>}, {pipeline_mode = #tpu.pipeline_mode<synchronous>, transform_indices = @transform_2, window_bounds = array<i64: 1, 8>}, {pipeline_mode = #tpu.pipeline_mode<synchronous>, transform_indices = @transform_3, window_bounds = array<i64: 1, 8>}, {pipeline_mode = #tpu.pipeline_mode<synchronous>, transform_indices = @transform_4, window_bounds = array<i64: 3, 3, 8, 8>}, {pipeline_mode = #tpu.pipeline_mode<synchronous>, transform_indices = @transform_5, window_bounds = array<i64: 1, 8>}, {pipeline_mode = #tpu.pipeline_mode<synchronous>, transform_indices = @transform_6, window_bounds = array<i64: 1, 8>}, {pipeline_mode = #tpu.pipeline_mode<synchronous>, transform_indices = @transform_7, window_bounds = array<i64: 8, 8>}, {pipeline_mode = #tpu.pipeline_mode<synchronous>, transform_indices = @transform_8, window_bounds = array<i64: 1, 8>}, {pipeline_mode = #tpu.pipeline_mode<synchronous>, transform_indices = @transform_9, window_bounds = array<i64: 1, 8>}, {pipeline_mode = #tpu.pipeline_mode<synchronous>, transform_indices = @transform_10, window_bounds = array<i64: 16, 8>}, {pipeline_mode = #tpu.pipeline_mode<synchronous>, transform_indices = @transform_11, window_bounds = array<i64: 1, 8>}, {pipeline_mode = #tpu.pipeline_mode<synchronous>, transform_indices = @transform_12, window_bounds = array<i64: 1, 8>}, {transform_indices = @transform_13, window_bounds = array<i64: 1, 8, 16, 8>}]} {
    %c0_i32 = arith.constant 0 : i32
    %0 = arith.cmpi eq, %arg1, %c0_i32 : i32
    %1 = arith.extui %0 : i1 to i32
    %c0_i32_0 = arith.constant 0 : i32
    %2 = arith.cmpi ne, %1, %c0_i32_0 : i32
    scf.if %2 {
      %cst_77 = arith.constant 0.000000e+00 : f32
      %102 = vector.broadcast %cst_77 : f32 to vector<20x20x8xf32>
      %c0_78 = arith.constant 0 : index
      %c0_79 = arith.constant 0 : index
      %c0_80 = arith.constant 0 : index
      %103 = vector.load %arg16[%c0_78, %c0_79, %c0_80] : memref<20x20x8xf32, #tpu.memory_space<vmem>>, vector<20x20x8xf32>
      tpu.vector_store %arg16[%c0_78, %c0_79, %c0_80], %102 {strides = array<i32>} : memref<20x20x8xf32, #tpu.memory_space<vmem>>, vector<20x20x8xf32>,
      %c0_81 = arith.constant 0 : index
      %c0_82 = arith.constant 0 : index
      %c0_83 = arith.constant 0 : index
      %c0_84 = arith.constant 0 : index
      %104 = vector.load %arg2[%c0_81, %c0_82, %c0_83, %c0_84] : memref<1x16x16x16xf32, #tpu.memory_space<vmem>>, vector<1x8x16x16xf32>
      %105 = vector.shape_cast %104 : vector<1x8x16x16xf32> to vector<8x16x16xf32>
      %106 = vector.shape_cast %105 : vector<8x16x16xf32> to vector<128x16xf32>
      %c0_85 = arith.constant 0 : index
      %c0_86 = arith.constant 0 : index
      %107 = vector.load %arg3[%c0_85, %c0_86] : memref<16x8xf32, #tpu.memory_space<vmem>>, vector<16x8xf32>
      %cst_87 = arith.constant dense<0.000000e+00> : vector<128x8xf32>
      %108 = tpu.matmul %106, %107, %cst_87 {dimension_numbers = #tpu.dot_dimension_numbers<[1], [0], [0], [1], [0, 0, 1, 1], [], []>} : vector<128x16xf32>, vector<16x8xf32>, vector<128x8xf32> -> vector<128x8xf32>
      %c0_88 = arith.constant 0 : index
      %c0_89 = arith.constant 0 : index
      %109 = vector.load %arg4[%c0_88, %c0_89] : memref<1x8xf32, #tpu.memory_space<vmem>>, vector<1x8xf32>
      %110 = vector.broadcast %109 : vector<1x8xf32> to vector<128x8xf32>
      %111 = arith.mulf %108, %110 : vector<128x8xf32>
      %c0_90 = arith.constant 0 : index
      %c0_91 = arith.constant 0 : index
      %112 = vector.load %arg5[%c0_90, %c0_91] : memref<1x8xf32, #tpu.memory_space<vmem>>, vector<1x8xf32>
      %113 = vector.broadcast %112 : vector<1x8xf32> to vector<128x8xf32>
      %114 = arith.addf %111, %113 : vector<128x8xf32>
      %cst_92 = arith.constant 0.000000e+00 : f32
      %115 = vector.broadcast %cst_92 : f32 to vector<128x8xf32>
      %116 = arith.maximumf %114, %115 : vector<128x8xf32>
      %117 = vector.shape_cast %116 : vector<128x8xf32> to vector<8x16x8xf32>
      %c2_93 = arith.constant 2 : index
      %c2_94 = arith.constant 2 : index
      %c0_95 = arith.constant 0 : index
      %118 = vector.load %arg16[%c2_93, %c2_94, %c0_95] : memref<20x20x8xf32, #tpu.memory_space<vmem>>, vector<8x16x8xf32>
      tpu.vector_store %arg16[%c2_93, %c2_94, %c0_95], %117 {strides = array<i32>} : memref<20x20x8xf32, #tpu.memory_space<vmem>>, vector<8x16x8xf32>,
      %c0_96 = arith.constant 0 : index
      %c8 = arith.constant 8 : index
      %c0_97 = arith.constant 0 : index
      %c0_98 = arith.constant 0 : index
      %119 = vector.load %arg2[%c0_96, %c8, %c0_97, %c0_98] : memref<1x16x16x16xf32, #tpu.memory_space<vmem>>, vector<1x8x16x16xf32>
      %120 = vector.shape_cast %119 : vector<1x8x16x16xf32> to vector<8x16x16xf32>
      %121 = vector.shape_cast %120 : vector<8x16x16xf32> to vector<128x16xf32>
      %c0_99 = arith.constant 0 : index
      %c0_100 = arith.constant 0 : index
      %122 = vector.load %arg3[%c0_99, %c0_100] : memref<16x8xf32, #tpu.memory_space<vmem>>, vector<16x8xf32>
      %cst_101 = arith.constant dense<0.000000e+00> : vector<128x8xf32>
      %123 = tpu.matmul %121, %122, %cst_101 {dimension_numbers = #tpu.dot_dimension_numbers<[1], [0], [0], [1], [0, 0, 1, 1], [], []>} : vector<128x16xf32>, vector<16x8xf32>, vector<128x8xf32> -> vector<128x8xf32>
      %c0_102 = arith.constant 0 : index
      %c0_103 = arith.constant 0 : index
      %124 = vector.load %arg4[%c0_102, %c0_103] : memref<1x8xf32, #tpu.memory_space<vmem>>, vector<1x8xf32>
      %125 = vector.broadcast %124 : vector<1x8xf32> to vector<128x8xf32>
      %126 = arith.mulf %123, %125 : vector<128x8xf32>
      %c0_104 = arith.constant 0 : index
      %c0_105 = arith.constant 0 : index
      %127 = vector.load %arg5[%c0_104, %c0_105] : memref<1x8xf32, #tpu.memory_space<vmem>>, vector<1x8xf32>
      %128 = vector.broadcast %127 : vector<1x8xf32> to vector<128x8xf32>
      %129 = arith.addf %126, %128 : vector<128x8xf32>
      %cst_106 = arith.constant 0.000000e+00 : f32
      %130 = vector.broadcast %cst_106 : f32 to vector<128x8xf32>
      %131 = arith.maximumf %129, %130 : vector<128x8xf32>
      %132 = vector.shape_cast %131 : vector<128x8xf32> to vector<8x16x8xf32>
      %c10 = arith.constant 10 : index
      %c2_107 = arith.constant 2 : index
      %c0_108 = arith.constant 0 : index
      %133 = vector.load %arg16[%c10, %c2_107, %c0_108] : memref<20x20x8xf32, #tpu.memory_space<vmem>>, vector<8x16x8xf32>
      tpu.vector_store %arg16[%c10, %c2_107, %c0_108], %132 {strides = array<i32>} : memref<20x20x8xf32, #tpu.memory_space<vmem>>, vector<8x16x8xf32>,
    } else {
    }
    %c8_i32 = arith.constant 8 : i32
    %3 = arith.muli %arg1, %c8_i32 : i32
    %4 = tpu.assume_multiple %3, 8 : i32
    %cst = arith.constant 0.000000e+00 : f32
    %5 = vector.broadcast %cst : f32 to vector<128x8xf32>
    %c0_i32_1 = arith.constant 0 : i32
    %6 = arith.addi %4, %c0_i32_1 : i32
    %7 = arith.index_cast %6 : i32 to index
    %c0 = arith.constant 0 : index
    %c0_2 = arith.constant 0 : index
    %8 = vector.load %arg16[%7, %c0, %c0_2] : memref<20x20x8xf32, #tpu.memory_space<vmem>>, vector<8x20x8xf32>
    %9 = vector.extract_strided_slice %8 {offsets = [0, 0, 0], sizes = [8, 16, 8], strides = [1, 1, 1]} : vector<8x20x8xf32> to vector<8x16x8xf32>
    %10 = vector.shape_cast %9 : vector<8x16x8xf32> to vector<128x8xf32>
    %c0_3 = arith.constant 0 : index
    %c0_4 = arith.constant 0 : index
    %c0_5 = arith.constant 0 : index
    %c0_6 = arith.constant 0 : index
    %11 = vector.load %arg6[%c0_3, %c0_4, %c0_5, %c0_6] : memref<3x3x8x8xf32, #tpu.memory_space<vmem>>, vector<1x1x8x8xf32>
    %12 = vector.shape_cast %11 : vector<1x1x8x8xf32> to vector<8x8xf32>
    %cst_7 = arith.constant dense<0.000000e+00> : vector<128x8xf32>
    %13 = tpu.matmul %10, %12, %cst_7 {dimension_numbers = #tpu.dot_dimension_numbers<[1], [0], [0], [1], [0, 0, 1, 1], [], []>} : vector<128x8xf32>, vector<8x8xf32>, vector<128x8xf32> -> vector<128x8xf32>
    %14 = arith.addf %5, %13 : vector<128x8xf32>
    %15 = vector.extract_strided_slice %8 {offsets = [0, 2, 0], sizes = [8, 16, 8], strides = [1, 1, 1]} : vector<8x20x8xf32> to vector<8x16x8xf32>
    %16 = vector.shape_cast %15 : vector<8x16x8xf32> to vector<128x8xf32>
    %c0_8 = arith.constant 0 : index
    %c1 = arith.constant 1 : index
    %c0_9 = arith.constant 0 : index
    %c0_10 = arith.constant 0 : index
    %17 = vector.load %arg6[%c0_8, %c1, %c0_9, %c0_10] : memref<3x3x8x8xf32, #tpu.memory_space<vmem>>, vector<1x1x8x8xf32>
    %18 = vector.shape_cast %17 : vector<1x1x8x8xf32> to vector<8x8xf32>
    %cst_11 = arith.constant dense<0.000000e+00> : vector<128x8xf32>
    %19 = tpu.matmul %16, %18, %cst_11 {dimension_numbers = #tpu.dot_dimension_numbers<[1], [0], [0], [1], [0, 0, 1, 1], [], []>} : vector<128x8xf32>, vector<8x8xf32>, vector<128x8xf32> -> vector<128x8xf32>
    %20 = arith.addf %14, %19 : vector<128x8xf32>
    %21 = vector.extract_strided_slice %8 {offsets = [0, 4, 0], sizes = [8, 16, 8], strides = [1, 1, 1]} : vector<8x20x8xf32> to vector<8x16x8xf32>
    %22 = vector.shape_cast %21 : vector<8x16x8xf32> to vector<128x8xf32>
    %c0_12 = arith.constant 0 : index
    %c2 = arith.constant 2 : index
    %c0_13 = arith.constant 0 : index
    %c0_14 = arith.constant 0 : index
    %23 = vector.load %arg6[%c0_12, %c2, %c0_13, %c0_14] : memref<3x3x8x8xf32, #tpu.memory_space<vmem>>, vector<1x1x8x8xf32>
    %24 = vector.shape_cast %23 : vector<1x1x8x8xf32> to vector<8x8xf32>
    %cst_15 = arith.constant dense<0.000000e+00> : vector<128x8xf32>
    %25 = tpu.matmul %22, %24, %cst_15 {dimension_numbers = #tpu.dot_dimension_numbers<[1], [0], [0], [1], [0, 0, 1, 1], [], []>} : vector<128x8xf32>, vector<8x8xf32>, vector<128x8xf32> -> vector<128x8xf32>
    %26 = arith.addf %20, %25 : vector<128x8xf32>
    %c2_i32 = arith.constant 2 : i32
    %27 = arith.addi %4, %c2_i32 : i32
    %28 = arith.index_cast %27 : i32 to index
    %c0_16 = arith.constant 0 : index
    %c0_17 = arith.constant 0 : index
    %29 = vector.load %arg16[%28, %c0_16, %c0_17] : memref<20x20x8xf32, #tpu.memory_space<vmem>>, vector<8x20x8xf32>
    %30 = vector.extract_strided_slice %29 {offsets = [0, 0, 0], sizes = [8, 16, 8], strides = [1, 1, 1]} : vector<8x20x8xf32> to vector<8x16x8xf32>
    %31 = vector.shape_cast %30 : vector<8x16x8xf32> to vector<128x8xf32>
    %c1_18 = arith.constant 1 : index
    %c0_19 = arith.constant 0 : index
    %c0_20 = arith.constant 0 : index
    %c0_21 = arith.constant 0 : index
    %32 = vector.load %arg6[%c1_18, %c0_19, %c0_20, %c0_21] : memref<3x3x8x8xf32, #tpu.memory_space<vmem>>, vector<1x1x8x8xf32>
    %33 = vector.shape_cast %32 : vector<1x1x8x8xf32> to vector<8x8xf32>
    %cst_22 = arith.constant dense<0.000000e+00> : vector<128x8xf32>
    %34 = tpu.matmul %31, %33, %cst_22 {dimension_numbers = #tpu.dot_dimension_numbers<[1], [0], [0], [1], [0, 0, 1, 1], [], []>} : vector<128x8xf32>, vector<8x8xf32>, vector<128x8xf32> -> vector<128x8xf32>
    %35 = arith.addf %26, %34 : vector<128x8xf32>
    %36 = vector.extract_strided_slice %29 {offsets = [0, 2, 0], sizes = [8, 16, 8], strides = [1, 1, 1]} : vector<8x20x8xf32> to vector<8x16x8xf32>
    %37 = vector.shape_cast %36 : vector<8x16x8xf32> to vector<128x8xf32>
    %c1_23 = arith.constant 1 : index
    %c1_24 = arith.constant 1 : index
    %c0_25 = arith.constant 0 : index
    %c0_26 = arith.constant 0 : index
    %38 = vector.load %arg6[%c1_23, %c1_24, %c0_25, %c0_26] : memref<3x3x8x8xf32, #tpu.memory_space<vmem>>, vector<1x1x8x8xf32>
    %39 = vector.shape_cast %38 : vector<1x1x8x8xf32> to vector<8x8xf32>
    %cst_27 = arith.constant dense<0.000000e+00> : vector<128x8xf32>
    %40 = tpu.matmul %37, %39, %cst_27 {dimension_numbers = #tpu.dot_dimension_numbers<[1], [0], [0], [1], [0, 0, 1, 1], [], []>} : vector<128x8xf32>, vector<8x8xf32>, vector<128x8xf32> -> vector<128x8xf32>
    %41 = arith.addf %35, %40 : vector<128x8xf32>
    %42 = vector.extract_strided_slice %29 {offsets = [0, 4, 0], sizes = [8, 16, 8], strides = [1, 1, 1]} : vector<8x20x8xf32> to vector<8x16x8xf32>
    %43 = vector.shape_cast %42 : vector<8x16x8xf32> to vector<128x8xf32>
    %c1_28 = arith.constant 1 : index
    %c2_29 = arith.constant 2 : index
    %c0_30 = arith.constant 0 : index
    %c0_31 = arith.constant 0 : index
    %44 = vector.load %arg6[%c1_28, %c2_29, %c0_30, %c0_31] : memref<3x3x8x8xf32, #tpu.memory_space<vmem>>, vector<1x1x8x8xf32>
    %45 = vector.shape_cast %44 : vector<1x1x8x8xf32> to vector<8x8xf32>
    %cst_32 = arith.constant dense<0.000000e+00> : vector<128x8xf32>
    %46 = tpu.matmul %43, %45, %cst_32 {dimension_numbers = #tpu.dot_dimension_numbers<[1], [0], [0], [1], [0, 0, 1, 1], [], []>} : vector<128x8xf32>, vector<8x8xf32>, vector<128x8xf32> -> vector<128x8xf32>
    %47 = arith.addf %41, %46 : vector<128x8xf32>
    %c4_i32 = arith.constant 4 : i32
    %48 = arith.addi %4, %c4_i32 : i32
    %49 = arith.index_cast %48 : i32 to index
    %c0_33 = arith.constant 0 : index
    %c0_34 = arith.constant 0 : index
    %50 = vector.load %arg16[%49, %c0_33, %c0_34] : memref<20x20x8xf32, #tpu.memory_space<vmem>>, vector<8x20x8xf32>
    %51 = vector.extract_strided_slice %50 {offsets = [0, 0, 0], sizes = [8, 16, 8], strides = [1, 1, 1]} : vector<8x20x8xf32> to vector<8x16x8xf32>
    %52 = vector.shape_cast %51 : vector<8x16x8xf32> to vector<128x8xf32>
    %c2_35 = arith.constant 2 : index
    %c0_36 = arith.constant 0 : index
    %c0_37 = arith.constant 0 : index
    %c0_38 = arith.constant 0 : index
    %53 = vector.load %arg6[%c2_35, %c0_36, %c0_37, %c0_38] : memref<3x3x8x8xf32, #tpu.memory_space<vmem>>, vector<1x1x8x8xf32>
    %54 = vector.shape_cast %53 : vector<1x1x8x8xf32> to vector<8x8xf32>
    %cst_39 = arith.constant dense<0.000000e+00> : vector<128x8xf32>
    %55 = tpu.matmul %52, %54, %cst_39 {dimension_numbers = #tpu.dot_dimension_numbers<[1], [0], [0], [1], [0, 0, 1, 1], [], []>} : vector<128x8xf32>, vector<8x8xf32>, vector<128x8xf32> -> vector<128x8xf32>
    %56 = arith.addf %47, %55 : vector<128x8xf32>
    %57 = vector.extract_strided_slice %50 {offsets = [0, 2, 0], sizes = [8, 16, 8], strides = [1, 1, 1]} : vector<8x20x8xf32> to vector<8x16x8xf32>
    %58 = vector.shape_cast %57 : vector<8x16x8xf32> to vector<128x8xf32>
    %c2_40 = arith.constant 2 : index
    %c1_41 = arith.constant 1 : index
    %c0_42 = arith.constant 0 : index
    %c0_43 = arith.constant 0 : index
    %59 = vector.load %arg6[%c2_40, %c1_41, %c0_42, %c0_43] : memref<3x3x8x8xf32, #tpu.memory_space<vmem>>, vector<1x1x8x8xf32>
    %60 = vector.shape_cast %59 : vector<1x1x8x8xf32> to vector<8x8xf32>
    %cst_44 = arith.constant dense<0.000000e+00> : vector<128x8xf32>
    %61 = tpu.matmul %58, %60, %cst_44 {dimension_numbers = #tpu.dot_dimension_numbers<[1], [0], [0], [1], [0, 0, 1, 1], [], []>} : vector<128x8xf32>, vector<8x8xf32>, vector<128x8xf32> -> vector<128x8xf32>
    %62 = arith.addf %56, %61 : vector<128x8xf32>
    %63 = vector.extract_strided_slice %50 {offsets = [0, 4, 0], sizes = [8, 16, 8], strides = [1, 1, 1]} : vector<8x20x8xf32> to vector<8x16x8xf32>
    %64 = vector.shape_cast %63 : vector<8x16x8xf32> to vector<128x8xf32>
    %c2_45 = arith.constant 2 : index
    %c2_46 = arith.constant 2 : index
    %c0_47 = arith.constant 0 : index
    %c0_48 = arith.constant 0 : index
    %65 = vector.load %arg6[%c2_45, %c2_46, %c0_47, %c0_48] : memref<3x3x8x8xf32, #tpu.memory_space<vmem>>, vector<1x1x8x8xf32>
    %66 = vector.shape_cast %65 : vector<1x1x8x8xf32> to vector<8x8xf32>
    %cst_49 = arith.constant dense<0.000000e+00> : vector<128x8xf32>
    %67 = tpu.matmul %64, %66, %cst_49 {dimension_numbers = #tpu.dot_dimension_numbers<[1], [0], [0], [1], [0, 0, 1, 1], [], []>} : vector<128x8xf32>, vector<8x8xf32>, vector<128x8xf32> -> vector<128x8xf32>
    %68 = arith.addf %62, %67 : vector<128x8xf32>
    %c0_50 = arith.constant 0 : index
    %c0_51 = arith.constant 0 : index
    %69 = vector.load %arg7[%c0_50, %c0_51] : memref<1x8xf32, #tpu.memory_space<vmem>>, vector<1x8xf32>
    %70 = vector.broadcast %69 : vector<1x8xf32> to vector<128x8xf32>
    %71 = arith.mulf %68, %70 : vector<128x8xf32>
    %c0_52 = arith.constant 0 : index
    %c0_53 = arith.constant 0 : index
    %72 = vector.load %arg8[%c0_52, %c0_53] : memref<1x8xf32, #tpu.memory_space<vmem>>, vector<1x8xf32>
    %73 = vector.broadcast %72 : vector<1x8xf32> to vector<128x8xf32>
    %74 = arith.addf %71, %73 : vector<128x8xf32>
    %cst_54 = arith.constant 0.000000e+00 : f32
    %75 = vector.broadcast %cst_54 : f32 to vector<128x8xf32>
    %76 = arith.maximumf %74, %75 : vector<128x8xf32>
    %c0_55 = arith.constant 0 : index
    %c0_56 = arith.constant 0 : index
    %77 = vector.load %arg9[%c0_55, %c0_56] : memref<8x8xf32, #tpu.memory_space<vmem>>, vector<8x8xf32>
    %cst_57 = arith.constant dense<0.000000e+00> : vector<128x8xf32>
    %78 = tpu.matmul %76, %77, %cst_57 {dimension_numbers = #tpu.dot_dimension_numbers<[1], [0], [0], [1], [0, 0, 1, 1], [], []>} : vector<128x8xf32>, vector<8x8xf32>, vector<128x8xf32> -> vector<128x8xf32>
    %c0_58 = arith.constant 0 : index
    %c0_59 = arith.constant 0 : index
    %79 = vector.load %arg10[%c0_58, %c0_59] : memref<1x8xf32, #tpu.memory_space<vmem>>, vector<1x8xf32>
    %80 = vector.broadcast %79 : vector<1x8xf32> to vector<128x8xf32>
    %81 = arith.mulf %78, %80 : vector<128x8xf32>
    %c0_60 = arith.constant 0 : index
    %c0_61 = arith.constant 0 : index
    %82 = vector.load %arg11[%c0_60, %c0_61] : memref<1x8xf32, #tpu.memory_space<vmem>>, vector<1x8xf32>
    %83 = vector.broadcast %82 : vector<1x8xf32> to vector<128x8xf32>
    %84 = arith.addf %81, %83 : vector<128x8xf32>
    %c0_62 = arith.constant 0 : index
    %85 = arith.index_cast %4 : i32 to index
    %c0_63 = arith.constant 0 : index
    %c0_64 = arith.constant 0 : index
    %86 = vector.load %arg2[%c0_62, %85, %c0_63, %c0_64] : memref<1x16x16x16xf32, #tpu.memory_space<vmem>>, vector<1x8x16x16xf32>
    %87 = vector.shape_cast %86 : vector<1x8x16x16xf32> to vector<8x16x16xf32>
    %88 = vector.shape_cast %87 : vector<8x16x16xf32> to vector<128x16xf32>
    %c0_65 = arith.constant 0 : index
    %c0_66 = arith.constant 0 : index
    %89 = vector.load %arg12[%c0_65, %c0_66] : memref<16x8xf32, #tpu.memory_space<vmem>>, vector<16x8xf32>
    %cst_67 = arith.constant dense<0.000000e+00> : vector<128x8xf32>
    %90 = tpu.matmul %88, %89, %cst_67 {dimension_numbers = #tpu.dot_dimension_numbers<[1], [0], [0], [1], [0, 0, 1, 1], [], []>} : vector<128x16xf32>, vector<16x8xf32>, vector<128x8xf32> -> vector<128x8xf32>
    %c0_68 = arith.constant 0 : index
    %c0_69 = arith.constant 0 : index
    %91 = vector.load %arg13[%c0_68, %c0_69] : memref<1x8xf32, #tpu.memory_space<vmem>>, vector<1x8xf32>
    %92 = vector.broadcast %91 : vector<1x8xf32> to vector<128x8xf32>
    %93 = arith.mulf %90, %92 : vector<128x8xf32>
    %c0_70 = arith.constant 0 : index
    %c0_71 = arith.constant 0 : index
    %94 = vector.load %arg14[%c0_70, %c0_71] : memref<1x8xf32, #tpu.memory_space<vmem>>, vector<1x8xf32>
    %95 = vector.broadcast %94 : vector<1x8xf32> to vector<128x8xf32>
    %96 = arith.addf %93, %95 : vector<128x8xf32>
    %97 = arith.addf %84, %96 : vector<128x8xf32>
    %cst_72 = arith.constant 0.000000e+00 : f32
    %98 = vector.broadcast %cst_72 : f32 to vector<128x8xf32>
    %99 = arith.maximumf %97, %98 : vector<128x8xf32>
    %100 = vector.shape_cast %99 : vector<128x8xf32> to vector<1x8x16x8xf32>
    %c0_73 = arith.constant 0 : index
    %c0_74 = arith.constant 0 : index
    %c0_75 = arith.constant 0 : index
    %c0_76 = arith.constant 0 : index
    %101 = vector.load %arg15[%c0_73, %c0_74, %c0_75, %c0_76] : memref<1x8x16x8xf32, #tpu.memory_space<vmem>>, vector<1x8x16x8xf32>
    tpu.vector_store %arg15[%c0_73, %c0_74, %c0_75, %c0_76], %100 {strides = array<i32>} : memref<1x8x16x8xf32, #tpu.memory_space<vmem>>, vector<1x8x16x8xf32>,
    return
  }
  func.func @transform_0(%arg0: i32, %arg1: i32) -> (i32, i32, i32, i32) {
    %c0_i32 = arith.constant 0 : i32
    %c0_i32_0 = arith.constant 0 : i32
    %c0_i32_1 = arith.constant 0 : i32
    %c0_i32_2 = arith.constant 0 : i32
    return %arg0, %c0_i32, %c0_i32_0, %c0_i32_1 : i32, i32, i32, i32
  }
  func.func @transform_1(%arg0: i32, %arg1: i32) -> (i32, i32) {
    %c0_i32 = arith.constant 0 : i32
    %c0_i32_0 = arith.constant 0 : i32
    %c0_i32_1 = arith.constant 0 : i32
    return %c0_i32, %c0_i32_0 : i32, i32
  }
  func.func @transform_2(%arg0: i32, %arg1: i32) -> (i32, i32) {
    %c0_i32 = arith.constant 0 : i32
    %c0_i32_0 = arith.constant 0 : i32
    %c0_i32_1 = arith.constant 0 : i32
    return %c0_i32, %c0_i32_0 : i32, i32
  }
  func.func @transform_3(%arg0: i32, %arg1: i32) -> (i32, i32) {
    %c0_i32 = arith.constant 0 : i32
    %c0_i32_0 = arith.constant 0 : i32
    %c0_i32_1 = arith.constant 0 : i32
    return %c0_i32, %c0_i32_0 : i32, i32
  }
  func.func @transform_4(%arg0: i32, %arg1: i32) -> (i32, i32, i32, i32) {
    %c0_i32 = arith.constant 0 : i32
    %c0_i32_0 = arith.constant 0 : i32
    %c0_i32_1 = arith.constant 0 : i32
    %c0_i32_2 = arith.constant 0 : i32
    %c0_i32_3 = arith.constant 0 : i32
    return %c0_i32, %c0_i32_0, %c0_i32_1, %c0_i32_2 : i32, i32, i32, i32
  }
  func.func @transform_5(%arg0: i32, %arg1: i32) -> (i32, i32) {
    %c0_i32 = arith.constant 0 : i32
    %c0_i32_0 = arith.constant 0 : i32
    %c0_i32_1 = arith.constant 0 : i32
    return %c0_i32, %c0_i32_0 : i32, i32
  }
  func.func @transform_6(%arg0: i32, %arg1: i32) -> (i32, i32) {
    %c0_i32 = arith.constant 0 : i32
    %c0_i32_0 = arith.constant 0 : i32
    %c0_i32_1 = arith.constant 0 : i32
    return %c0_i32, %c0_i32_0 : i32, i32
  }
  func.func @transform_7(%arg0: i32, %arg1: i32) -> (i32, i32) {
    %c0_i32 = arith.constant 0 : i32
    %c0_i32_0 = arith.constant 0 : i32
    %c0_i32_1 = arith.constant 0 : i32
    return %c0_i32, %c0_i32_0 : i32, i32
  }
  func.func @transform_8(%arg0: i32, %arg1: i32) -> (i32, i32) {
    %c0_i32 = arith.constant 0 : i32
    %c0_i32_0 = arith.constant 0 : i32
    %c0_i32_1 = arith.constant 0 : i32
    return %c0_i32, %c0_i32_0 : i32, i32
  }
  func.func @transform_9(%arg0: i32, %arg1: i32) -> (i32, i32) {
    %c0_i32 = arith.constant 0 : i32
    %c0_i32_0 = arith.constant 0 : i32
    %c0_i32_1 = arith.constant 0 : i32
    return %c0_i32, %c0_i32_0 : i32, i32
  }
  func.func @transform_10(%arg0: i32, %arg1: i32) -> (i32, i32) {
    %c0_i32 = arith.constant 0 : i32
    %c0_i32_0 = arith.constant 0 : i32
    %c0_i32_1 = arith.constant 0 : i32
    return %c0_i32, %c0_i32_0 : i32, i32
  }
  func.func @transform_11(%arg0: i32, %arg1: i32) -> (i32, i32) {
    %c0_i32 = arith.constant 0 : i32
    %c0_i32_0 = arith.constant 0 : i32
    %c0_i32_1 = arith.constant 0 : i32
    return %c0_i32, %c0_i32_0 : i32, i32
  }
  func.func @transform_12(%arg0: i32, %arg1: i32) -> (i32, i32) {
    %c0_i32 = arith.constant 0 : i32
    %c0_i32_0 = arith.constant 0 : i32
    %c0_i32_1 = arith.constant 0 : i32
    return %c0_i32, %c0_i32_0 : i32, i32
  }
  func.func @transform_13(%arg0: i32, %arg1: i32) -> (i32, i32, i32, i32) {
    %c0_i32 = arith.constant 0 : i32
    %c0_i32_0 = arith.constant 0 : i32
    %c0_i32_1 = arith.constant 0 : i32
    return %arg0, %arg1, %c0_i32, %c0_i32_0 : i32, i32, i32, i32
  }
}

module attributes {stable_mosaic.version = 11 : i64} {
  func.func @_detnet_kernel_A(%arg0: i32, %arg1: i32, %arg2: memref<1x16x16x8xf32, #tpu.memory_space<vmem>>, %arg3: memref<8x8xf32, #tpu.memory_space<vmem>>, %arg4: memref<1x8xf32, #tpu.memory_space<vmem>>, %arg5: memref<1x8xf32, #tpu.memory_space<vmem>>, %arg6: memref<3x3x8x8xf32, #tpu.memory_space<vmem>>, %arg7: memref<1x8xf32, #tpu.memory_space<vmem>>, %arg8: memref<1x8xf32, #tpu.memory_space<vmem>>, %arg9: memref<8x8xf32, #tpu.memory_space<vmem>>, %arg10: memref<1x8xf32, #tpu.memory_space<vmem>>, %arg11: memref<1x8xf32, #tpu.memory_space<vmem>>, %arg12: memref<1x8x16x8xf32, #tpu.memory_space<vmem>>, %arg13: memref<20x20x8xf32, #tpu.memory_space<vmem>>) attributes {dimension_semantics = [#tpu.dimension_semantics<parallel>, #tpu.dimension_semantics<arbitrary>], iteration_bounds = array<i64: 2, 2>, scalar_prefetch = 0 : i64, scratch_operands = 1 : i64, tpu.core_type = #tpu.core_type<tc>, window_params = [{transform_indices = @transform_0, window_bounds = array<i64: 1, 16, 16, 8>}, {pipeline_mode = #tpu.pipeline_mode<synchronous>, transform_indices = @transform_1, window_bounds = array<i64: 8, 8>}, {pipeline_mode = #tpu.pipeline_mode<synchronous>, transform_indices = @transform_2, window_bounds = array<i64: 1, 8>}, {pipeline_mode = #tpu.pipeline_mode<synchronous>, transform_indices = @transform_3, window_bounds = array<i64: 1, 8>}, {pipeline_mode = #tpu.pipeline_mode<synchronous>, transform_indices = @transform_4, window_bounds = array<i64: 3, 3, 8, 8>}, {pipeline_mode = #tpu.pipeline_mode<synchronous>, transform_indices = @transform_5, window_bounds = array<i64: 1, 8>}, {pipeline_mode = #tpu.pipeline_mode<synchronous>, transform_indices = @transform_6, window_bounds = array<i64: 1, 8>}, {pipeline_mode = #tpu.pipeline_mode<synchronous>, transform_indices = @transform_7, window_bounds = array<i64: 8, 8>}, {pipeline_mode = #tpu.pipeline_mode<synchronous>, transform_indices = @transform_8, window_bounds = array<i64: 1, 8>}, {pipeline_mode = #tpu.pipeline_mode<synchronous>, transform_indices = @transform_9, window_bounds = array<i64: 1, 8>}, {transform_indices = @transform_10, window_bounds = array<i64: 1, 8, 16, 8>}]} {
    %c0_i32 = arith.constant 0 : i32
    %0 = arith.cmpi eq, %arg1, %c0_i32 : i32
    %1 = arith.extui %0 : i1 to i32
    %c0_i32_0 = arith.constant 0 : i32
    %2 = arith.cmpi ne, %1, %c0_i32_0 : i32
    scf.if %2 {
      %cst_70 = arith.constant 0.000000e+00 : f32
      %94 = vector.broadcast %cst_70 : f32 to vector<20x20x8xf32>
      %c0_71 = arith.constant 0 : index
      %c0_72 = arith.constant 0 : index
      %c0_73 = arith.constant 0 : index
      %95 = vector.load %arg13[%c0_71, %c0_72, %c0_73] : memref<20x20x8xf32, #tpu.memory_space<vmem>>, vector<20x20x8xf32>
      tpu.vector_store %arg13[%c0_71, %c0_72, %c0_73], %94 {strides = array<i32>} : memref<20x20x8xf32, #tpu.memory_space<vmem>>, vector<20x20x8xf32>,
      %c0_74 = arith.constant 0 : index
      %c0_75 = arith.constant 0 : index
      %c0_76 = arith.constant 0 : index
      %c0_77 = arith.constant 0 : index
      %96 = vector.load %arg2[%c0_74, %c0_75, %c0_76, %c0_77] : memref<1x16x16x8xf32, #tpu.memory_space<vmem>>, vector<1x8x16x8xf32>
      %97 = vector.shape_cast %96 : vector<1x8x16x8xf32> to vector<8x16x8xf32>
      %98 = vector.shape_cast %97 : vector<8x16x8xf32> to vector<128x8xf32>
      %c0_78 = arith.constant 0 : index
      %c0_79 = arith.constant 0 : index
      %99 = vector.load %arg3[%c0_78, %c0_79] : memref<8x8xf32, #tpu.memory_space<vmem>>, vector<8x8xf32>
      %cst_80 = arith.constant dense<0.000000e+00> : vector<128x8xf32>
      %100 = tpu.matmul %98, %99, %cst_80 {dimension_numbers = #tpu.dot_dimension_numbers<[1], [0], [0], [1], [0, 0, 1, 1], [], []>} : vector<128x8xf32>, vector<8x8xf32>, vector<128x8xf32> -> vector<128x8xf32>
      %c0_81 = arith.constant 0 : index
      %c0_82 = arith.constant 0 : index
      %101 = vector.load %arg4[%c0_81, %c0_82] : memref<1x8xf32, #tpu.memory_space<vmem>>, vector<1x8xf32>
      %102 = vector.broadcast %101 : vector<1x8xf32> to vector<128x8xf32>
      %103 = arith.mulf %100, %102 : vector<128x8xf32>
      %c0_83 = arith.constant 0 : index
      %c0_84 = arith.constant 0 : index
      %104 = vector.load %arg5[%c0_83, %c0_84] : memref<1x8xf32, #tpu.memory_space<vmem>>, vector<1x8xf32>
      %105 = vector.broadcast %104 : vector<1x8xf32> to vector<128x8xf32>
      %106 = arith.addf %103, %105 : vector<128x8xf32>
      %cst_85 = arith.constant 0.000000e+00 : f32
      %107 = vector.broadcast %cst_85 : f32 to vector<128x8xf32>
      %108 = arith.maximumf %106, %107 : vector<128x8xf32>
      %109 = vector.shape_cast %108 : vector<128x8xf32> to vector<8x16x8xf32>
      %c2_86 = arith.constant 2 : index
      %c2_87 = arith.constant 2 : index
      %c0_88 = arith.constant 0 : index
      %110 = vector.load %arg13[%c2_86, %c2_87, %c0_88] : memref<20x20x8xf32, #tpu.memory_space<vmem>>, vector<8x16x8xf32>
      tpu.vector_store %arg13[%c2_86, %c2_87, %c0_88], %109 {strides = array<i32>} : memref<20x20x8xf32, #tpu.memory_space<vmem>>, vector<8x16x8xf32>,
      %c0_89 = arith.constant 0 : index
      %c8 = arith.constant 8 : index
      %c0_90 = arith.constant 0 : index
      %c0_91 = arith.constant 0 : index
      %111 = vector.load %arg2[%c0_89, %c8, %c0_90, %c0_91] : memref<1x16x16x8xf32, #tpu.memory_space<vmem>>, vector<1x8x16x8xf32>
      %112 = vector.shape_cast %111 : vector<1x8x16x8xf32> to vector<8x16x8xf32>
      %113 = vector.shape_cast %112 : vector<8x16x8xf32> to vector<128x8xf32>
      %c0_92 = arith.constant 0 : index
      %c0_93 = arith.constant 0 : index
      %114 = vector.load %arg3[%c0_92, %c0_93] : memref<8x8xf32, #tpu.memory_space<vmem>>, vector<8x8xf32>
      %cst_94 = arith.constant dense<0.000000e+00> : vector<128x8xf32>
      %115 = tpu.matmul %113, %114, %cst_94 {dimension_numbers = #tpu.dot_dimension_numbers<[1], [0], [0], [1], [0, 0, 1, 1], [], []>} : vector<128x8xf32>, vector<8x8xf32>, vector<128x8xf32> -> vector<128x8xf32>
      %c0_95 = arith.constant 0 : index
      %c0_96 = arith.constant 0 : index
      %116 = vector.load %arg4[%c0_95, %c0_96] : memref<1x8xf32, #tpu.memory_space<vmem>>, vector<1x8xf32>
      %117 = vector.broadcast %116 : vector<1x8xf32> to vector<128x8xf32>
      %118 = arith.mulf %115, %117 : vector<128x8xf32>
      %c0_97 = arith.constant 0 : index
      %c0_98 = arith.constant 0 : index
      %119 = vector.load %arg5[%c0_97, %c0_98] : memref<1x8xf32, #tpu.memory_space<vmem>>, vector<1x8xf32>
      %120 = vector.broadcast %119 : vector<1x8xf32> to vector<128x8xf32>
      %121 = arith.addf %118, %120 : vector<128x8xf32>
      %cst_99 = arith.constant 0.000000e+00 : f32
      %122 = vector.broadcast %cst_99 : f32 to vector<128x8xf32>
      %123 = arith.maximumf %121, %122 : vector<128x8xf32>
      %124 = vector.shape_cast %123 : vector<128x8xf32> to vector<8x16x8xf32>
      %c10 = arith.constant 10 : index
      %c2_100 = arith.constant 2 : index
      %c0_101 = arith.constant 0 : index
      %125 = vector.load %arg13[%c10, %c2_100, %c0_101] : memref<20x20x8xf32, #tpu.memory_space<vmem>>, vector<8x16x8xf32>
      tpu.vector_store %arg13[%c10, %c2_100, %c0_101], %124 {strides = array<i32>} : memref<20x20x8xf32, #tpu.memory_space<vmem>>, vector<8x16x8xf32>,
    } else {
    }
    %c8_i32 = arith.constant 8 : i32
    %3 = arith.muli %arg1, %c8_i32 : i32
    %4 = tpu.assume_multiple %3, 8 : i32
    %cst = arith.constant 0.000000e+00 : f32
    %5 = vector.broadcast %cst : f32 to vector<128x8xf32>
    %c0_i32_1 = arith.constant 0 : i32
    %6 = arith.addi %4, %c0_i32_1 : i32
    %7 = arith.index_cast %6 : i32 to index
    %c0 = arith.constant 0 : index
    %c0_2 = arith.constant 0 : index
    %8 = vector.load %arg13[%7, %c0, %c0_2] : memref<20x20x8xf32, #tpu.memory_space<vmem>>, vector<8x20x8xf32>
    %9 = vector.extract_strided_slice %8 {offsets = [0, 0, 0], sizes = [8, 16, 8], strides = [1, 1, 1]} : vector<8x20x8xf32> to vector<8x16x8xf32>
    %10 = vector.shape_cast %9 : vector<8x16x8xf32> to vector<128x8xf32>
    %c0_3 = arith.constant 0 : index
    %c0_4 = arith.constant 0 : index
    %c0_5 = arith.constant 0 : index
    %c0_6 = arith.constant 0 : index
    %11 = vector.load %arg6[%c0_3, %c0_4, %c0_5, %c0_6] : memref<3x3x8x8xf32, #tpu.memory_space<vmem>>, vector<1x1x8x8xf32>
    %12 = vector.shape_cast %11 : vector<1x1x8x8xf32> to vector<8x8xf32>
    %cst_7 = arith.constant dense<0.000000e+00> : vector<128x8xf32>
    %13 = tpu.matmul %10, %12, %cst_7 {dimension_numbers = #tpu.dot_dimension_numbers<[1], [0], [0], [1], [0, 0, 1, 1], [], []>} : vector<128x8xf32>, vector<8x8xf32>, vector<128x8xf32> -> vector<128x8xf32>
    %14 = arith.addf %5, %13 : vector<128x8xf32>
    %15 = vector.extract_strided_slice %8 {offsets = [0, 2, 0], sizes = [8, 16, 8], strides = [1, 1, 1]} : vector<8x20x8xf32> to vector<8x16x8xf32>
    %16 = vector.shape_cast %15 : vector<8x16x8xf32> to vector<128x8xf32>
    %c0_8 = arith.constant 0 : index
    %c1 = arith.constant 1 : index
    %c0_9 = arith.constant 0 : index
    %c0_10 = arith.constant 0 : index
    %17 = vector.load %arg6[%c0_8, %c1, %c0_9, %c0_10] : memref<3x3x8x8xf32, #tpu.memory_space<vmem>>, vector<1x1x8x8xf32>
    %18 = vector.shape_cast %17 : vector<1x1x8x8xf32> to vector<8x8xf32>
    %cst_11 = arith.constant dense<0.000000e+00> : vector<128x8xf32>
    %19 = tpu.matmul %16, %18, %cst_11 {dimension_numbers = #tpu.dot_dimension_numbers<[1], [0], [0], [1], [0, 0, 1, 1], [], []>} : vector<128x8xf32>, vector<8x8xf32>, vector<128x8xf32> -> vector<128x8xf32>
    %20 = arith.addf %14, %19 : vector<128x8xf32>
    %21 = vector.extract_strided_slice %8 {offsets = [0, 4, 0], sizes = [8, 16, 8], strides = [1, 1, 1]} : vector<8x20x8xf32> to vector<8x16x8xf32>
    %22 = vector.shape_cast %21 : vector<8x16x8xf32> to vector<128x8xf32>
    %c0_12 = arith.constant 0 : index
    %c2 = arith.constant 2 : index
    %c0_13 = arith.constant 0 : index
    %c0_14 = arith.constant 0 : index
    %23 = vector.load %arg6[%c0_12, %c2, %c0_13, %c0_14] : memref<3x3x8x8xf32, #tpu.memory_space<vmem>>, vector<1x1x8x8xf32>
    %24 = vector.shape_cast %23 : vector<1x1x8x8xf32> to vector<8x8xf32>
    %cst_15 = arith.constant dense<0.000000e+00> : vector<128x8xf32>
    %25 = tpu.matmul %22, %24, %cst_15 {dimension_numbers = #tpu.dot_dimension_numbers<[1], [0], [0], [1], [0, 0, 1, 1], [], []>} : vector<128x8xf32>, vector<8x8xf32>, vector<128x8xf32> -> vector<128x8xf32>
    %26 = arith.addf %20, %25 : vector<128x8xf32>
    %c2_i32 = arith.constant 2 : i32
    %27 = arith.addi %4, %c2_i32 : i32
    %28 = arith.index_cast %27 : i32 to index
    %c0_16 = arith.constant 0 : index
    %c0_17 = arith.constant 0 : index
    %29 = vector.load %arg13[%28, %c0_16, %c0_17] : memref<20x20x8xf32, #tpu.memory_space<vmem>>, vector<8x20x8xf32>
    %30 = vector.extract_strided_slice %29 {offsets = [0, 0, 0], sizes = [8, 16, 8], strides = [1, 1, 1]} : vector<8x20x8xf32> to vector<8x16x8xf32>
    %31 = vector.shape_cast %30 : vector<8x16x8xf32> to vector<128x8xf32>
    %c1_18 = arith.constant 1 : index
    %c0_19 = arith.constant 0 : index
    %c0_20 = arith.constant 0 : index
    %c0_21 = arith.constant 0 : index
    %32 = vector.load %arg6[%c1_18, %c0_19, %c0_20, %c0_21] : memref<3x3x8x8xf32, #tpu.memory_space<vmem>>, vector<1x1x8x8xf32>
    %33 = vector.shape_cast %32 : vector<1x1x8x8xf32> to vector<8x8xf32>
    %cst_22 = arith.constant dense<0.000000e+00> : vector<128x8xf32>
    %34 = tpu.matmul %31, %33, %cst_22 {dimension_numbers = #tpu.dot_dimension_numbers<[1], [0], [0], [1], [0, 0, 1, 1], [], []>} : vector<128x8xf32>, vector<8x8xf32>, vector<128x8xf32> -> vector<128x8xf32>
    %35 = arith.addf %26, %34 : vector<128x8xf32>
    %36 = vector.extract_strided_slice %29 {offsets = [0, 2, 0], sizes = [8, 16, 8], strides = [1, 1, 1]} : vector<8x20x8xf32> to vector<8x16x8xf32>
    %37 = vector.shape_cast %36 : vector<8x16x8xf32> to vector<128x8xf32>
    %c1_23 = arith.constant 1 : index
    %c1_24 = arith.constant 1 : index
    %c0_25 = arith.constant 0 : index
    %c0_26 = arith.constant 0 : index
    %38 = vector.load %arg6[%c1_23, %c1_24, %c0_25, %c0_26] : memref<3x3x8x8xf32, #tpu.memory_space<vmem>>, vector<1x1x8x8xf32>
    %39 = vector.shape_cast %38 : vector<1x1x8x8xf32> to vector<8x8xf32>
    %cst_27 = arith.constant dense<0.000000e+00> : vector<128x8xf32>
    %40 = tpu.matmul %37, %39, %cst_27 {dimension_numbers = #tpu.dot_dimension_numbers<[1], [0], [0], [1], [0, 0, 1, 1], [], []>} : vector<128x8xf32>, vector<8x8xf32>, vector<128x8xf32> -> vector<128x8xf32>
    %41 = arith.addf %35, %40 : vector<128x8xf32>
    %42 = vector.extract_strided_slice %29 {offsets = [0, 4, 0], sizes = [8, 16, 8], strides = [1, 1, 1]} : vector<8x20x8xf32> to vector<8x16x8xf32>
    %43 = vector.shape_cast %42 : vector<8x16x8xf32> to vector<128x8xf32>
    %c1_28 = arith.constant 1 : index
    %c2_29 = arith.constant 2 : index
    %c0_30 = arith.constant 0 : index
    %c0_31 = arith.constant 0 : index
    %44 = vector.load %arg6[%c1_28, %c2_29, %c0_30, %c0_31] : memref<3x3x8x8xf32, #tpu.memory_space<vmem>>, vector<1x1x8x8xf32>
    %45 = vector.shape_cast %44 : vector<1x1x8x8xf32> to vector<8x8xf32>
    %cst_32 = arith.constant dense<0.000000e+00> : vector<128x8xf32>
    %46 = tpu.matmul %43, %45, %cst_32 {dimension_numbers = #tpu.dot_dimension_numbers<[1], [0], [0], [1], [0, 0, 1, 1], [], []>} : vector<128x8xf32>, vector<8x8xf32>, vector<128x8xf32> -> vector<128x8xf32>
    %47 = arith.addf %41, %46 : vector<128x8xf32>
    %c4_i32 = arith.constant 4 : i32
    %48 = arith.addi %4, %c4_i32 : i32
    %49 = arith.index_cast %48 : i32 to index
    %c0_33 = arith.constant 0 : index
    %c0_34 = arith.constant 0 : index
    %50 = vector.load %arg13[%49, %c0_33, %c0_34] : memref<20x20x8xf32, #tpu.memory_space<vmem>>, vector<8x20x8xf32>
    %51 = vector.extract_strided_slice %50 {offsets = [0, 0, 0], sizes = [8, 16, 8], strides = [1, 1, 1]} : vector<8x20x8xf32> to vector<8x16x8xf32>
    %52 = vector.shape_cast %51 : vector<8x16x8xf32> to vector<128x8xf32>
    %c2_35 = arith.constant 2 : index
    %c0_36 = arith.constant 0 : index
    %c0_37 = arith.constant 0 : index
    %c0_38 = arith.constant 0 : index
    %53 = vector.load %arg6[%c2_35, %c0_36, %c0_37, %c0_38] : memref<3x3x8x8xf32, #tpu.memory_space<vmem>>, vector<1x1x8x8xf32>
    %54 = vector.shape_cast %53 : vector<1x1x8x8xf32> to vector<8x8xf32>
    %cst_39 = arith.constant dense<0.000000e+00> : vector<128x8xf32>
    %55 = tpu.matmul %52, %54, %cst_39 {dimension_numbers = #tpu.dot_dimension_numbers<[1], [0], [0], [1], [0, 0, 1, 1], [], []>} : vector<128x8xf32>, vector<8x8xf32>, vector<128x8xf32> -> vector<128x8xf32>
    %56 = arith.addf %47, %55 : vector<128x8xf32>
    %57 = vector.extract_strided_slice %50 {offsets = [0, 2, 0], sizes = [8, 16, 8], strides = [1, 1, 1]} : vector<8x20x8xf32> to vector<8x16x8xf32>
    %58 = vector.shape_cast %57 : vector<8x16x8xf32> to vector<128x8xf32>
    %c2_40 = arith.constant 2 : index
    %c1_41 = arith.constant 1 : index
    %c0_42 = arith.constant 0 : index
    %c0_43 = arith.constant 0 : index
    %59 = vector.load %arg6[%c2_40, %c1_41, %c0_42, %c0_43] : memref<3x3x8x8xf32, #tpu.memory_space<vmem>>, vector<1x1x8x8xf32>
    %60 = vector.shape_cast %59 : vector<1x1x8x8xf32> to vector<8x8xf32>
    %cst_44 = arith.constant dense<0.000000e+00> : vector<128x8xf32>
    %61 = tpu.matmul %58, %60, %cst_44 {dimension_numbers = #tpu.dot_dimension_numbers<[1], [0], [0], [1], [0, 0, 1, 1], [], []>} : vector<128x8xf32>, vector<8x8xf32>, vector<128x8xf32> -> vector<128x8xf32>
    %62 = arith.addf %56, %61 : vector<128x8xf32>
    %63 = vector.extract_strided_slice %50 {offsets = [0, 4, 0], sizes = [8, 16, 8], strides = [1, 1, 1]} : vector<8x20x8xf32> to vector<8x16x8xf32>
    %64 = vector.shape_cast %63 : vector<8x16x8xf32> to vector<128x8xf32>
    %c2_45 = arith.constant 2 : index
    %c2_46 = arith.constant 2 : index
    %c0_47 = arith.constant 0 : index
    %c0_48 = arith.constant 0 : index
    %65 = vector.load %arg6[%c2_45, %c2_46, %c0_47, %c0_48] : memref<3x3x8x8xf32, #tpu.memory_space<vmem>>, vector<1x1x8x8xf32>
    %66 = vector.shape_cast %65 : vector<1x1x8x8xf32> to vector<8x8xf32>
    %cst_49 = arith.constant dense<0.000000e+00> : vector<128x8xf32>
    %67 = tpu.matmul %64, %66, %cst_49 {dimension_numbers = #tpu.dot_dimension_numbers<[1], [0], [0], [1], [0, 0, 1, 1], [], []>} : vector<128x8xf32>, vector<8x8xf32>, vector<128x8xf32> -> vector<128x8xf32>
    %68 = arith.addf %62, %67 : vector<128x8xf32>
    %c0_50 = arith.constant 0 : index
    %c0_51 = arith.constant 0 : index
    %69 = vector.load %arg7[%c0_50, %c0_51] : memref<1x8xf32, #tpu.memory_space<vmem>>, vector<1x8xf32>
    %70 = vector.broadcast %69 : vector<1x8xf32> to vector<128x8xf32>
    %71 = arith.mulf %68, %70 : vector<128x8xf32>
    %c0_52 = arith.constant 0 : index
    %c0_53 = arith.constant 0 : index
    %72 = vector.load %arg8[%c0_52, %c0_53] : memref<1x8xf32, #tpu.memory_space<vmem>>, vector<1x8xf32>
    %73 = vector.broadcast %72 : vector<1x8xf32> to vector<128x8xf32>
    %74 = arith.addf %71, %73 : vector<128x8xf32>
    %cst_54 = arith.constant 0.000000e+00 : f32
    %75 = vector.broadcast %cst_54 : f32 to vector<128x8xf32>
    %76 = arith.maximumf %74, %75 : vector<128x8xf32>
    %c0_55 = arith.constant 0 : index
    %c0_56 = arith.constant 0 : index
    %77 = vector.load %arg9[%c0_55, %c0_56] : memref<8x8xf32, #tpu.memory_space<vmem>>, vector<8x8xf32>
    %cst_57 = arith.constant dense<0.000000e+00> : vector<128x8xf32>
    %78 = tpu.matmul %76, %77, %cst_57 {dimension_numbers = #tpu.dot_dimension_numbers<[1], [0], [0], [1], [0, 0, 1, 1], [], []>} : vector<128x8xf32>, vector<8x8xf32>, vector<128x8xf32> -> vector<128x8xf32>
    %c0_58 = arith.constant 0 : index
    %c0_59 = arith.constant 0 : index
    %79 = vector.load %arg10[%c0_58, %c0_59] : memref<1x8xf32, #tpu.memory_space<vmem>>, vector<1x8xf32>
    %80 = vector.broadcast %79 : vector<1x8xf32> to vector<128x8xf32>
    %81 = arith.mulf %78, %80 : vector<128x8xf32>
    %c0_60 = arith.constant 0 : index
    %c0_61 = arith.constant 0 : index
    %82 = vector.load %arg11[%c0_60, %c0_61] : memref<1x8xf32, #tpu.memory_space<vmem>>, vector<1x8xf32>
    %83 = vector.broadcast %82 : vector<1x8xf32> to vector<128x8xf32>
    %84 = arith.addf %81, %83 : vector<128x8xf32>
    %c0_62 = arith.constant 0 : index
    %85 = arith.index_cast %4 : i32 to index
    %c0_63 = arith.constant 0 : index
    %c0_64 = arith.constant 0 : index
    %86 = vector.load %arg2[%c0_62, %85, %c0_63, %c0_64] : memref<1x16x16x8xf32, #tpu.memory_space<vmem>>, vector<1x8x16x8xf32>
    %87 = vector.shape_cast %86 : vector<1x8x16x8xf32> to vector<8x16x8xf32>
    %88 = vector.shape_cast %87 : vector<8x16x8xf32> to vector<128x8xf32>
    %89 = arith.addf %84, %88 : vector<128x8xf32>
    %cst_65 = arith.constant 0.000000e+00 : f32
    %90 = vector.broadcast %cst_65 : f32 to vector<128x8xf32>
    %91 = arith.maximumf %89, %90 : vector<128x8xf32>
    %92 = vector.shape_cast %91 : vector<128x8xf32> to vector<1x8x16x8xf32>
    %c0_66 = arith.constant 0 : index
    %c0_67 = arith.constant 0 : index
    %c0_68 = arith.constant 0 : index
    %c0_69 = arith.constant 0 : index
    %93 = vector.load %arg12[%c0_66, %c0_67, %c0_68, %c0_69] : memref<1x8x16x8xf32, #tpu.memory_space<vmem>>, vector<1x8x16x8xf32>
    tpu.vector_store %arg12[%c0_66, %c0_67, %c0_68, %c0_69], %92 {strides = array<i32>} : memref<1x8x16x8xf32, #tpu.memory_space<vmem>>, vector<1x8x16x8xf32>,
    return
  }
  func.func @transform_0(%arg0: i32, %arg1: i32) -> (i32, i32, i32, i32) {
    %c0_i32 = arith.constant 0 : i32
    %c0_i32_0 = arith.constant 0 : i32
    %c0_i32_1 = arith.constant 0 : i32
    %c0_i32_2 = arith.constant 0 : i32
    return %arg0, %c0_i32, %c0_i32_0, %c0_i32_1 : i32, i32, i32, i32
  }
  func.func @transform_1(%arg0: i32, %arg1: i32) -> (i32, i32) {
    %c0_i32 = arith.constant 0 : i32
    %c0_i32_0 = arith.constant 0 : i32
    %c0_i32_1 = arith.constant 0 : i32
    return %c0_i32, %c0_i32_0 : i32, i32
  }
  func.func @transform_2(%arg0: i32, %arg1: i32) -> (i32, i32) {
    %c0_i32 = arith.constant 0 : i32
    %c0_i32_0 = arith.constant 0 : i32
    %c0_i32_1 = arith.constant 0 : i32
    return %c0_i32, %c0_i32_0 : i32, i32
  }
  func.func @transform_3(%arg0: i32, %arg1: i32) -> (i32, i32) {
    %c0_i32 = arith.constant 0 : i32
    %c0_i32_0 = arith.constant 0 : i32
    %c0_i32_1 = arith.constant 0 : i32
    return %c0_i32, %c0_i32_0 : i32, i32
  }
  func.func @transform_4(%arg0: i32, %arg1: i32) -> (i32, i32, i32, i32) {
    %c0_i32 = arith.constant 0 : i32
    %c0_i32_0 = arith.constant 0 : i32
    %c0_i32_1 = arith.constant 0 : i32
    %c0_i32_2 = arith.constant 0 : i32
    %c0_i32_3 = arith.constant 0 : i32
    return %c0_i32, %c0_i32_0, %c0_i32_1, %c0_i32_2 : i32, i32, i32, i32
  }
  func.func @transform_5(%arg0: i32, %arg1: i32) -> (i32, i32) {
    %c0_i32 = arith.constant 0 : i32
    %c0_i32_0 = arith.constant 0 : i32
    %c0_i32_1 = arith.constant 0 : i32
    return %c0_i32, %c0_i32_0 : i32, i32
  }
  func.func @transform_6(%arg0: i32, %arg1: i32) -> (i32, i32) {
    %c0_i32 = arith.constant 0 : i32
    %c0_i32_0 = arith.constant 0 : i32
    %c0_i32_1 = arith.constant 0 : i32
    return %c0_i32, %c0_i32_0 : i32, i32
  }
  func.func @transform_7(%arg0: i32, %arg1: i32) -> (i32, i32) {
    %c0_i32 = arith.constant 0 : i32
    %c0_i32_0 = arith.constant 0 : i32
    %c0_i32_1 = arith.constant 0 : i32
    return %c0_i32, %c0_i32_0 : i32, i32
  }
  func.func @transform_8(%arg0: i32, %arg1: i32) -> (i32, i32) {
    %c0_i32 = arith.constant 0 : i32
    %c0_i32_0 = arith.constant 0 : i32
    %c0_i32_1 = arith.constant 0 : i32
    return %c0_i32, %c0_i32_0 : i32, i32
  }
  func.func @transform_9(%arg0: i32, %arg1: i32) -> (i32, i32) {
    %c0_i32 = arith.constant 0 : i32
    %c0_i32_0 = arith.constant 0 : i32
    %c0_i32_1 = arith.constant 0 : i32
    return %c0_i32, %c0_i32_0 : i32, i32
  }
  func.func @transform_10(%arg0: i32, %arg1: i32) -> (i32, i32, i32, i32) {
    %c0_i32 = arith.constant 0 : i32
    %c0_i32_0 = arith.constant 0 : i32
    %c0_i32_1 = arith.constant 0 : i32
    return %arg0, %arg1, %c0_i32, %c0_i32_0 : i32, i32, i32, i32
  }
}

</mosaic_0001>

<bundles_post_ra>
// kernel: _lambda_.3
= control target key start
LH: loop header
LB: loop body
LE: loop exit
PB: predicated region body
PF: predicated region fallthrough
CT: control target
= control target key end

     0   :  { %s5119_s25 = smov 0   ;;  %s5121_s26 = smov 0   ;;  %s6419_s0 = inlined_call_operand.vmem [shape: f32[2,16,16,16], index: 0, kind: input, shape index: {}]   ;;  %s6420_s1 = inlined_call_operand.vmem [shape: f32[16,8], index: 1, kind: input, shape index: {}]   ;;  %s6421_s2 = inlined_call_operand.vmem [shape: f32[1,8], index: 2, kind: input, shape index: {}]   ;;  %s6422_s3 = inlined_call_operand.vmem [shape: f32[1,8], index: 3, kind: input, shape index: {}]   ;;  %s6423_s4 = inlined_call_operand.vmem [shape: f32[3,3,8,8], index: 4, kind: input, shape index: {}]   ;;  %s6424_s5 = inlined_call_operand.vmem [shape: f32[1,8], index: 5, kind: input, shape index: {}]   ;;  %s6425_s6 = inlined_call_operand.vmem [shape: f32[1,8], index: 6, kind: input, shape index: {}]   ;;  %s6426_s7 = inlined_call_operand.vmem [shape: f32[8,8], index: 7, kind: input, shape index: {}]   ;;  %s6427_s8 = inlined_call_operand.vmem [shape: f32[1,8], index: 8, kind: input, shape index: {}]   ;;  %s6428_s9 = inlined_call_operand.vmem [shape: f32[1,8], index: 9, kind: input, shape index: {}]   ;;  %s6429_s10 = inlined_call_operand.vmem [shape: f32[16,8], index: 10, kind: input, shape index: {}]   ;;  %s6430_s11 = inlined_call_operand.vmem [shape: f32[1,8], index: 11, kind: input, shape index: {}]   ;;  %s6431_s12 = inlined_call_operand.vmem [shape: f32[1,8], index: 12, kind: input, shape index: {}]   ;;  %s6432_s13 = inlined_call_operand.vmem [shape: f32[2,16,16,8], index: 13, kind: output, shape index: {}]  }
   0x1   :  { %s5123_s27 = smov 0   ;;  %s5125_s28 = smov 0  }
   0x2   :  { %s5127_s29 = smov 0  }
   0x3 LB: > { %6471 = sst [smem:[#allocation3_spill]] %s5038_s27  ;;  %s32_s30 = sadd.s32 1, %s5038_s27  ;;  %s5046_s29 = sphi %s5127_s29, %s23_s29   ;;  %s5042_s28 = sphi %s5125_s28, %s6536_s28   ;;  %s5038_s27 = sphi %s5123_s27, %s6535_s27   ;;  %s5034_s26 = sphi %s5121_s26, %s6534_s26   ;;  %s5030_s25 = sphi %s5119_s25, %s6533_s25  }
   0x4   : > { %6472 = sst [smem:[#allocation4_spill]] %s5042_s28  ;;  %s35_s14 = sadd.s32 1, %s5042_s28 }
   0x5   : > { %p33_p0 = scmp.ge.s32.totalorder %s32_s30, 2  ;;  %p3948_p1 = scmp.ge.s32.totalorder %s5046_s29, 1 }
   0x6   : > { %p401_p2 = scmp.lt.s32.totalorder %s5046_s29, 5 }
   0x7   : > { %s6538_s30 = smov (%p33_p0, %s32_s30), 0  ;;  %s6540_s14 = smov (!%p33_p0, %s35_s14), %s5042_s28 }
   0x8   : > { %6473 = sst [smem:[#allocation5_spill]] %s6538_s30  ;;  %p402_p3 = pnand %p3948_p1, %p401_p2 }
   0x9   : > { %p37_p4 = scmp.ge.s32.totalorder %s6540_s14, 2 }
   0xa   : > { %405 = sbr.rel (%p402_p3) target bundleno = 931 (0x3a3), region = 72 }
   0xb   : > { %s6542_s14 = smov (%p37_p4, %s6540_s14), 0 }
   0xc   : > { %6474 = sst [smem:[#allocation6_spill]] %s6542_s14 }
  0x11   : > { %p450_p5 = scmp.lt.s32.totalorder %s5034_s26, 1  ;;  %s3951_s15 = sshll.u32 %s5030_s25, 3 }
  0x12   : > { %p458_p6 = scmp.lt.s32.totalorder %s3951_s15, 15  ;;  %p3955_p7 = scmp.ne.s32.totalorder %s5030_s25, 0 }
  0x13   : > { %s6544_s26 = smov (!%p450_p5, %s5034_s26), 1  ;;  %v548_v0 = vld [vmem:[%s6420_s1] sm:$0xff] (!%p3955_p7)  ;;  %v549_v1 = vld [vmem:[%s6420_s1 + $0x8] sm:$0xff] (!%p3955_p7)  ;;  %vm550_vm0 = vcmask (!%p3955_p7), 130048   ;;  %vm470_vm1 = vcmask (!%p3955_p7), 64512   ;;  %v5048_v5 = vmov (!%p3955_p7), 0.0  }
  0x14   : > { %s6546_s15 = smov (!%p458_p6, %s3951_s15), 15  ;;  %s4255_s16 = sshll.u32 %s6544_s26, 8  ;;  %v5170_v3 = vpack.c.bf16 (!%p3955_p7), %v549_v1, %v548_v0  ;;  %471 = vst.msk [vmem:[#allocation2] sm:$0xff] (!%p3955_p7), %vm470_vm1, %v5048_v5  ;;  %472 = vst.msk [vmem:[#allocation2 + $0x8] sm:$0xff] (!%p3955_p7), %vm470_vm1, %v5048_v5  ;;  %vm473_vm2 = vcmask (!%p3955_p7), 60416  }
  0x15   : > { %s3953_s17 = sshll.u32 %s6544_s26, 5  ;;  %s5155_s20 = scalar_lea.vmem %s6419_s0, %s4255_s16  ;;  %475 = vst.msk [vmem:[#allocation2 + $0x18] sm:$0xff] (!%p3955_p7), %vm470_vm1, %v5048_v5  ;;  %476 = vst.msk [vmem:[#allocation2 + $0x20] sm:$0xff] (!%p3955_p7), %vm470_vm1, %v5048_v5  ;;  %v5302_v36 = vld [vmem:[%s6421_s2] ss:$0 sm:$0xff] (!%p3955_p7) }
  0x16   : > { %s3952_s21 = sshll.u32 %s6546_s15, 1  ;;  %469 = sbr.rel (%p3955_p7) target bundleno = 275 (0x113), region = 76  ;;  %v532_v2 = vld [vmem:[%s5155_s20] sm:$0xff] (!%p3955_p7)  ;;  %479 = vst.msk [vmem:[#allocation2 + $0x38] sm:$0xff] (!%p3955_p7), %vm470_vm1, %v5048_v5  ;;  %526 = vst.msk [vmem:[#allocation2 + $0x1b0] sm:$0xff] (!%p3955_p7), %vm470_vm1, %v5048_v5  ;;  %4826 = vmatprep.subr.bf16.mxu0 (!%p3955_p7), %v5170_v3  ;;  %4830 = vmatprep.subr.bf16.mxu1 (!%p3955_p7), %v5170_v3  ;;  %v533_v6 = vld [vmem:[%s5155_s20 + $0x8] sm:$0xff] (!%p3955_p7) }
  0x17   : > { %s462_s22 = sadd.s32 %s3953_s17, %s3952_s21  ;;  %4485 = vmatprep.mubr.msk.f32.mxu0 (!%p3955_p7), %vm550_vm0, %v532_v2  ;;  %v3974_v4 = vld [vmem:[%s5155_s20 + $0x80] sm:$0xff] (!%p3955_p7)  ;;  %527 = vst.msk [vmem:[#allocation2 + $0x1b8] sm:$0xff] (!%p3955_p7), %vm470_vm1, %v5048_v5  ;;  %529 = vst.msk [vmem:[#allocation2 + $0x1c8] sm:$0xff] (!%p3955_p7), %vm470_vm1, %v5048_v5  ;;  %4828 = vmatpush3.bf16.msra.mxu0 (!%p3955_p7), %v5170_v3  ;;  %v3975_v7 = vld [vmem:[%s5155_s20 + $0x88] sm:$0xff] (!%p3955_p7) }
  0x18   : > { %s3954_s23 = sshll.u32 %s462_s22, 3  ;;  %530 = vst.msk [vmem:[#allocation2 + $0x1d0] sm:$0xff] (!%p3955_p7), %vm470_vm1, %v5048_v5  ;;  %478 = vst.msk [vmem:[#allocation2 + $0x30] sm:$0xff] (!%p3955_p7), %vm470_vm1, %v5048_v5  ;;  %4513 = vmatprep.mubr.msk.f32.mxu1 (!%p3955_p7), %vm550_vm0, %v3974_v4  ;;  %4832 = vmatpush3.bf16.msra.mxu1 (!%p3955_p7), %v5170_v3  ;;  %v534_v8 = vld [vmem:[%s5155_s20 + $0x10] sm:$0xff] (!%p3955_p7)  ;;  %v535_v10 = vld [vmem:[%s5155_s20 + $0x18] sm:$0xff] (!%p3955_p7) }
  0x19   : > { %s5160_s14 = scalar_lea.vmem %s6432_s13, %s3954_s23  ;;  %481 = vst.msk [vmem:[#allocation2 + $0x48] sm:$0xff] (!%p3955_p7), %vm470_vm1, %v5048_v5  ;;  %482 = vst.msk [vmem:[#allocation2 + $0x50] sm:$0xff] (!%p3955_p7), %vm470_vm1, %v5048_v5  ;;  %v3976_v9 = vld [vmem:[%s5155_s20 + $0x90] sm:$0xff] (!%p3955_p7)  ;;  %v3977_v11 = vld [vmem:[%s5155_s20 + $0x98] sm:$0xff] (!%p3955_p7) }
  0x1a   : > { %484 = vst.msk [vmem:[#allocation2 + $0x60] sm:$0xff] (!%p3955_p7), %vm470_vm1, %v5048_v5  ;;  %485 = vst.msk [vmem:[#allocation2 + $0x68] sm:$0xff] (!%p3955_p7), %vm470_vm1, %v5048_v5  ;;  %4486 = vmatmul.mubr.msk.f32.vlgmr.msra.gmra.mrb[0].mxu0 (!%p3955_p7), %vm550_vm0, %v533_v6  ;;  %v536_v12 = vld [vmem:[%s5155_s20 + $0x20] sm:$0xff] (!%p3955_p7)  ;;  %v537_v14 = vld [vmem:[%s5155_s20 + $0x28] sm:$0xff] (!%p3955_p7) }
  0x1b   : > { %487 = vst.msk [vmem:[#allocation2 + $0x78] sm:$0xff] (!%p3955_p7), %vm470_vm1, %v5048_v5  ;;  %488 = vst.msk [vmem:[#allocation2 + $0x80] sm:$0xff] (!%p3955_p7), %vm470_vm1, %v5048_v5  ;;  %4514 = vmatmul.mubr.msk.f32.vlgmr.msra.gmra.mrb[0].mxu1 (!%p3955_p7), %vm550_vm0, %v3975_v7  ;;  %4488 = vmatprep.mubr.msk.f32.mxu0 (!%p3955_p7), %vm550_vm0, %v534_v8  ;;  %v3978_v13 = vld [vmem:[%s5155_s20 + $0xa0] sm:$0xff] (!%p3955_p7)  ;;  %v3979_v15 = vld [vmem:[%s5155_s20 + $0xa8] sm:$0xff] (!%p3955_p7) }
  0x1c   : > { %490 = vst.msk [vmem:[#allocation2 + $0x90] sm:$0xff] (!%p3955_p7), %vm470_vm1, %v5048_v5  ;;  %491 = vst.msk [vmem:[#allocation2 + $0x98] sm:$0xff] (!%p3955_p7), %vm470_vm1, %v5048_v5  ;;  %4516 = vmatprep.mubr.msk.f32.mxu1 (!%p3955_p7), %vm550_vm0, %v3976_v9  ;;  %v538_v16 = vld [vmem:[%s5155_s20 + $0x30] sm:$0xff] (!%p3955_p7)  ;;  %v539_v18 = vld [vmem:[%s5155_s20 + $0x38] sm:$0xff] (!%p3955_p7) }
  0x1d   : > { %493 = vst.msk [vmem:[#allocation2 + $0xa8] sm:$0xff] %vm470_vm1, %v5048_v5  ;;  %494 = vst.msk [vmem:[#allocation2 + $0xb0] sm:$0xff] %vm470_vm1, %v5048_v5  ;;  %v3980_v17 = vld [vmem:[%s5155_s20 + $0xb0] sm:$0xff]  ;;  %v3981_v19 = vld [vmem:[%s5155_s20 + $0xb8] sm:$0xff] }
  0x1e   : > { %496 = vst.msk [vmem:[#allocation2 + $0xc0] sm:$0xff] %vm470_vm1, %v5048_v5  ;;  %497 = vst.msk [vmem:[#allocation2 + $0xc8] sm:$0xff] %vm470_vm1, %v5048_v5  ;;  %4489 = vmatmul.mubr.msk.f32.gmra.mrb[2].mxu0 %vm550_vm0, %v535_v10  ;;  %v540_v20 = vld [vmem:[%s5155_s20 + $0x40] sm:$0xff]  ;;  %v541_v22 = vld [vmem:[%s5155_s20 + $0x48] sm:$0xff] }
  0x1f   : > { %499 = vst.msk [vmem:[#allocation2 + $0xd8] sm:$0xff] %vm470_vm1, %v5048_v5  ;;  %500 = vst.msk [vmem:[#allocation2 + $0xe0] sm:$0xff] %vm470_vm1, %v5048_v5  ;;  %4517 = vmatmul.mubr.msk.f32.gmra.mrb[2].mxu1 %vm550_vm0, %v3977_v11  ;;  %4491 = vmatprep.mubr.msk.f32.mxu0 %vm550_vm0, %v536_v12  ;;  %v3982_v21 = vld [vmem:[%s5155_s20 + $0xc0] sm:$0xff]  ;;  %v3983_v23 = vld [vmem:[%s5155_s20 + $0xc8] sm:$0xff] }
  0x20   : > { %502 = vst.msk [vmem:[#allocation2 + $0xf0] sm:$0xff] %vm470_vm1, %v5048_v5  ;;  %503 = vst.msk [vmem:[#allocation2 + $0xf8] sm:$0xff] %vm470_vm1, %v5048_v5  ;;  %4519 = vmatprep.mubr.msk.f32.mxu1 %vm550_vm0, %v3978_v13  ;;  %v542_v24 = vld [vmem:[%s5155_s20 + $0x50] sm:$0xff]  ;;  %v543_v26 = vld [vmem:[%s5155_s20 + $0x58] sm:$0xff] }
  0x21   : > { %505 = vst.msk [vmem:[#allocation2 + $0x108] sm:$0xff] %vm470_vm1, %v5048_v5  ;;  %506 = vst.msk [vmem:[#allocation2 + $0x110] sm:$0xff] %vm470_vm1, %v5048_v5  ;;  %v3984_v25 = vld [vmem:[%s5155_s20 + $0xd0] sm:$0xff]  ;;  %v3985_v27 = vld [vmem:[%s5155_s20 + $0xd8] sm:$0xff] }
  0x22   : > { %508 = vst.msk [vmem:[#allocation2 + $0x120] sm:$0xff] %vm470_vm1, %v5048_v5  ;;  %509 = vst.msk [vmem:[#allocation2 + $0x128] sm:$0xff] %vm470_vm1, %v5048_v5  ;;  %4492 = vmatmul.mubr.msk.f32.gmra.mrb[4].mxu0 %vm550_vm0, %v537_v14  ;;  %v544_v28 = vld [vmem:[%s5155_s20 + $0x60] sm:$0xff]  ;;  %v545_v30 = vld [vmem:[%s5155_s20 + $0x68] sm:$0xff] }
  0x23   : > { %511 = vst.msk [vmem:[#allocation2 + $0x138] sm:$0xff] %vm470_vm1, %v5048_v5  ;;  %512 = vst.msk [vmem:[#allocation2 + $0x140] sm:$0xff] %vm470_vm1, %v5048_v5  ;;  %4520 = vmatmul.mubr.msk.f32.gmra.mrb[4].mxu1 %vm550_vm0, %v3979_v15  ;;  %4494 = vmatprep.mubr.msk.f32.mxu0 %vm550_vm0, %v538_v16  ;;  %v3986_v29 = vld [vmem:[%s5155_s20 + $0xe0] sm:$0xff]  ;;  %v3987_v31 = vld [vmem:[%s5155_s20 + $0xe8] sm:$0xff] }
  0x24   : > { %514 = vst.msk [vmem:[#allocation2 + $0x150] sm:$0xff] %vm470_vm1, %v5048_v5  ;;  %515 = vst.msk [vmem:[#allocation2 + $0x158] sm:$0xff] %vm470_vm1, %v5048_v5  ;;  %4522 = vmatprep.mubr.msk.f32.mxu1 %vm550_vm0, %v3980_v17  ;;  %v546_v32 = vld [vmem:[%s5155_s20 + $0x70] sm:$0xff]  ;;  %v547_v34 = vld [vmem:[%s5155_s20 + $0x78] sm:$0xff] }
  0x25   : > { %517 = vst.msk [vmem:[#allocation2 + $0x168] sm:$0xff] %vm470_vm1, %v5048_v5  ;;  %518 = vst.msk [vmem:[#allocation2 + $0x170] sm:$0xff] %vm470_vm1, %v5048_v5  ;;  %v3988_v33 = vld [vmem:[%s5155_s20 + $0xf0] sm:$0xff]  ;;  %v3989_v35 = vld [vmem:[%s5155_s20 + $0xf8] sm:$0xff] }
  0x26   : > { %520 = vst.msk [vmem:[#allocation2 + $0x180] sm:$0xff] %vm470_vm1, %v5048_v5  ;;  %521 = vst.msk [vmem:[#allocation2 + $0x188] sm:$0xff] %vm470_vm1, %v5048_v5  ;;  %4495 = vmatmul.mubr.msk.f32.gmra.mrb[6].mxu0 %vm550_vm0, %v539_v18  ;;  %v5307_v38 = vld [vmem:[%s6422_s3] ss:$0 sm:$0xff] }
  0x27   : > { %523 = vst.msk [vmem:[#allocation2 + $0x198] sm:$0xff] %vm470_vm1, %v5048_v5  ;;  %524 = vst.msk [vmem:[#allocation2 + $0x1a0] sm:$0xff] %vm470_vm1, %v5048_v5  ;;  %4523 = vmatmul.mubr.msk.f32.gmra.mrb[6].mxu1 %vm550_vm0, %v3981_v19  ;;  %4497 = vmatprep.mubr.msk.f32.mxu0 %vm550_vm0, %v540_v20 }
  0x28   : > { %474 = vst.msk [vmem:[#allocation2 + $0x10] sm:$0xf] %vm473_vm2, %v5048_v5  ;;  %477 = vst.msk [vmem:[#allocation2 + $0x28] sm:$0xf] %vm473_vm2, %v5048_v5  ;;  %4525 = vmatprep.mubr.msk.f32.mxu1 %vm550_vm0, %v3982_v21 }
  0x29   : > { %480 = vst.msk [vmem:[#allocation2 + $0x40] sm:$0xf] %vm473_vm2, %v5048_v5  ;;  %528 = vst.msk [vmem:[#allocation2 + $0x1c0] sm:$0xf] %vm473_vm2, %v5048_v5 }
  0x2a   : > { %531 = vst.msk [vmem:[#allocation2 + $0x1d8] sm:$0xf] %vm473_vm2, %v5048_v5  ;;  %483 = vst.msk [vmem:[#allocation2 + $0x58] sm:$0xf] %vm473_vm2, %v5048_v5  ;;  %4498 = vmatmul.mubr.msk.f32.gmra.mrb[8].mxu0 %vm550_vm0, %v541_v22 }
  0x2b   : > { %486 = vst.msk [vmem:[#allocation2 + $0x70] sm:$0xf] %vm473_vm2, %v5048_v5  ;;  %489 = vst.msk [vmem:[#allocation2 + $0x88] sm:$0xf] %vm473_vm2, %v5048_v5  ;;  %4526 = vmatmul.mubr.msk.f32.gmra.mrb[8].mxu1 %vm550_vm0, %v3983_v23  ;;  %4500 = vmatprep.mubr.msk.f32.mxu0 %vm550_vm0, %v542_v24 }
  0x2c   : > { %492 = vst.msk [vmem:[#allocation2 + $0xa0] sm:$0xf] %vm473_vm2, %v5048_v5  ;;  %495 = vst.msk [vmem:[#allocation2 + $0xb8] sm:$0xf] %vm473_vm2, %v5048_v5  ;;  %4528 = vmatprep.mubr.msk.f32.mxu1 %vm550_vm0, %v3984_v25 }
  0x2d   : > { %498 = vst.msk [vmem:[#allocation2 + $0xd0] sm:$0xf] %vm473_vm2, %v5048_v5  ;;  %501 = vst.msk [vmem:[#allocation2 + $0xe8] sm:$0xf] %vm473_vm2, %v5048_v5 }
  0x2e   : > { %504 = vst.msk [vmem:[#allocation2 + $0x100] sm:$0xf] %vm473_vm2, %v5048_v5  ;;  %507 = vst.msk [vmem:[#allocation2 + $0x118] sm:$0xf] %vm473_vm2, %v5048_v5  ;;  %4501 = vmatmul.mubr.msk.f32.gmra.mrb[10].mxu0 %vm550_vm0, %v543_v26 }
  0x2f   : > { %510 = vst.msk [vmem:[#allocation2 + $0x130] sm:$0xf] %vm473_vm2, %v5048_v5  ;;  %513 = vst.msk [vmem:[#allocation2 + $0x148] sm:$0xf] %vm473_vm2, %v5048_v5  ;;  %4529 = vmatmul.mubr.msk.f32.gmra.mrb[10].mxu1 %vm550_vm0, %v3985_v27  ;;  %4503 = vmatprep.mubr.msk.f32.mxu0 %vm550_vm0, %v544_v28 }
  0x30   : > { %516 = vst.msk [vmem:[#allocation2 + $0x160] sm:$0xf] %vm473_vm2, %v5048_v5  ;;  %519 = vst.msk [vmem:[#allocation2 + $0x178] sm:$0xf] %vm473_vm2, %v5048_v5  ;;  %4531 = vmatprep.mubr.msk.f32.mxu1 %vm550_vm0, %v3986_v29 }
  0x31   : > { %522 = vst.msk [vmem:[#allocation2 + $0x190] sm:$0xf] %vm473_vm2, %v5048_v5  ;;  %525 = vst.msk [vmem:[#allocation2 + $0x1a8] sm:$0xf] %vm473_vm2, %v5048_v5 }
  0x32   : > { %4504 = vmatmul.mubr.msk.f32.gmra.mrb[12].mxu0 %vm550_vm0, %v545_v30 }
  0x33   : > { %4532 = vmatmul.mubr.msk.f32.gmra.mrb[12].mxu1 %vm550_vm0, %v3987_v31  ;;  %4506 = vmatprep.mubr.msk.f32.mxu0 %vm550_vm0, %v546_v32 }
  0x34   : > { %4534 = vmatprep.mubr.msk.f32.mxu1 %vm550_vm0, %v3988_v33 }
  0x36   : > { %4507 = vmatmul.mubr.msk.f32.gmra.mrb[14].mxu0 %vm550_vm0, %v547_v34 }
  0x37   : > { %4535 = vmatmul.mubr.msk.f32.gmra.mrb[14].mxu1 %vm550_vm0, %v3989_v35 }
  0xed   : > { %v4487_v37 = vpop.f32.mrb[0].mxu0 }
  0xee   : > { %v4515_v39 = vpop.f32.mrb[0].mxu1  ;;  %v752_v40 = vmul.f32 %v4487_v37, %v5302_v36  ;;  %v665_v42 = vpop.f32.mrb[1].mxu0 }
  0xef   : > { %v1043_v41 = vmul.f32 %v4515_v39, %v5302_v36  ;;  %v956_v43 = vpop.f32.mrb[1].mxu1  ;;  %v751_v44 = vmul.f32 %v5302_v36, %v665_v42 }
  0xf0   : > { %v1042_v45 = vmul.f32 %v5302_v36, %v956_v43  ;;  %v775_v46 = vadd.f32 %v5307_v38, %v752_v40 }
  0xf1   : > { %v1066_v47 = vadd.f32 %v5307_v38, %v1043_v41  ;;  %v774_v48 = vadd.f32 %v5307_v38, %v751_v44  ;;  %v4490_v50 = vpop.f32.mrb[2].mxu0 }
  0xf2   : > { %v1065_v49 = vadd.f32 %v5307_v38, %v1042_v45  ;;  %v4518_v51 = vpop.f32.mrb[2].mxu1  ;;  %v791_v52 = vmax.f32 %v775_v46, 0.0  ;;  %v754_v54 = vmul.f32 %v4490_v50, %v5302_v36  ;;  %v675_v56 = vpop.f32.mrb[3].mxu0 }
  0xf3   : > { %v1082_v53 = vmax.f32 %v1066_v47, 0.0  ;;  %v1045_v55 = vmul.f32 %v4518_v51, %v5302_v36  ;;  %v966_v57 = vpop.f32.mrb[3].mxu1  ;;  %v790_v58 = vmax.f32 %v774_v48, 0.0  ;;  %v753_v60 = vmul.f32 %v5302_v36, %v675_v56 }
  0xf4   : > { %v1081_v59 = vmax.f32 %v1065_v49, 0.0  ;;  %v1044_v61 = vmul.f32 %v5302_v36, %v966_v57  ;;  %808 = vst.msk [vmem:[#allocation2 + $0x3a] sm:$0xff] %vm470_vm1, %v791_v52  ;;  %v777_v62 = vadd.f32 %v5307_v38, %v754_v54 }
  0xf5   : > { %1099 = vst.msk [vmem:[#allocation2 + $0xfa] sm:$0xff] %vm470_vm1, %v1082_v53  ;;  %v1068_v63 = vadd.f32 %v5307_v38, %v1045_v55  ;;  %807 = vst.msk [vmem:[#allocation2 + $0x32] sm:$0xff] %vm470_vm1, %v790_v58  ;;  %v776_v0 = vadd.f32 %v5307_v38, %v753_v60  ;;  %v4493_v2 = vpop.f32.mrb[4].mxu0 }
  0xf6   : > { %1098 = vst.msk [vmem:[#allocation2 + $0xf2] sm:$0xff] %vm470_vm1, %v1081_v59  ;;  %v1067_v1 = vadd.f32 %v5307_v38, %v1044_v61  ;;  %v4521_v3 = vpop.f32.mrb[4].mxu1  ;;  %v793_v4 = vmax.f32 %v777_v62, 0.0  ;;  %v756_v6 = vmul.f32 %v4493_v2, %v5302_v36  ;;  %v685_v8 = vpop.f32.mrb[5].mxu0 }
  0xf7   : > { %v1084_v5 = vmax.f32 %v1068_v63, 0.0  ;;  %v1047_v7 = vmul.f32 %v4521_v3, %v5302_v36  ;;  %v976_v9 = vpop.f32.mrb[5].mxu1  ;;  %v792_v10 = vmax.f32 %v776_v0, 0.0  ;;  %v755_v12 = vmul.f32 %v5302_v36, %v685_v8 }
  0xf8   : > { %v1083_v11 = vmax.f32 %v1067_v1, 0.0  ;;  %v1046_v13 = vmul.f32 %v5302_v36, %v976_v9  ;;  %810 = vst.msk [vmem:[#allocation2 + $0x52] sm:$0xff] %vm470_vm1, %v793_v4  ;;  %v779_v14 = vadd.f32 %v5307_v38, %v756_v6 }
  0xf9   : > { %1101 = vst.msk [vmem:[#allocation2 + $0x112] sm:$0xff] %vm470_vm1, %v1084_v5  ;;  %v1070_v15 = vadd.f32 %v5307_v38, %v1047_v7  ;;  %809 = vst.msk [vmem:[#allocation2 + $0x4a] sm:$0xff] %vm470_vm1, %v792_v10  ;;  %v778_v16 = vadd.f32 %v5307_v38, %v755_v12  ;;  %v4496_v18 = vpop.f32.mrb[6].mxu0 }
  0xfa   : > { %1100 = vst.msk [vmem:[#allocation2 + $0x10a] sm:$0xff] %vm470_vm1, %v1083_v11  ;;  %v1069_v17 = vadd.f32 %v5307_v38, %v1046_v13  ;;  %v4524_v19 = vpop.f32.mrb[6].mxu1  ;;  %v795_v20 = vmax.f32 %v779_v14, 0.0  ;;  %v758_v22 = vmul.f32 %v4496_v18, %v5302_v36  ;;  %v695_v24 = vpop.f32.mrb[7].mxu0 }
  0xfb   : > { %v1086_v21 = vmax.f32 %v1070_v15, 0.0  ;;  %v1049_v23 = vmul.f32 %v4524_v19, %v5302_v36  ;;  %v986_v25 = vpop.f32.mrb[7].mxu1  ;;  %v794_v26 = vmax.f32 %v778_v16, 0.0  ;;  %v757_v28 = vmul.f32 %v5302_v36, %v695_v24 }
  0xfc   : > { %v1085_v27 = vmax.f32 %v1069_v17, 0.0  ;;  %v1048_v29 = vmul.f32 %v5302_v36, %v986_v25  ;;  %812 = vst.msk [vmem:[#allocation2 + $0x6a] sm:$0xff] %vm470_vm1, %v795_v20  ;;  %v781_v30 = vadd.f32 %v5307_v38, %v758_v22 }
  0xfd   : > { %1103 = vst.msk [vmem:[#allocation2 + $0x12a] sm:$0xff] %vm470_vm1, %v1086_v21  ;;  %v1072_v31 = vadd.f32 %v5307_v38, %v1049_v23  ;;  %811 = vst.msk [vmem:[#allocation2 + $0x62] sm:$0xff] %vm470_vm1, %v794_v26  ;;  %v780_v32 = vadd.f32 %v5307_v38, %v757_v28  ;;  %v4499_v34 = vpop.f32.mrb[8].mxu0 }
  0xfe   : > { %1102 = vst.msk [vmem:[#allocation2 + $0x122] sm:$0xff] %vm470_vm1, %v1085_v27  ;;  %v1071_v33 = vadd.f32 %v5307_v38, %v1048_v29  ;;  %v4527_v35 = vpop.f32.mrb[8].mxu1  ;;  %v797_v37 = vmax.f32 %v781_v30, 0.0  ;;  %v760_v40 = vmul.f32 %v4499_v34, %v5302_v36  ;;  %v705_v42 = vpop.f32.mrb[9].mxu0 }
  0xff   : > { %v1088_v39 = vmax.f32 %v1072_v31, 0.0  ;;  %v1051_v41 = vmul.f32 %v4527_v35, %v5302_v36  ;;  %v996_v43 = vpop.f32.mrb[9].mxu1  ;;  %v796_v44 = vmax.f32 %v780_v32, 0.0  ;;  %v759_v46 = vmul.f32 %v5302_v36, %v705_v42 }
 0x100   : > { %v1087_v45 = vmax.f32 %v1071_v33, 0.0  ;;  %v1050_v47 = vmul.f32 %v5302_v36, %v996_v43  ;;  %814 = vst.msk [vmem:[#allocation2 + $0x82] sm:$0xff] %vm470_vm1, %v797_v37  ;;  %v783_v48 = vadd.f32 %v5307_v38, %v760_v40 }
 0x101   : > { %1105 = vst.msk [vmem:[#allocation2 + $0x142] sm:$0xff] %vm470_vm1, %v1088_v39  ;;  %v1074_v49 = vadd.f32 %v5307_v38, %v1051_v41  ;;  %813 = vst.msk [vmem:[#allocation2 + $0x7a] sm:$0xff] %vm470_vm1, %v796_v44  ;;  %v782_v50 = vadd.f32 %v5307_v38, %v759_v46  ;;  %v4502_v52 = vpop.f32.mrb[10].mxu0 }
 0x102   : > { %1104 = vst.msk [vmem:[#allocation2 + $0x13a] sm:$0xff] %vm470_vm1, %v1087_v45  ;;  %v1073_v51 = vadd.f32 %v5307_v38, %v1050_v47  ;;  %v4530_v53 = vpop.f32.mrb[10].mxu1  ;;  %v799_v54 = vmax.f32 %v783_v48, 0.0  ;;  %v762_v56 = vmul.f32 %v4502_v52, %v5302_v36  ;;  %v715_v58 = vpop.f32.mrb[11].mxu0 }
 0x103   : > { %v1090_v55 = vmax.f32 %v1074_v49, 0.0  ;;  %v1053_v57 = vmul.f32 %v4530_v53, %v5302_v36  ;;  %v1006_v59 = vpop.f32.mrb[11].mxu1  ;;  %v798_v60 = vmax.f32 %v782_v50, 0.0  ;;  %v761_v62 = vmul.f32 %v5302_v36, %v715_v58 }
 0x104   : > { %v1089_v61 = vmax.f32 %v1073_v51, 0.0  ;;  %v1052_v63 = vmul.f32 %v5302_v36, %v1006_v59  ;;  %816 = vst.msk [vmem:[#allocation2 + $0x9a] sm:$0xff] %vm470_vm1, %v799_v54  ;;  %v785_v0 = vadd.f32 %v5307_v38, %v762_v56 }
 0x105   : > { %1107 = vst.msk [vmem:[#allocation2 + $0x15a] sm:$0xff] %vm470_vm1, %v1090_v55  ;;  %v1076_v1 = vadd.f32 %v5307_v38, %v1053_v57  ;;  %815 = vst.msk [vmem:[#allocation2 + $0x92] sm:$0xff] %vm470_vm1, %v798_v60  ;;  %v784_v2 = vadd.f32 %v5307_v38, %v761_v62  ;;  %v4505_v4 = vpop.f32.mrb[12].mxu0 }
 0x106   : > { %1106 = vst.msk [vmem:[#allocation2 + $0x152] sm:$0xff] %vm470_vm1, %v1089_v61  ;;  %v1075_v3 = vadd.f32 %v5307_v38, %v1052_v63  ;;  %v4533_v5 = vpop.f32.mrb[12].mxu1  ;;  %v801_v6 = vmax.f32 %v785_v0, 0.0  ;;  %v764_v8 = vmul.f32 %v4505_v4, %v5302_v36  ;;  %v725_v10 = vpop.f32.mrb[13].mxu0 }
 0x107   : > { %v1092_v7 = vmax.f32 %v1076_v1, 0.0  ;;  %v1055_v9 = vmul.f32 %v4533_v5, %v5302_v36  ;;  %v1016_v11 = vpop.f32.mrb[13].mxu1  ;;  %v800_v12 = vmax.f32 %v784_v2, 0.0  ;;  %v763_v14 = vmul.f32 %v5302_v36, %v725_v10 }
 0x108   : > { %v1091_v13 = vmax.f32 %v1075_v3, 0.0  ;;  %v1054_v15 = vmul.f32 %v5302_v36, %v1016_v11  ;;  %818 = vst.msk [vmem:[#allocation2 + $0xb2] sm:$0xff] %vm470_vm1, %v801_v6  ;;  %v787_v16 = vadd.f32 %v5307_v38, %v764_v8 }
 0x109   : > { %1109 = vst.msk [vmem:[#allocation2 + $0x172] sm:$0xff] %vm470_vm1, %v1092_v7  ;;  %v1078_v17 = vadd.f32 %v5307_v38, %v1055_v9  ;;  %817 = vst.msk [vmem:[#allocation2 + $0xaa] sm:$0xff] %vm470_vm1, %v800_v12  ;;  %v786_v18 = vadd.f32 %v5307_v38, %v763_v14  ;;  %v4508_v20 = vpop.f32.mrb[14].mxu0 }
 0x10a   : > { %1108 = vst.msk [vmem:[#allocation2 + $0x16a] sm:$0xff] %vm470_vm1, %v1091_v13  ;;  %v1077_v19 = vadd.f32 %v5307_v38, %v1054_v15  ;;  %v4536_v21 = vpop.f32.mrb[14].mxu1  ;;  %v803_v22 = vmax.f32 %v787_v16, 0.0  ;;  %v766_v24 = vmul.f32 %v4508_v20, %v5302_v36  ;;  %v735_v26 = vpop.f32.mrb[15].mxu0 }
 0x10b   : > { %v1094_v23 = vmax.f32 %v1078_v17, 0.0  ;;  %v1057_v25 = vmul.f32 %v4536_v21, %v5302_v36  ;;  %v1026_v27 = vpop.f32.mrb[15].mxu1  ;;  %v802_v28 = vmax.f32 %v786_v18, 0.0  ;;  %v765_v30 = vmul.f32 %v5302_v36, %v735_v26 }
 0x10c   : > { %v1093_v29 = vmax.f32 %v1077_v19, 0.0  ;;  %v1056_v31 = vmul.f32 %v5302_v36, %v1026_v27  ;;  %820 = vst.msk [vmem:[#allocation2 + $0xca] sm:$0xff] %vm470_vm1, %v803_v22  ;;  %v789_v32 = vadd.f32 %v5307_v38, %v766_v24 }
 0x10d   : > { %1111 = vst.msk [vmem:[#allocation2 + $0x18a] sm:$0xff] %vm470_vm1, %v1094_v23  ;;  %v1080_v33 = vadd.f32 %v5307_v38, %v1057_v25  ;;  %819 = vst.msk [vmem:[#allocation2 + $0xc2] sm:$0xff] %vm470_vm1, %v802_v28  ;;  %v788_v34 = vadd.f32 %v5307_v38, %v765_v30 }
 0x10e   : > { %1110 = vst.msk [vmem:[#allocation2 + $0x182] sm:$0xff] %vm470_vm1, %v1093_v29  ;;  %v1079_v35 = vadd.f32 %v5307_v38, %v1056_v31  ;;  %v805_v37 = vmax.f32 %v789_v32, 0.0 }
 0x10f   : > { %v1096_v39 = vmax.f32 %v1080_v33, 0.0  ;;  %v804_v40 = vmax.f32 %v788_v34, 0.0 }
 0x110   : > { %v1095_v36 = vmax.f32 %v1079_v35, 0.0  ;;  %822 = vst.msk [vmem:[#allocation2 + $0xe2] sm:$0xff] %vm470_vm1, %v805_v37 }
 0x111   : > { %1113 = vst.msk [vmem:[#allocation2 + $0x1a2] sm:$0xff] %vm470_vm1, %v1096_v39  ;;  %821 = vst.msk [vmem:[#allocation2 + $0xda] sm:$0xff] %vm470_vm1, %v804_v40 }
 0x112   : > { %1112 = vst.msk [vmem:[#allocation2 + $0x19a] sm:$0xff] %vm470_vm1, %v1095_v36 }
 0x113 PF: > { %v5408_v41 = vld [vmem:[%s6423_s4 + $0x18] sm:$0xff]  ;;  %s4009_s19 = smul.u32 192, %s5030_s25  ;;  %v4103_v38 = vld [vmem:[%s6423_s4 + $0x20] sm:$0xff]  ;;  %v4010_v42 = vld [vmem:[%s6423_s4 + $0x8] sm:$0xff]  ;;  %vm1209_vm3 = vcmask 64512   ;;  %vm1166_vm4 = vcmask 1045504  }
 0x114   : > { %4615 = vmatprep.subr.mxu0 %v5408_v41  ;;  %4537 = vmatprep.subr.mxu1 %v4010_v42  ;;  %v1141_v43 = vld [vmem:[%s6423_s4] sm:$0xff]  ;;  %v5444_v49 = vld [vmem:[%s6423_s4 + $0x28] sm:$0xff]  ;;  %v5486_v3 = vld [vmem:[%s6423_s4 + $0x10] sm:$0xff]  ;;  %vm1564_vm5 = vcmask 1043456   ;;  %s4256_s22 = sshll.u32 %s5030_s25, 7  ;;  %vm3554_vm6 = vcmask 130048  }
 0x115   : > { %4616 = vmatpush3.msra.mxu0 %v5408_v41  ;;  %4538 = vmatpush3.msra.mxu1 %v4010_v42  ;;  %s5422_s27 = scalar_lea.vmem [#allocation2], %s4009_s19  ;;  %v5568_v34 = vld [vmem:[%s6423_s4 + $0x30] sm:$0xff]  ;;  %s6227_s23 = scalar_lea.vmem %s5155_s20, %s4256_s22 }
 0x116   : > { %4641 = vmatprep.subr.mxu0 %v4103_v38  ;;  %4563 = vmatprep.subr.mxu1 %v1141_v43 }
 0x119   : > { %v5425_v44 = vld [vmem:[%s5422_s27 + $0x30] sm:$0xff]  ;;  %v5428_v45 = vld [vmem:[%s5422_s27 + $0x38] sm:$0xff]  ;;  %v5431_v46 = vld [vmem:[%s5422_s27] sm:$0xff] }
 0x11a   : > { %6475 = vst [vmem:[#allocation7_spill] sm:$0xff] %v5431_v46  ;;  %4617 = vmatprep.mubr.msk.f32.mxu0 %vm1209_vm3, %v5425_v44  ;;  %v5436_v47 = vld [vmem:[%s5422_s27 + $0x8] sm:$0xff]  ;;  %v1167_v50 = vrot.slane %v5431_v46, 2  ;;  %v5451_v52 = vld [vmem:[%s5422_s27 + $0x10] sm:$0xf]  ;;  %v5460_v55 = vld [vmem:[%s5422_s27 + $0x18] sm:$0xff] }
 0x11b   : > { %v5439_v48 = vld [vmem:[%s5422_s27 + $0x48] sm:$0xff]  ;;  %4618 = vmatmul.mubr.msk.f32.vlgmr.msra.gmra.mrb[0].mxu0 %vm1209_vm3, %v5428_v45  ;;  %v1168_v51 = vrot.slane %v5436_v47, 2  ;;  %6476 = vst [vmem:[#allocation8_spill] sm:$0xff] %v5451_v52  ;;  %v1170_v53 = vrot.slane %v5451_v52, 2  ;;  %v5457_v54 = vld [vmem:[%s5422_s27 + $0x50] sm:$0xff]  ;;  %v5463_v56 = vld [vmem:[%s5422_s27 + $0x20] sm:$0xff] }
 0x11c   : > { %4642 = vmatpush3.msra.mxu0 %v4103_v38  ;;  %4620 = vmatprep.mubr.msk.f32.mxu0 %vm1209_vm3, %v5439_v48  ;;  %v2046_v57 = vrot.slane %v5425_v44, 2  ;;  %v2047_v58 = vrot.slane %v5428_v45, 2  ;;  %v1172_v60 = vrot.slane %v5460_v55, 2  ;;  %v5470_v61 = vld [vmem:[%s5422_s27 + $0x28] sm:$0xf]  ;;  %v5473_v62 = vld [vmem:[%s5422_s27 + $0x60] sm:$0xff] }
 0x11d   : > { %v1169_v59 = vsel %vm1166_vm4, %v1167_v50, %v1168_v51  ;;  %6477 = vst [vmem:[#allocation9_spill] sm:$0xff] %v5470_v61  ;;  %4667 = vmatprep.subr.mxu0 %v5444_v49  ;;  %v1171_v63 = vsel %vm1166_vm4, %v1168_v51, %v1170_v53  ;;  %v1173_v0 = vrot.slane %v5463_v56, 2  ;;  %v1175_v1 = vrot.slane %v5470_v61, 2  ;;  %v5481_v2 = vld [vmem:[%s5422_s27 + $0x40] sm:$0xf]  ;;  %v5497_v7 = vld [vmem:[%s5422_s27 + $0x68] sm:$0xff] }
 0x11e   : > { %4539 = vmatprep.mubr.msk.f32.mxu1 %vm1209_vm3, %v1169_v59  ;;  %6478 = vst [vmem:[#allocation10_spill] sm:$0xff] %v5481_v2  ;;  %v2051_v4 = vrot.slane %v5439_v48, 2  ;;  %v1180_v8 = vrot.slane %v5481_v2, 2  ;;  %v2052_v9 = vrot.slane %v5457_v54, 2  ;;  %v1179_v10 = vsel %vm1166_vm4, %v2046_v57, %v2047_v58  ;;  %v5504_v11 = vld [vmem:[%s5422_s27 + $0x78] sm:$0xff]  ;;  %v5521_v15 = vld [vmem:[%s5422_s27 + $0x80] sm:$0xff] }
 0x11f   : > { %4540 = vmatmul.mubr.msk.f32.vlgmr.msra.gmra.mrb[0].mxu1 %vm1209_vm3, %v1171_v63  ;;  %4621 = vmatmul.mubr.msk.f32.gmra.mrb[2].mxu0 %vm1209_vm3, %v5457_v54  ;;  %v1174_v5 = vsel %vm1166_vm4, %v1172_v60, %v1173_v0  ;;  %v1176_v6 = vsel %vm1166_vm4, %v1173_v0, %v1175_v1  ;;  %v5507_v12 = vld [vmem:[%s5422_s27 + $0x58] sm:$0xf]  ;;  %v5510_v13 = vld [vmem:[%s5422_s27 + $0x40] sm:$0xf]  ;;  %6480 = vst [vmem:[#allocation12_spill] sm:$0xff] %v5521_v15  ;;  %v2056_v18 = vrot.slane %v5473_v62, 2 }
 0x120   : > { %4623 = vmatprep.mubr.msk.f32.mxu0 %vm1209_vm3, %v5473_v62  ;;  %4564 = vmatpush3.msra.mxu1 %v1141_v43  ;;  %6479 = vst [vmem:[#allocation11_spill] sm:$0xff] %v5507_v12  ;;  %v1181_v14 = vsel %vm1166_vm4, %v2047_v58, %v1180_v8  ;;  %v1185_v16 = vrot.slane %v5507_v12, 2  ;;  %v2049_v17 = vrot.slane %v5510_v13, 2  ;;  %v5527_v19 = vrot.slane %v5497_v7, 2  ;;  %v5531_v21 = vld [vmem:[%s5422_s27 + $0x70] sm:$0xf] }
 0x121   : > { %4542 = vmatprep.mubr.msk.f32.mxu1 %vm1209_vm3, %v1174_v5  ;;  %4589 = vmatprep.subr.mxu1 %v5486_v3  ;;  %v1184_v20 = vsel %vm1166_vm4, %v2051_v4, %v2052_v9  ;;  %6481 = vst [vmem:[#allocation13_spill] sm:$0xff] %v5531_v21  ;;  %v5534_v22 = vld [vmem:[%s5422_s27 + $0x58] sm:$0xf]  ;;  %v1190_v25 = vrot.slane %v5531_v21, 2  ;;  %v2061_v27 = vrot.slane %v5504_v11, 2  ;;  %v5547_v28 = vrot.slane %v5521_v15, 2 }
 0x122   : > { %v1186_v23 = vsel %vm1166_vm4, %v2052_v9, %v1185_v16  ;;  %v2050_v24 = vsel %vm1166_vm4, %v2047_v58, %v2049_v17  ;;  %v2054_v26 = vrot.slane %v5534_v22, 2  ;;  %v5551_v29 = vsel %vm1166_vm4, %v2056_v18, %v5527_v19  ;;  %v5554_v30 = vld [vmem:[%s5422_s27 + $0x88] sm:$0xf]  ;;  %v5557_v31 = vld [vmem:[%s5422_s27 + $0x70] sm:$0xf]  ;;  %v5563_v33 = vld [vmem:[%s5422_s27 + $0x98] sm:$0xff] }
 0x123   : > { %4543 = vmatmul.mubr.msk.f32.gmra.mrb[2].mxu1 %vm1209_vm3, %v1176_v6  ;;  %4624 = vmatmul.mubr.msk.f32.gmra.mrb[4].mxu0 %vm1209_vm3, %v5497_v7  ;;  %6482 = vst [vmem:[#allocation14_spill] sm:$0xff] %v5551_v29  ;;  %6483 = vst [vmem:[#allocation15_spill] sm:$0xff] %v5554_v30  ;;  %v5560_v32 = vld [vmem:[%s5422_s27 + $0x90] sm:$0xff]  ;;  %v5573_v35 = vld [vmem:[%s5422_s27 + $0xa0] sm:$0xf]  ;;  %v1191_v37 = vsel %vm1166_vm4, %v5527_v19, %v1190_v25  ;;  %v1195_v40 = vrot.slane %v5554_v30, 2  ;;  %v5589_v42 = vsel %vm1166_vm4, %v2061_v27, %v5547_v28 }
 0x124   : > { %4545 = vmatprep.mubr.msk.f32.mxu1 %vm1209_vm3, %v1179_v10  ;;  %4626 = vmatprep.mubr.msk.f32.mxu0 %vm1209_vm3, %v5504_v11  ;;  %6484 = vst [vmem:[#allocation16_spill] sm:$0xff] %v5563_v33  ;;  %6485 = vst [vmem:[#allocation17_spill] sm:$0xff] %v5573_v35  ;;  %v2055_v39 = vsel %vm1166_vm4, %v2052_v9, %v2054_v26  ;;  %v2059_v36 = vrot.slane %v5557_v31, 2  ;;  %v5584_v38 = vld [vmem:[%s5422_s27 + $0x88] sm:$0xf]  ;;  %v1197_v43 = vrot.slane %v5560_v32, 2 }
 0x125   : > { %6486 = vst [vmem:[#allocation18_spill] sm:$0xff] %v5589_v42  ;;  %v1200_v50 = vrot.slane %v5573_v35, 2  ;;  %v5598_v51 = vld [vmem:[%s5422_s27 + $0xa8] sm:$0xff]  ;;  %v5601_v53 = vld [vmem:[%s5422_s27 + $0xb0] sm:$0xff]  ;;  %v2064_v57 = vrot.slane %v5584_v38, 2  ;;  %v1196_v60 = vsel %vm1166_vm4, %v5547_v28, %v1195_v40  ;;  %v5624_v1 = vld [vmem:[%s5422_s27 + $0xc0] sm:$0xff] }
 0x126   : > { %6487 = vst [vmem:[#allocation19_spill] sm:$0xff] %v5598_v51  ;;  %6488 = vst [vmem:[#allocation20_spill] sm:$0xff] %v5601_v53  ;;  %v5607_v58 = vld [vmem:[%s5422_s27 + $0xb8] sm:$0xf]  ;;  %v5610_v59 = vld [vmem:[%s5422_s27 + $0xa0] sm:$0xf]  ;;  %v2060_v63 = vsel %vm1166_vm4, %v5527_v19, %v2059_v36 }
 0x127   : > { %4546 = vmatmul.mubr.msk.f32.gmra.mrb[4].mxu1 %vm1209_vm3, %v1181_v14  ;;  %4627 = vmatmul.mubr.msk.f32.gmra.mrb[6].mxu0 %vm1209_vm3, %v5521_v15  ;;  %6489 = vst [vmem:[#allocation21_spill] sm:$0xff] %v5607_v58  ;;  %6490 = vst [vmem:[#allocation22_spill] sm:$0xff] %v5610_v59  ;;  %v5621_v0 = vld [vmem:[%s5422_s27 + $0xb8] sm:$0xf]  ;;  %v5627_v4 = vld [vmem:[%s5422_s27 + $0xc8] sm:$0xff]  ;;  %v1202_v6 = vrot.slane %v5598_v51, 2  ;;  %v2065_v18 = vsel %vm1166_vm4, %v5547_v28, %v2064_v57 }
 0x128   : > { %4548 = vmatprep.mubr.msk.f32.mxu1 %vm1209_vm3, %v1184_v20  ;;  %4643 = vmatprep.mubr.msk.f32.mxu0 %vm1209_vm3, %v1179_v10  ;;  %6491 = vst [vmem:[#allocation23_spill] sm:$0xff] %v5621_v0  ;;  %6492 = vst [vmem:[#allocation24_spill] sm:$0xff] %v5624_v1  ;;  %v5635_v8 = vrot.slane %v5601_v53, 2  ;;  %v5638_v9 = vld [vmem:[%s5422_s27 + $0xd0] sm:$0xf]  ;;  %v5641_v10 = vld [vmem:[%s5422_s27 + $0xd8] sm:$0xff] }
 0x129   : > { %6493 = vst [vmem:[#allocation25_spill] sm:$0xff] %v5627_v4  ;;  %6495 = vst [vmem:[#allocation27_spill] sm:$0xff] %v5638_v9  ;;  %v5644_v14 = vld [vmem:[%s5422_s27 + $0xe0] sm:$0xff]  ;;  %v1205_v17 = vrot.slane %v5607_v58, 2  ;;  %v5661_v25 = vrot.slane %v5627_v4, 2  ;;  %v2079_v26 = vrot.slane %v5638_v9, 2 }
 0x12a   : > { %6496 = vst [vmem:[#allocation28_spill] sm:$0xff] %v5641_v10  ;;  %6497 = vst [vmem:[#allocation29_spill] sm:$0xff] %v5644_v14  ;;  %v2081_v27 = vrot.slane %v5641_v10, 2  ;;  %v5673_v40 = vsel %vm1166_vm4, %v1202_v6, %v5635_v8  ;;  %v5683_v57 = vrot.slane %v5521_v15, 4  ;;  %v5701_v58 = vld [vmem:[%s5422_s27 + $0x70] sm:$0xf] }
 0x12b   : > { %4549 = vmatmul.mubr.msk.f32.gmra.mrb[6].mxu1 %vm1209_vm3, %v1186_v23  ;;  %4644 = vmatmul.mubr.msk.f32.vlgmr.msra.gmra.mrb[0].mxu0 %vm1209_vm3, %v2050_v24  ;;  %v2074_v23 = vrot.slane %v5621_v0, 2  ;;  %v2076_v24 = vrot.slane %v5624_v1, 2  ;;  %6498 = vst [vmem:[#allocation30_spill] sm:$0xff] %v5673_v40  ;;  %v4147_v35 = vld [vmem:[%s5422_s27 + $0xa0] sm:$0xf]  ;;  %v5741_v2 = vrot.slane %v5644_v14, 4 }
 0x12c   : > { %4668 = vmatpush3.msra.mxu0 %v5444_v49  ;;  %4551 = vmatprep.mubr.msk.f32.mxu1 %vm1209_vm3, %v5551_v29  ;;  %v5593_v49 = vrot.slane %v5563_v33, 2  ;;  %v4150_v30 = vld [vmem:[%s5422_s27 + $0xb8] sm:$0xf]  ;;  %v4153_v21 = vld [vmem:[%s5422_s27 + $0xd0] sm:$0xf] }
 0x12d   : > { %4646 = vmatprep.mubr.msk.f32.mxu0 %vm1209_vm3, %v1184_v20  ;;  %4693 = vmatprep.subr.mxu0 %v5568_v34  ;;  %v2069_v20 = vrot.slane %v5610_v59, 2  ;;  %v2075_v36 = vsel %vm1166_vm4, %v5635_v8, %v2074_v23  ;;  %v5721_v23 = vld [vmem:[%s5422_s27 + $0x108] sm:$0xff]  ;;  %v4159_v1 = vld [vmem:[%s5422_s27 + $0x100] sm:$0xf]  ;;  %v4162_v52 = vld [vmem:[%s5422_s27 + $0x118] sm:$0xf] }
 0x12e   : > { %v5631_v5 = vsel %vm1166_vm4, %v1197_v43, %v5593_v49  ;;  %v1201_v16 = vsel %vm1166_vm4, %v5593_v49, %v1200_v50  ;;  %v5677_v43 = vrot.slane %v5428_v45, 4  ;;  %v5680_v50 = vrot.slane %v5497_v7, 4  ;;  %6501 = vst [vmem:[#allocation33_spill] sm:$0xff] %v5721_v23  ;;  %v4156_v12 = vld [vmem:[%s5422_s27 + $0xe8] sm:$0xf] }
 0x12f   : > { %4552 = vmatmul.mubr.msk.f32.gmra.mrb[8].mxu1 %vm1209_vm3, %v1191_v37  ;;  %4647 = vmatmul.mubr.msk.f32.gmra.mrb[2].mxu0 %vm1209_vm3, %v2055_v39  ;;  %6494 = vst [vmem:[#allocation26_spill] sm:$0xff] %v5631_v5  ;;  %v5666_v37 = vrot.slane %v5644_v14, 2  ;;  %v5669_v39 = vld [vmem:[%s5422_s27 + $0xe8] sm:$0xf]  ;;  %v2070_v6 = vsel %vm1166_vm4, %v5593_v49, %v2069_v20  ;;  %v2790_v51 = vrot.slane %v4156_v12, 2  ;;  %v2795_v59 = vrot.slane %v4159_v1, 2 }
 0x130   : > { %4554 = vmatprep.mubr.msk.f32.mxu1 %vm1209_vm3, %v5589_v42  ;;  %4649 = vmatprep.mubr.msk.f32.mxu0 %vm1209_vm3, %v5551_v29  ;;  %v5698_v29 = vld [vmem:[%s5422_s27 + $0xf8] sm:$0xff] }
 0x131   : > { %6500 = vst [vmem:[#allocation32_spill] sm:$0xff] %v5698_v29  ;;  %v5718_v20 = vsel %vm1166_vm4, %v2081_v27, %v5666_v37  ;;  %v2793_v9 = vrot.slane %v5698_v29, 2  ;;  %v3028_v61 = vrot.slane %v5698_v29, 4  ;;  %v2765_v29 = vrot.slane %v5701_v58, 2 }
 0x133   : > { %4555 = vmatmul.mubr.msk.f32.gmra.mrb[10].mxu1 %vm1209_vm3, %v1196_v60  ;;  %4650 = vmatmul.mubr.msk.f32.gmra.mrb[4].mxu0 %vm1209_vm3, %v2060_v63  ;;  %v5686_v60 = vld [vmem:[%s5422_s27 + $0xf0] sm:$0xff]  ;;  %v1206_v63 = vsel %vm1166_vm4, %v5635_v8, %v1205_v17  ;;  %v5712_v17 = vsel %vm1166_vm4, %v2076_v24, %v5661_v25  ;;  %v5733_v24 = vrot.slane %v5601_v53, 4  ;;  %v3032_v53 = vrot.slane %v5721_v23, 4 }
 0x134   : > { %4557 = vmatprep.mubr.msk.f32.mxu1 %vm1209_vm3, %v5631_v5  ;;  %4652 = vmatprep.mubr.msk.f32.mxu0 %vm1209_vm3, %v5589_v42  ;;  %6499 = vst [vmem:[#allocation31_spill] sm:$0xff] %v5686_v60  ;;  %v5724_v42 = vld [vmem:[%s5422_s27 + $0x110] sm:$0xff]  ;;  %v2792_v27 = vrot.slane %v5686_v60, 2  ;;  %v3027_v10 = vrot.slane %v5686_v60, 4  ;;  %v2775_v60 = vrot.slane %v4147_v35, 2 }
 0x135   : > { %6502 = vst [vmem:[#allocation34_spill] sm:$0xff] %v5724_v42  ;;  %v2798_v0 = vrot.slane %v5724_v42, 2  ;;  %v3033_v14 = vrot.slane %v5724_v42, 4  ;;  %v5765_v42 = vsel %vm1166_vm4, %v5527_v19, %v2765_v29  ;;  %v5791_v29 = vsel %vm1166_vm4, %v2793_v9, %v2795_v59 }
 0x136   : > { %v3015_v59 = vrot.slane %v4150_v30, 4 }
 0x137   : > { %4558 = vmatmul.mubr.msk.f32.gmra.mrb[12].mxu1 %vm1209_vm3, %v1201_v16  ;;  %4653 = vmatmul.mubr.msk.f32.gmra.mrb[6].mxu0 %vm1209_vm3, %v2065_v18  ;;  %v5704_v16 = vld [vmem:[%s5422_s27 + $0x88] sm:$0xf]  ;;  %v2080_v18 = vsel %vm1166_vm4, %v5661_v25, %v2079_v26  ;;  %v5736_v26 = vrot.slane %v5627_v4, 4  ;;  %v2797_v4 = vrot.slane %v5721_v23, 2  ;;  %v5761_v23 = vsel %vm1166_vm4, %v2792_v27, %v2793_v9 }
 0x138   : > { %4560 = vmatprep.mubr.msk.f32.mxu1 %vm1209_vm3, %v5673_v40  ;;  %4655 = vmatprep.mubr.msk.f32.mxu0 %vm1209_vm3, %v5631_v5  ;;  %v5730_v5 = vrot.slane %v5563_v33, 4  ;;  %v2785_v33 = vrot.slane %v4153_v21, 2  ;;  %v3020_v9 = vrot.slane %v4153_v21, 4 }
 0x13a   : > { %v5784_v19 = vsel %vm1166_vm4, %v5661_v25, %v2785_v33  ;;  %v3000_v33 = vrot.slane %v5701_v58, 4  ;;  %v3005_v25 = vrot.slane %v5704_v16, 4  ;;  %v5831_v21 = vsel %vm1564_vm5, %v5736_v26, %v3020_v9  ;;  %v6506_v9 = vld [vmem:[#allocation22_spill] sm:$0xff] }
 0x13b   : > { %4561 = vmatmul.mubr.msk.f32.gmra.mrb[14].mxu1 %vm1209_vm3, %v1206_v63  ;;  %4656 = vmatmul.mubr.msk.f32.gmra.mrb[8].mxu0 %vm1209_vm3, %v2070_v6  ;;  %v2770_v63 = vrot.slane %v5704_v16, 2  ;;  %v2780_v6 = vrot.slane %v4150_v30, 2  ;;  %v2284_v16 = vrot.slane %v5510_v13, 4 }
 0x13c   : > { %4565 = vmatprep.mubr.msk.f32.mxu1 %vm1209_vm3, %v5431_v46  ;;  %4658 = vmatprep.mubr.msk.f32.mxu0 %vm1209_vm3, %v5673_v40  ;;  %v5773_v46 = vsel %vm1166_vm4, %v5593_v49, %v2775_v60  ;;  %v2800_v49 = vrot.slane %v4162_v52, 2  ;;  %v3025_v60 = vrot.slane %v4156_v12, 4  ;;  %v5809_v27 = vsel %vm1564_vm5, %v5680_v50, %v3000_v33 }
 0x13d   : > { %v5769_v40 = vsel %vm1166_vm4, %v5547_v28, %v2770_v63  ;;  %v5777_v15 = vsel %vm1166_vm4, %v5635_v8, %v2780_v6  ;;  %v5788_v28 = vsel %vm1166_vm4, %v5666_v37, %v2790_v51  ;;  %v5798_v8 = vsel %vm1166_vm4, %v2797_v4, %v2798_v0 }
 0x13e   : > { %v5804_v51 = vsel %vm1166_vm4, %v2798_v0, %v2800_v49  ;;  %v5813_v58 = vsel %vm1564_vm5, %v5683_v57, %v3005_v25  ;;  %v5827_v12 = vsel %vm1564_vm5, %v5733_v24, %v3015_v59  ;;  %v5835_v30 = vsel %vm1564_vm5, %v5741_v2, %v3025_v60  ;;  %v6505_v59 = vld [vmem:[#allocation12_spill] sm:$0xff] }
 0x13f   : > { %4566 = vmatmul.mubr.msk.f32.vlgmr.msra.gmra.mrb[0].mxu1 %vm1209_vm3, %v5436_v47  ;;  %4659 = vmatmul.mubr.msk.f32.gmra.mrb[10].mxu0 %vm1209_vm3, %v2075_v36  ;;  %v3010_v36 = vrot.slane %v4147_v35, 4  ;;  %v3030_v0 = vrot.slane %v4159_v1, 4  ;;  %v6503_v4 = vrot.slane %v5669_v39, 2  ;;  %v3035_v63 = vrot.slane %v4162_v52, 4 }
 0x140   : > { %4568 = vmatprep.mubr.msk.f32.mxu1 %vm1209_vm3, %v5460_v55  ;;  %4661 = vmatprep.mubr.msk.f32.mxu0 %vm1209_vm3, %v5712_v17  ;;  %v6504_v1 = vrot.slane %v5425_v44, 4  ;;  %v2286_v33 = vrot.slane %v5439_v48, 4  ;;  %v5860_v25 = vrot.slane %v5457_v54, 4  ;;  %v2289_v52 = vrot.slane %v5534_v22, 4 }
 0x141   : > { %4590 = vmatpush3.msra.mxu1 %v5486_v3  ;;  %v5817_v35 = vsel %vm1564_vm5, %v5730_v5, %v3010_v36  ;;  %v5820_v3 = vsel %vm1564_vm5, %v3027_v10, %v3028_v61  ;;  %v2085_v10 = vsel %vm1166_vm4, %v5666_v37, %v6503_v4  ;;  %v5856_v49 = vsel %vm1564_vm5, %v3028_v61, %v3030_v0  ;;  %v6507_v0 = vld [vmem:[#allocation7_spill] sm:$0xff] }
 0x142   : > { %4837 = vmatprep.subr.mxu1 %v5408_v41  ;;  %v5853_v6 = vsel %vm1564_vm5, %v6504_v1, %v5677_v43  ;;  %v5863_v13 = vsel %vm1564_vm5, %v3033_v14, %v3035_v63  ;;  %v2291_v61 = vrot.slane %v5473_v62, 4  ;;  %v2294_v22 = vrot.slane %v5557_v31, 4  ;;  %v6508_v63 = vld [vmem:[#allocation19_spill] sm:$0xff] }
 0x143   : > { %4569 = vmatmul.mubr.msk.f32.gmra.mrb[2].mxu1 %vm1209_vm3, %v5463_v56  ;;  %4662 = vmatmul.mubr.msk.f32.gmra.mrb[12].mxu0 %vm1209_vm3, %v2080_v18  ;;  %v5847_v18 = vsel %vm1564_vm5, %v3032_v53, %v3033_v14  ;;  %v5878_v53 = vsel %vm1564_vm5, %v2286_v33, %v5860_v25  ;;  %v2296_v14 = vrot.slane %v5504_v11, 4  ;;  %v2301_v36 = vrot.slane %v5560_v32, 4  ;;  %v6509_v33 = vld [vmem:[#allocation16_spill] sm:$0xff] }
 0x144   : > { %4571 = vmatprep.mubr.msk.f32.mxu1 %vm1209_vm3, %v5425_v44  ;;  %4664 = vmatprep.mubr.msk.f32.mxu0 %vm1209_vm3, %v5718_v20  ;;  %v2285_v44 = vsel %vm1564_vm5, %v5677_v43, %v2284_v16  ;;  %v2295_v31 = vsel %vm1564_vm5, %v5680_v50, %v2294_v22  ;;  %v2304_v60 = vrot.slane %v6506_v9, 4  ;;  %v1565_v4 = vrot.slane %v6507_v0, 4  ;;  %v6513_v9 = vld [vmem:[#allocation20_spill] sm:$0xff] }
 0x145   : > { %v5914_v37 = vsel %vm1564_vm5, %v2296_v14, %v5683_v57  ;;  %v5931_v16 = vsel %vm1564_vm5, %v2301_v36, %v5730_v5  ;;  %v2306_v1 = vrot.slane %v6508_v63, 4  ;;  %v6512_v36 = vld [vmem:[#allocation24_spill] sm:$0xff] }
 0x147   : > { %4572 = vmatmul.mubr.msk.f32.gmra.mrb[4].mxu1 %vm1209_vm3, %v5428_v45  ;;  %4665 = vmatmul.mubr.msk.f32.gmra.mrb[14].mxu0 %vm1209_vm3, %v2085_v10  ;;  %v5883_v45 = vld [vmem:[%s6423_s4 + $0x38] sm:$0xff]  ;;  %v1566_v10 = vrot.slane %v5436_v47, 4  ;;  %v2305_v47 = vsel %vm1564_vm5, %v5730_v5, %v2304_v60  ;;  %v5948_v14 = vsel %vm1564_vm5, %v2306_v1, %v5733_v24 }
 0x148   : > { %4574 = vmatprep.mubr.msk.f32.mxu1 %vm1209_vm3, %v5439_v48  ;;  %4669 = vmatprep.mubr.msk.f32.mxu0 %vm1209_vm3, %v5853_v6  ;;  %v2290_v48 = vsel %vm1564_vm5, %v5860_v25, %v2289_v52 }
 0x14b   : > { %4575 = vmatmul.mubr.msk.f32.gmra.mrb[6].mxu1 %vm1209_vm3, %v5457_v54  ;;  %4670 = vmatmul.mubr.msk.f32.vlgmr.msra.gmra.mrb[0].mxu0 %vm1209_vm3, %v2285_v44  ;;  %v5899_v54 = vsel %vm1564_vm5, %v2291_v61, %v5680_v50  ;;  %v6510_v44 = vld [vmem:[#allocation8_spill] sm:$0xff]  ;;  %v1567_v61 = vsel %vm1564_vm5, %v1565_v4, %v1566_v10 }
 0x14c   : > { %4694 = vmatpush3.msra.mxu0 %v5568_v34  ;;  %4577 = vmatprep.mubr.msk.f32.mxu1 %vm1209_vm3, %v5473_v62  ;;  %v2299_v34 = vrot.slane %v5584_v38, 4  ;;  %v1568_v52 = vrot.slane %v6510_v44, 4 }
 0x14d   : > { %4672 = vmatprep.mubr.msk.f32.mxu0 %vm1209_vm3, %v5878_v53  ;;  %4719 = vmatprep.subr.mxu0 %v5883_v45 }
 0x14e   : > { %v2300_v38 = vsel %vm1564_vm5, %v5683_v57, %v2299_v34  ;;  %v1571_v34 = vrot.slane %v5463_v56, 4  ;;  %v1569_v60 = vsel %vm1564_vm5, %v1566_v10, %v1568_v52  ;;  %v6515_v56 = vld [vmem:[#allocation27_spill] sm:$0xff] }
 0x14f   : > { %4578 = vmatmul.mubr.msk.f32.gmra.mrb[8].mxu1 %vm1209_vm3, %v5497_v7  ;;  %4673 = vmatmul.mubr.msk.f32.gmra.mrb[2].mxu0 %vm1209_vm3, %v2290_v48  ;;  %v6511_v48 = vld [vmem:[#allocation23_spill] sm:$0xff]  ;;  %v2314_v1 = vrot.slane %v6515_v56, 4  ;;  %v6526_v56 = vld [vmem:[#allocation32_spill] sm:$0xff] }
 0x150   : > { %4580 = vmatprep.mubr.msk.f32.mxu1 %vm1209_vm3, %v5504_v11  ;;  %4675 = vmatprep.mubr.msk.f32.mxu0 %vm1209_vm3, %v5899_v54  ;;  %v2309_v22 = vrot.slane %v6511_v48, 4 }
 0x151   : > { %v2315_v52 = vsel %vm1564_vm5, %v5736_v26, %v2314_v1  ;;  %v6532_v1 = vld [vmem:[#allocation30_spill] sm:$0xff] }
 0x152   : > { %v2310_v0 = vsel %vm1564_vm5, %v5733_v24, %v2309_v22  ;;  %v6517_v22 = vld [vmem:[#allocation10_spill] sm:$0xff] }
 0x153   : > { %4581 = vmatmul.mubr.msk.f32.gmra.mrb[10].mxu1 %vm1209_vm3, %v6505_v59  ;;  %4676 = vmatmul.mubr.msk.f32.gmra.mrb[4].mxu0 %vm1209_vm3, %v2295_v31  ;;  %v1570_v31 = vrot.slane %v5460_v55, 4  ;;  %v6514_v55 = vld [vmem:[#allocation9_spill] sm:$0xff] }
 0x154   : > { %4583 = vmatprep.mubr.msk.f32.mxu1 %vm1209_vm3, %v5560_v32  ;;  %4678 = vmatprep.mubr.msk.f32.mxu0 %vm1209_vm3, %v5914_v37  ;;  %v1573_v4 = vrot.slane %v6514_v55, 4 }
 0x155   : > { %v1572_v44 = vsel %vm1564_vm5, %v1570_v31, %v1571_v34  ;;  %v1578_v31 = vrot.slane %v6517_v22, 4 }
 0x156   : > { %v1574_v10 = vsel %vm1564_vm5, %v1571_v34, %v1573_v4  ;;  %v6518_v34 = vld [vmem:[#allocation11_spill] sm:$0xff]  ;;  %v6524_v4 = vld [vmem:[#allocation29_spill] sm:$0xff] }
 0x157   : > { %4584 = vmatmul.mubr.msk.f32.gmra.mrb[12].mxu1 %vm1209_vm3, %v6509_v33  ;;  %4679 = vmatmul.mubr.msk.f32.gmra.mrb[6].mxu0 %vm1209_vm3, %v2300_v38  ;;  %v2311_v38 = vrot.slane %v6512_v36, 4 }
 0x158   : > { %4586 = vmatprep.mubr.msk.f32.mxu1 %vm1209_vm3, %v6508_v63  ;;  %4681 = vmatprep.mubr.msk.f32.mxu0 %vm1209_vm3, %v5931_v16 }
 0x159   : > { %v5967_v48 = vsel %vm1564_vm5, %v2311_v38, %v5736_v26  ;;  %v2319_v38 = vrot.slane %v5669_v39, 4  ;;  %v1579_v26 = vsel %vm1564_vm5, %v5677_v43, %v1578_v31  ;;  %v6519_v43 = vld [vmem:[#allocation13_spill] sm:$0xff] }
 0x15b   : > { %4587 = vmatmul.mubr.msk.f32.gmra.mrb[14].mxu1 %vm1209_vm3, %v6513_v9  ;;  %4682 = vmatmul.mubr.msk.f32.gmra.mrb[8].mxu0 %vm1209_vm3, %v2305_v47  ;;  %v6516_v47 = vld [vmem:[#allocation28_spill] sm:$0xff]  ;;  %v2320_v39 = vsel %vm1564_vm5, %v5741_v2, %v2319_v38 }
 0x15c   : > { %4591 = vmatprep.mubr.msk.f32.mxu1 %vm1209_vm3, %v1567_v61  ;;  %4684 = vmatprep.mubr.msk.f32.mxu0 %vm1209_vm3, %v5948_v14  ;;  %v2316_v61 = vrot.slane %v6516_v47, 4 }
 0x15e   : > { %v5982_v55 = vsel %vm1564_vm5, %v2316_v61, %v5741_v2  ;;  %v4197_v2 = vld [vmem:[%s6423_s4 + $0x40] sm:$0xff] }
 0x15f   : > { %4592 = vmatmul.mubr.msk.f32.vlgmr.msra.gmra.mrb[0].mxu1 %vm1209_vm3, %v1569_v60  ;;  %4685 = vmatmul.mubr.msk.f32.gmra.mrb[10].mxu0 %vm1209_vm3, %v2310_v0  ;;  %v1583_v60 = vrot.slane %v6518_v34, 4 }
 0x160   : > { %4594 = vmatprep.mubr.msk.f32.mxu1 %vm1209_vm3, %v1572_v44  ;;  %4687 = vmatprep.mubr.msk.f32.mxu0 %vm1209_vm3, %v5967_v48 }
 0x161   : > { %4838 = vmatpush3.msra.mxu1 %v5408_v41  ;;  %v1584_v41 = vsel %vm1564_vm5, %v5860_v25, %v1583_v60 }
 0x163   : > { %4595 = vmatmul.mubr.msk.f32.gmra.mrb[2].mxu1 %vm1209_vm3, %v1574_v10  ;;  %4688 = vmatmul.mubr.msk.f32.gmra.mrb[12].mxu0 %vm1209_vm3, %v2315_v52 }
 0x164   : > { %4597 = vmatprep.mubr.msk.f32.mxu1 %vm1209_vm3, %v5853_v6  ;;  %4690 = vmatprep.mubr.msk.f32.mxu0 %vm1209_vm3, %v5982_v55  ;;  %v1588_v6 = vrot.slane %v6519_v43, 4 }
 0x166   : > { %v1589_v25 = vsel %vm1564_vm5, %v5680_v50, %v1588_v6  ;;  %v6521_v50 = vld [vmem:[#allocation17_spill] sm:$0xff] }
 0x167   : > { %4598 = vmatmul.mubr.msk.f32.gmra.mrb[4].mxu1 %vm1209_vm3, %v1579_v26  ;;  %4691 = vmatmul.mubr.msk.f32.gmra.mrb[14].mxu0 %vm1209_vm3, %v2320_v39 }
 0x168   : > { %4600 = vmatprep.mubr.msk.f32.mxu1 %vm1209_vm3, %v5878_v53  ;;  %4695 = vmatprep.mubr.msk.f32.mxu0 %vm1209_vm3, %v5473_v62  ;;  %v6520_v62 = vld [vmem:[#allocation15_spill] sm:$0xff] }
 0x169   : > { %v1593_v53 = vrot.slane %v6520_v62, 4 }
 0x16b   : > { %4601 = vmatmul.mubr.msk.f32.gmra.mrb[6].mxu1 %vm1209_vm3, %v1584_v41  ;;  %4696 = vmatmul.mubr.msk.f32.vlgmr.msra.gmra.mrb[0].mxu0 %vm1209_vm3, %v5497_v7  ;;  %v1594_v7 = vsel %vm1564_vm5, %v5683_v57, %v1593_v53  ;;  %v6522_v57 = vld [vmem:[#allocation21_spill] sm:$0xff] }
 0x16c   : > { %4720 = vmatpush3.msra.mxu0 %v5883_v45  ;;  %4603 = vmatprep.mubr.msk.f32.mxu1 %vm1209_vm3, %v5899_v54  ;;  %v1598_v45 = vrot.slane %v6521_v50, 4 }
 0x16d   : > { %4698 = vmatprep.mubr.msk.f32.mxu0 %vm1209_vm3, %v5504_v11  ;;  %4745 = vmatprep.subr.mxu0 %v4197_v2 }
 0x16e   : > { %v1599_v11 = vsel %vm1564_vm5, %v5730_v5, %v1598_v45  ;;  %v6523_v5 = vld [vmem:[#allocation25_spill] sm:$0xff] }
 0x16f   : > { %4604 = vmatmul.mubr.msk.f32.gmra.mrb[8].mxu1 %vm1209_vm3, %v1589_v25  ;;  %4699 = vmatmul.mubr.msk.f32.gmra.mrb[2].mxu0 %vm1209_vm3, %v6505_v59  ;;  %v1603_v59 = vrot.slane %v6522_v57, 4 }
 0x170   : > { %4606 = vmatprep.mubr.msk.f32.mxu1 %vm1209_vm3, %v5914_v37  ;;  %4701 = vmatprep.mubr.msk.f32.mxu0 %vm1209_vm3, %v5560_v32 }
 0x171   : > { %v1604_v0 = vsel %vm1564_vm5, %v5733_v24, %v1603_v59  ;;  %v6525_v24 = vld [vmem:[#allocation31_spill] sm:$0xff] }
 0x173   : > { %4607 = vmatmul.mubr.msk.f32.gmra.mrb[10].mxu1 %vm1209_vm3, %v1594_v7  ;;  %4702 = vmatmul.mubr.msk.f32.gmra.mrb[4].mxu0 %vm1209_vm3, %v6509_v33 }
 0x174   : > { %4609 = vmatprep.mubr.msk.f32.mxu1 %vm1209_vm3, %v5931_v16  ;;  %4704 = vmatprep.mubr.msk.f32.mxu0 %vm1209_vm3, %v6508_v63 }
 0x177   : > { %4610 = vmatmul.mubr.msk.f32.gmra.mrb[12].mxu1 %vm1209_vm3, %v1599_v11  ;;  %4705 = vmatmul.mubr.msk.f32.gmra.mrb[6].mxu0 %vm1209_vm3, %v6513_v9 }
 0x178   : > { %4612 = vmatprep.mubr.msk.f32.mxu1 %vm1209_vm3, %v5948_v14  ;;  %4707 = vmatprep.mubr.msk.f32.mxu0 %vm1209_vm3, %v6512_v36 }
 0x17b   : > { %4613 = vmatmul.mubr.msk.f32.gmra.mrb[14].mxu1 %vm1209_vm3, %v1604_v0  ;;  %4708 = vmatmul.mubr.msk.f32.gmra.mrb[8].mxu0 %vm1209_vm3, %v6523_v5 }
 0x17c   : > { %4629 = vmatprep.mubr.msk.f32.mxu1 %vm1209_vm3, %v5560_v32  ;;  %4710 = vmatprep.mubr.msk.f32.mxu0 %vm1209_vm3, %v6516_v47  ;;  %v6527_v32 = vld [vmem:[#allocation33_spill] sm:$0xff] }
 0x17f   : > { %4630 = vmatmul.mubr.msk.f32.vlgmr.msra.gmra.mrb[8].mxu1 %vm1209_vm3, %v6509_v33  ;;  %4711 = vmatmul.mubr.msk.f32.gmra.mrb[10].mxu0 %vm1209_vm3, %v6524_v4  ;;  %v6528_v33 = vld [vmem:[#allocation34_spill] sm:$0xff] }
 0x180   : > { %4632 = vmatprep.mubr.msk.f32.mxu1 %vm1209_vm3, %v6508_v63  ;;  %4713 = vmatprep.mubr.msk.f32.mxu0 %vm1209_vm3, %v6525_v24  ;;  %v6529_v63 = vld [vmem:[#allocation14_spill] sm:$0xff] }
 0x183   : > { %4633 = vmatmul.mubr.msk.f32.gmra.mrb[10].mxu1 %vm1209_vm3, %v6513_v9  ;;  %4714 = vmatmul.mubr.msk.f32.gmra.mrb[12].mxu0 %vm1209_vm3, %v6526_v56  ;;  %v6531_v9 = vld [vmem:[#allocation26_spill] sm:$0xff] }
 0x184   : > { %4635 = vmatprep.mubr.msk.f32.mxu1 %vm1209_vm3, %v6512_v36  ;;  %4716 = vmatprep.mubr.msk.f32.mxu0 %vm1209_vm3, %v6527_v32  ;;  %v6530_v36 = vld [vmem:[#allocation18_spill] sm:$0xff] }
 0x187   : > { %4636 = vmatmul.mubr.msk.f32.gmra.mrb[12].mxu1 %vm1209_vm3, %v6523_v5  ;;  %4717 = vmatmul.mubr.msk.f32.gmra.mrb[14].mxu0 %vm1209_vm3, %v6528_v33 }
 0x188   : > { %4638 = vmatprep.mubr.msk.f32.mxu1 %vm1209_vm3, %v6516_v47  ;;  %4721 = vmatprep.mubr.msk.f32.mxu0 %vm1209_vm3, %v6529_v63 }
 0x18b   : > { %4639 = vmatmul.mubr.msk.f32.gmra.mrb[14].mxu1 %vm1209_vm3, %v6524_v4  ;;  %4722 = vmatmul.mubr.msk.f32.vlgmr.msra.gmra.mrb[0].mxu0 %vm1209_vm3, %v5765_v42  ;;  %v3553_v42 = vld [vmem:[%s6429_s10 + $0x8] sm:$0xff] }
 0x18c   : > { %4746 = vmatpush3.msra.mxu0 %v4197_v2  ;;  %4724 = vmatprep.mubr.msk.f32.mxu0 %vm1209_vm3, %v6530_v36 }
 0x18f   : > { %4725 = vmatmul.mubr.msk.f32.gmra.mrb[2].mxu0 %vm1209_vm3, %v5769_v40 }
 0x190   : > { %4727 = vmatprep.mubr.msk.f32.mxu0 %vm1209_vm3, %v6531_v9 }
 0x193   : > { %4728 = vmatmul.mubr.msk.f32.gmra.mrb[4].mxu0 %vm1209_vm3, %v5773_v46  ;;  %v3294_v46 = vld [vmem:[%s6426_s7] sm:$0xff] }
 0x194   : > { %4730 = vmatprep.mubr.msk.f32.mxu0 %vm1209_vm3, %v6532_v1  ;;  %4771 = vmatprep.subr.mxu1 %v3294_v46 }
 0x195   : > { %4772 = vmatpush3.msra.mxu1 %v3294_v46 }
 0x197   : > { %4731 = vmatmul.mubr.msk.f32.gmra.mrb[6].mxu0 %vm1209_vm3, %v5777_v15  ;;  %v3552_v15 = vld [vmem:[%s6429_s10] sm:$0xff] }
 0x198   : > { %4733 = vmatprep.mubr.msk.f32.mxu0 %vm1209_vm3, %v5712_v17  ;;  %v4833_v40 = vpack.c.bf16 %v3553_v42, %v3552_v15 }
 0x19a   : > { %4834 = vmatprep.subr.bf16.mxu1 %v4833_v40 }
 0x19b   : > { %4734 = vmatmul.mubr.msk.f32.gmra.mrb[8].mxu0 %vm1209_vm3, %v5784_v19 }
 0x19c   : > { %4736 = vmatprep.mubr.msk.f32.mxu0 %vm1209_vm3, %v5718_v20 }
 0x19f   : > { %4737 = vmatmul.mubr.msk.f32.gmra.mrb[10].mxu0 %vm1209_vm3, %v5788_v28 }
 0x1a0   : > { %4739 = vmatprep.mubr.msk.f32.mxu0 %vm1209_vm3, %v5761_v23 }
 0x1a3   : > { %4740 = vmatmul.mubr.msk.f32.gmra.mrb[12].mxu0 %vm1209_vm3, %v5791_v29 }
 0x1a4   : > { %4742 = vmatprep.mubr.msk.f32.mxu0 %vm1209_vm3, %v5798_v8 }
 0x1a7   : > { %4743 = vmatmul.mubr.msk.f32.gmra.mrb[14].mxu0 %vm1209_vm3, %v5804_v51 }
 0x1a8   : > { %4747 = vmatprep.mubr.msk.f32.mxu0 %vm1209_vm3, %v5899_v54 }
 0x1ab   : > { %4748 = vmatmul.mubr.msk.f32.vlgmr.msra.gmra.mrb[0].mxu0 %vm1209_vm3, %v5809_v27 }
 0x1ac   : > { %4750 = vmatprep.mubr.msk.f32.mxu0 %vm1209_vm3, %v5914_v37 }
 0x1af   : > { %4751 = vmatmul.mubr.msk.f32.gmra.mrb[2].mxu0 %vm1209_vm3, %v5813_v58 }
 0x1b0   : > { %4753 = vmatprep.mubr.msk.f32.mxu0 %vm1209_vm3, %v5931_v16  ;;  %v6172_v16 = vld [vmem:[%s6425_s6] ss:$0 sm:$0xff] }
 0x1b3   : > { %4754 = vmatmul.mubr.msk.f32.gmra.mrb[4].mxu0 %vm1209_vm3, %v5817_v35 }
 0x1b4   : > { %4756 = vmatprep.mubr.msk.f32.mxu0 %vm1209_vm3, %v5948_v14 }
 0x1b7   : > { %4757 = vmatmul.mubr.msk.f32.gmra.mrb[6].mxu0 %vm1209_vm3, %v5827_v12 }
 0x1b8   : > { %4759 = vmatprep.mubr.msk.f32.mxu0 %vm1209_vm3, %v5967_v48 }
 0x1bb   : > { %4760 = vmatmul.mubr.msk.f32.gmra.mrb[8].mxu0 %vm1209_vm3, %v5831_v21 }
 0x1bc   : > { %4762 = vmatprep.mubr.msk.f32.mxu0 %vm1209_vm3, %v5982_v55 }
 0x1bf   : > { %4763 = vmatmul.mubr.msk.f32.gmra.mrb[10].mxu0 %vm1209_vm3, %v5835_v30 }
 0x1c0   : > { %4765 = vmatprep.mubr.msk.f32.mxu0 %vm1209_vm3, %v5820_v3 }
 0x1c3   : > { %4766 = vmatmul.mubr.msk.f32.gmra.mrb[12].mxu0 %vm1209_vm3, %v5856_v49 }
 0x1c4   : > { %4768 = vmatprep.mubr.msk.f32.mxu0 %vm1209_vm3, %v5847_v18 }
 0x1c7   : > { %4769 = vmatmul.mubr.msk.f32.gmra.mrb[14].mxu0 %vm1209_vm3, %v5863_v13  ;;  %v6167_v13 = vld [vmem:[%s6424_s5] ss:$0 sm:$0xff] }
 0x232   : > { %v4593_v17 = vpop.f32.mrb[0].mxu1 }
 0x233   : > { %v1705_v20 = vpop.f32.mrb[1].mxu1 }
 0x236   : > { %v4596_v23 = vpop.f32.mrb[2].mxu1 }
 0x237   : > { %v1715_v19 = vpop.f32.mrb[3].mxu1 }
 0x23a   : > { %v4599_v28 = vpop.f32.mrb[4].mxu1 }
 0x23b   : > { %v1725_v29 = vpop.f32.mrb[5].mxu1 }
 0x23e   : > { %v4602_v8 = vpop.f32.mrb[6].mxu1 }
 0x23f   : > { %v1735_v51 = vpop.f32.mrb[7].mxu1 }
 0x252   : > { %v4631_v27 = vpop.f32.mrb[8].mxu1 }
 0x253   : > { %v1983_v58 = vpop.f32.mrb[9].mxu1 }
 0x256   : > { %v6152_v35 = vpop.f32.mrb[10].mxu1 }
 0x257   : > { %v6154_v3 = vpop.f32.mrb[11].mxu1 }
 0x25a   : > { %v6156_v12 = vpop.f32.mrb[12].mxu1 }
 0x25b   : > { %v6158_v21 = vpop.f32.mrb[13].mxu1 }
 0x25e   : > { %v6160_v30 = vpop.f32.mrb[14].mxu1 }
 0x25f   : > { %v6162_v18 = vpop.f32.mrb[15].mxu1 }
 0x27e   : > { %v4749_v49 = vpop.f32.mrb[0].mxu0 }
 0x27f   : > { %v4839_v54 = vadd.f32 %v4749_v49, %v4593_v17  ;;  %v3137_v37 = vpop.f32.mrb[1].mxu0 }
 0x280   : > { %v4840_v14 = vadd.f32 %v3137_v37, %v1705_v20 }
 0x281   : > { %v3240_v44 = vmul.f32 %v4839_v54, %v6167_v13 }
 0x282   : > { %v3239_v48 = vmul.f32 %v4840_v14, %v6167_v13  ;;  %v4752_v47 = vpop.f32.mrb[2].mxu0 }
 0x283   : > { %v3263_v61 = vadd.f32 %v6172_v16, %v3240_v44  ;;  %v4841_v10 = vadd.f32 %v4752_v47, %v4596_v23  ;;  %v3147_v52 = vpop.f32.mrb[3].mxu0 }
 0x284   : > { %v3262_v22 = vadd.f32 %v6172_v16, %v3239_v48  ;;  %v4842_v31 = vadd.f32 %v3147_v52, %v1715_v19 }
 0x285   : > { %v3242_v38 = vmul.f32 %v4841_v10, %v6167_v13  ;;  %v3279_v34 = vmax.f32 %v3263_v61, 0.0 }
 0x286   : > { %v3278_v55 = vmax.f32 %v3262_v22, 0.0  ;;  %v3241_v26 = vmul.f32 %v4842_v31, %v6167_v13  ;;  %v4755_v39 = vpop.f32.mrb[4].mxu0 }
 0x287   : > { %v3265_v60 = vadd.f32 %v6172_v16, %v3242_v38  ;;  %v4843_v41 = vadd.f32 %v4755_v39, %v4599_v28  ;;  %v3157_v43 = vpop.f32.mrb[5].mxu0 }
 0x288   : > { %v3264_v6 = vadd.f32 %v6172_v16, %v3241_v26  ;;  %v4844_v2 = vadd.f32 %v3157_v43, %v1725_v29  ;;  %4773 = vmatprep.mubr.msk.f32.mxu1 %vm1209_vm3, %v3278_v55  ;;  %v3539_v43 = vld [vmem:[%s6227_s23 + $0x18] sm:$0xff] }
 0x289   : > { %v3244_v25 = vmul.f32 %v4843_v41, %v6167_v13  ;;  %4774 = vmatmul.mubr.msk.f32.vlgmr.msra.gmra.mrb[16].mxu1 %vm1209_vm3, %v3279_v34  ;;  %v3281_v50 = vmax.f32 %v3265_v60, 0.0  ;;  %v3536_v60 = vld [vmem:[%s6227_s23] sm:$0xff]  ;;  %v3538_v41 = vld [vmem:[%s6227_s23 + $0x10] sm:$0xff] }
 0x28a   : > { %v3280_v62 = vmax.f32 %v3264_v6, 0.0  ;;  %v3243_v53 = vmul.f32 %v4844_v2, %v6167_v13  ;;  %4836 = vmatpush3.bf16.msra.mxu1 %v4833_v40  ;;  %v4758_v7 = vpop.f32.mrb[6].mxu0  ;;  %v3540_v6 = vld [vmem:[%s6227_s23 + $0x20] sm:$0xff]  ;;  %v3541_v2 = vld [vmem:[%s6227_s23 + $0x28] sm:$0xff] }
 0x28b   : > { %v3267_v45 = vadd.f32 %v6172_v16, %v3244_v25  ;;  %v4845_v11 = vadd.f32 %v4758_v7, %v4602_v8  ;;  %v3167_v57 = vpop.f32.mrb[7].mxu0  ;;  %v3542_v25 = vld [vmem:[%s6227_s23 + $0x30] sm:$0xff]  ;;  %v3545_v7 = vld [vmem:[%s6227_s23 + $0x48] sm:$0xff] }
 0x28c   : > { %v3266_v59 = vadd.f32 %v6172_v16, %v3243_v53  ;;  %v4846_v0 = vadd.f32 %v3167_v57, %v1735_v51  ;;  %4776 = vmatprep.mubr.msk.f32.mxu1 %vm1209_vm3, %v3280_v62  ;;  %v3543_v62 = vld [vmem:[%s6227_s23 + $0x38] sm:$0xff]  ;;  %v3544_v53 = vld [vmem:[%s6227_s23 + $0x40] sm:$0xff]  ;;  %v3549_v57 = vld [vmem:[%s6227_s23 + $0x68] sm:$0xff] }
 0x28d   : > { %v3246_v5 = vmul.f32 %v4845_v11, %v6167_v13  ;;  %4777 = vmatmul.mubr.msk.f32.gmra.mrb[18].mxu1 %vm1209_vm3, %v3281_v50  ;;  %v3283_v32 = vmax.f32 %v3267_v45, 0.0  ;;  %v3546_v50 = vld [vmem:[%s6227_s23 + $0x50] sm:$0xff]  ;;  %v3547_v45 = vld [vmem:[%s6227_s23 + $0x58] sm:$0xff]  ;;  %v3548_v11 = vld [vmem:[%s6227_s23 + $0x60] sm:$0xff] }
 0x28e   : > { %v3282_v4 = vmax.f32 %v3266_v59, 0.0  ;;  %v3245_v24 = vmul.f32 %v4846_v0, %v6167_v13  ;;  %v4761_v56 = vpop.f32.mrb[8].mxu0  ;;  %v3550_v59 = vld [vmem:[%s6227_s23 + $0x70] sm:$0xff]  ;;  %v3551_v0 = vld [vmem:[%s6227_s23 + $0x78] sm:$0xff] }
 0x28f   : > { %v3269_v33 = vadd.f32 %v6172_v16, %v3246_v5  ;;  %v4847_v63 = vadd.f32 %v4761_v56, %v4631_v27  ;;  %v3177_v36 = vpop.f32.mrb[9].mxu0 }
 0x290   : > { %v3268_v9 = vadd.f32 %v6172_v16, %v3245_v24  ;;  %v4848_v1 = vadd.f32 %v3177_v36, %v1983_v58  ;;  %4779 = vmatprep.mubr.msk.f32.mxu1 %vm1209_vm3, %v3282_v4 }
 0x291   : > { %v3248_v46 = vmul.f32 %v4847_v63, %v6167_v13  ;;  %4780 = vmatmul.mubr.msk.f32.gmra.mrb[20].mxu1 %vm1209_vm3, %v3283_v32  ;;  %v3285_v17 = vmax.f32 %v3269_v33, 0.0 }
 0x292   : > { %v3284_v15 = vmax.f32 %v3268_v9, 0.0  ;;  %v3247_v42 = vmul.f32 %v4848_v1, %v6167_v13  ;;  %v4764_v40 = vpop.f32.mrb[10].mxu0 }
 0x293   : > { %v3271_v20 = vadd.f32 %v6172_v16, %v3248_v46  ;;  %v4849_v23 = vadd.f32 %v4764_v40, %v6152_v35  ;;  %v3187_v19 = vpop.f32.mrb[11].mxu0 }
 0x294   : > { %v3270_v28 = vadd.f32 %v6172_v16, %v3247_v42  ;;  %v4850_v29 = vadd.f32 %v3187_v19, %v6154_v3  ;;  %4782 = vmatprep.mubr.msk.f32.mxu1 %vm1209_vm3, %v3284_v15  ;;  %v6288_v19 = vld [vmem:[%s6430_s11] ss:$0 sm:$0xff] }
 0x295   : > { %v3250_v8 = vmul.f32 %v4849_v23, %v6167_v13  ;;  %4783 = vmatmul.mubr.msk.f32.gmra.mrb[22].mxu1 %vm1209_vm3, %v3285_v17  ;;  %v3287_v49 = vmax.f32 %v3271_v20, 0.0  ;;  %v6279_v17 = vld [vmem:[%s6427_s8] ss:$0 sm:$0xff] }
 0x296   : > { %v3286_v51 = vmax.f32 %v3270_v28, 0.0  ;;  %v3249_v27 = vmul.f32 %v4850_v29, %v6167_v13  ;;  %v4767_v58 = vpop.f32.mrb[12].mxu0  ;;  %v6294_v29 = vld [vmem:[%s6428_s9] ss:$0 sm:$0xff] }
 0x297   : > { %v3273_v54 = vadd.f32 %v6172_v16, %v3250_v8  ;;  %v4851_v35 = vadd.f32 %v4767_v58, %v6156_v12  ;;  %v3197_v37 = vpop.f32.mrb[13].mxu0 }
 0x298   : > { %v3272_v14 = vadd.f32 %v6172_v16, %v3249_v27  ;;  %v4852_v3 = vadd.f32 %v3197_v37, %v6158_v21  ;;  %4785 = vmatprep.mubr.msk.f32.mxu1 %vm1209_vm3, %v3286_v51  ;;  %v6300_v27 = vld [vmem:[%s6431_s12] ss:$0 sm:$0xff] }
 0x299   : > { %v3252_v44 = vmul.f32 %v4851_v35, %v6167_v13  ;;  %4786 = vmatmul.mubr.msk.f32.gmra.mrb[24].mxu1 %vm1209_vm3, %v3287_v49  ;;  %v3289_v10 = vmax.f32 %v3273_v54, 0.0 }
 0x29a   : > { %v3288_v48 = vmax.f32 %v3272_v14, 0.0  ;;  %v3251_v47 = vmul.f32 %v4852_v3, %v6167_v13  ;;  %v4770_v61 = vpop.f32.mrb[14].mxu0 }
 0x29b   : > { %v3275_v12 = vadd.f32 %v6172_v16, %v3252_v44  ;;  %v4853_v52 = vadd.f32 %v4770_v61, %v6160_v30  ;;  %v3207_v22 = vpop.f32.mrb[15].mxu0 }
 0x29c   : > { %v3274_v21 = vadd.f32 %v6172_v16, %v3251_v47  ;;  %v4854_v31 = vadd.f32 %v3207_v22, %v6162_v18  ;;  %4788 = vmatprep.mubr.msk.f32.mxu1 %vm1209_vm3, %v3288_v48 }
 0x29d   : > { %v3254_v38 = vmul.f32 %v4853_v52, %v6167_v13  ;;  %4789 = vmatmul.mubr.msk.f32.gmra.mrb[26].mxu1 %vm1209_vm3, %v3289_v10  ;;  %v3291_v39 = vmax.f32 %v3275_v12, 0.0 }
 0x29e   : > { %v3290_v55 = vmax.f32 %v3274_v21, 0.0  ;;  %v3253_v26 = vmul.f32 %v4854_v31, %v6167_v13 }
 0x29f   : > { %v3277_v34 = vadd.f32 %v6172_v16, %v3254_v38 }
 0x2a0   : > { %v3276_v30 = vadd.f32 %v6172_v16, %v3253_v26  ;;  %4791 = vmatprep.mubr.msk.f32.mxu1 %vm1209_vm3, %v3290_v55  ;;  %v3537_v16 = vld [vmem:[%s6227_s23 + $0x8] sm:$0xff] }
 0x2a1   : > { %4792 = vmatmul.mubr.msk.f32.gmra.mrb[28].mxu1 %vm1209_vm3, %v3291_v39  ;;  %v3293_v13 = vmax.f32 %v3277_v34, 0.0 }
 0x2a2   : > { %v3292_v18 = vmax.f32 %v3276_v30, 0.0 }
 0x2a4   : > { %4794 = vmatprep.mubr.msk.f32.mxu1 %vm1209_vm3, %v3292_v18 }
 0x2a5   : > { %4795 = vmatmul.mubr.msk.f32.gmra.mrb[30].mxu1 %vm1209_vm3, %v3293_v13 }
 0x2a6   : > { %4801 = vmatprep.mubr.msk.f32.mxu1 %vm3554_vm6, %v3536_v60 }
 0x2a9   : > { %4802 = vmatmul.mubr.msk.f32.vlgmr.msra.gmra.mrb[32].mxu1 %vm3554_vm6, %v3537_v16 }
 0x2aa   : > { %4804 = vmatprep.mubr.msk.f32.mxu1 %vm3554_vm6, %v3538_v41 }
 0x2ad   : > { %4805 = vmatmul.mubr.msk.f32.gmra.mrb[34].mxu1 %vm3554_vm6, %v3539_v43 }
 0x2ae   : > { %4807 = vmatprep.mubr.msk.f32.mxu1 %vm3554_vm6, %v3540_v6 }
 0x2b1   : > { %4808 = vmatmul.mubr.msk.f32.gmra.mrb[36].mxu1 %vm3554_vm6, %v3541_v2 }
 0x2b2   : > { %4810 = vmatprep.mubr.msk.f32.mxu1 %vm3554_vm6, %v3542_v25 }
 0x2b5   : > { %4811 = vmatmul.mubr.msk.f32.gmra.mrb[38].mxu1 %vm3554_vm6, %v3543_v62 }
 0x2b6   : > { %4813 = vmatprep.mubr.msk.f32.mxu1 %vm3554_vm6, %v3544_v53 }
 0x2b9   : > { %4814 = vmatmul.mubr.msk.f32.gmra.mrb[40].mxu1 %vm3554_vm6, %v3545_v7 }
 0x2ba   : > { %4816 = vmatprep.mubr.msk.f32.mxu1 %vm3554_vm6, %v3546_v50 }
 0x2bd   : > { %4817 = vmatmul.mubr.msk.f32.gmra.mrb[42].mxu1 %vm3554_vm6, %v3547_v45 }
 0x2be   : > { %4819 = vmatprep.mubr.msk.f32.mxu1 %vm3554_vm6, %v3548_v11 }
 0x2c1   : > { %4820 = vmatmul.mubr.msk.f32.gmra.mrb[44].mxu1 %vm3554_vm6, %v3549_v57 }
 0x2c2   : > { %4822 = vmatprep.mubr.msk.f32.mxu1 %vm3554_vm6, %v3550_v59 }
 0x2c5   : > { %4823 = vmatmul.mubr.msk.f32.gmra.mrb[46].mxu1 %vm3554_vm6, %v3551_v0 }
 0x35c   : > { %v4775_v5 = vpop.f32.mrb[16].mxu1 }
 0x35d   : > { %v3409_v4 = vpop.f32.mrb[17].mxu1  ;;  %v3496_v28 = vmul.f32 %v4775_v5, %v6279_v17 }
 0x35e   : > { %v3495_v8 = vmul.f32 %v6279_v17, %v3409_v4 }
 0x35f   : > { %v3519_v35 = vadd.f32 %v6294_v29, %v3496_v28 }
 0x360   : > { %v4778_v24 = vpop.f32.mrb[18].mxu1  ;;  %v3518_v3 = vadd.f32 %v6294_v29, %v3495_v8 }
 0x361   : > { %v3419_v56 = vpop.f32.mrb[19].mxu1  ;;  %v3498_v37 = vmul.f32 %v4778_v24, %v6279_v17 }
 0x362   : > { %v3497_v44 = vmul.f32 %v6279_v17, %v3419_v56 }
 0x363   : > { %v3521_v21 = vadd.f32 %v6294_v29, %v3498_v37 }
 0x364   : > { %v4781_v32 = vpop.f32.mrb[20].mxu1  ;;  %v3520_v26 = vadd.f32 %v6294_v29, %v3497_v44 }
 0x365   : > { %v3429_v33 = vpop.f32.mrb[21].mxu1  ;;  %v3500_v31 = vmul.f32 %v4781_v32, %v6279_v17 }
 0x366   : > { %v3499_v39 = vmul.f32 %v6279_v17, %v3429_v33 }
 0x367   : > { %v3523_v6 = vadd.f32 %v6294_v29, %v3500_v31 }
 0x368   : > { %v4784_v63 = vpop.f32.mrb[22].mxu1  ;;  %v3522_v53 = vadd.f32 %v6294_v29, %v3499_v39 }
 0x369   : > { %v3439_v36 = vpop.f32.mrb[23].mxu1  ;;  %v3502_v2 = vmul.f32 %v4784_v63, %v6279_v17 }
 0x36a   : > { %v3501_v7 = vmul.f32 %v6279_v17, %v3439_v36 }
 0x36b   : > { %v3525_v24 = vadd.f32 %v6294_v29, %v3502_v2 }
 0x36c   : > { %v6264_v9 = vpop.f32.mrb[24].mxu1  ;;  %v3524_v63 = vadd.f32 %v6294_v29, %v3501_v7 }
 0x36d   : > { %v6266_v1 = vpop.f32.mrb[25].mxu1  ;;  %v3504_v56 = vmul.f32 %v6264_v9, %v6279_v17 }
 0x36e   : > { %v3503_v36 = vmul.f32 %v6279_v17, %v6266_v1 }
 0x36f   : > { %v3527_v37 = vadd.f32 %v6294_v29, %v3504_v56 }
 0x370   : > { %v6268_v46 = vpop.f32.mrb[26].mxu1  ;;  %v3526_v44 = vadd.f32 %v6294_v29, %v3503_v36 }
 0x371   : > { %v6270_v15 = vpop.f32.mrb[27].mxu1  ;;  %v3506_v1 = vmul.f32 %v6268_v46, %v6279_v17 }
 0x373   : > { %v3529_v31 = vadd.f32 %v6294_v29, %v3506_v1 }
 0x374   : > { %v6272_v42 = vpop.f32.mrb[28].mxu1 }
 0x375   : > { %v6274_v40 = vpop.f32.mrb[29].mxu1 }
 0x376   : > { %v3507_v39 = vmul.f32 %v6279_v17, %v6274_v40 }
 0x378   : > { %v6281_v20 = vpop.f32.mrb[30].mxu1 }
 0x379   : > { %v6283_v23 = vpop.f32.mrb[31].mxu1  ;;  %v3510_v40 = vmul.f32 %v6281_v20, %v6279_v17 }
 0x37c   : > { %v4803_v51 = vpop.f32.mrb[32].mxu1 }
 0x37d   : > { %v3756_v58 = vmul.f32 %v4803_v51, %v6288_v19  ;;  %v3669_v49 = vpop.f32.mrb[33].mxu1 }
 0x37e   : > { %v3755_v54 = vmul.f32 %v6288_v19, %v3669_v49 }
 0x37f   : > { %v3779_v14 = vadd.f32 %v6300_v27, %v3756_v58 }
 0x380   : > { %v3778_v48 = vadd.f32 %v6300_v27, %v3755_v54  ;;  %v4806_v47 = vpop.f32.mrb[34].mxu1 }
 0x381   : > { %v3795_v61 = vadd.f32 %v3779_v14, %v3519_v35  ;;  %v3758_v10 = vmul.f32 %v4806_v47, %v6288_v19  ;;  %v3679_v12 = vpop.f32.mrb[35].mxu1 }
 0x382   : > { %v3794_v52 = vadd.f32 %v3778_v48, %v3518_v3  ;;  %v3757_v22 = vmul.f32 %v6288_v19, %v3679_v12  ;;  %v3505_v48 = vmul.f32 %v6279_v17, %v6270_v15  ;;  %v3508_v15 = vmul.f32 %v6272_v42, %v6279_v17 }
 0x383   : > { %v3811_v38 = vmax.f32 %v3795_v61, 0.0  ;;  %v3781_v55 = vadd.f32 %v6300_v27, %v3758_v10 }
 0x384   : > { %v3810_v34 = vmax.f32 %v3794_v52, 0.0  ;;  %v3780_v30 = vadd.f32 %v6300_v27, %v3757_v22  ;;  %v4809_v18 = vpop.f32.mrb[36].mxu1 }
 0x385   : > { %3827 = vst.msk [vmem:[%s5160_s14 + $0x8] sm:$0xff] %vm1209_vm3, %v3811_v38  ;;  %v3797_v13 = vadd.f32 %v3781_v55, %v3521_v21  ;;  %v3760_v60 = vmul.f32 %v4809_v18, %v6288_v19  ;;  %v3689_v16 = vpop.f32.mrb[37].mxu1 }
 0x386   : > { %3826 = vst.msk [vmem:[%s5160_s14] sm:$0xff] %vm1209_vm3, %v3810_v34  ;;  %v3796_v41 = vadd.f32 %v3780_v30, %v3520_v26  ;;  %v3759_v43 = vmul.f32 %v6288_v19, %v3689_v16  ;;  %v3528_v26 = vadd.f32 %v6294_v29, %v3505_v48 }
 0x387   : > { %v3813_v25 = vmax.f32 %v3797_v13, 0.0  ;;  %v3783_v62 = vadd.f32 %v6300_v27, %v3760_v60 }
 0x388   : > { %v3812_v50 = vmax.f32 %v3796_v41, 0.0  ;;  %v3782_v45 = vadd.f32 %v6300_v27, %v3759_v43  ;;  %v4812_v11 = vpop.f32.mrb[38].mxu1  ;;  %v3531_v43 = vadd.f32 %v6294_v29, %v3508_v15 }
 0x389   : > { %3829 = vst.msk [vmem:[%s5160_s14 + $0x18] sm:$0xff] %vm1209_vm3, %v3813_v25  ;;  %v3799_v57 = vadd.f32 %v3783_v62, %v3523_v6  ;;  %v3762_v59 = vmul.f32 %v4812_v11, %v6288_v19  ;;  %v3699_v0 = vpop.f32.mrb[39].mxu1  ;;  %v3530_v25 = vadd.f32 %v6294_v29, %v3507_v39  ;;  %v3509_v62 = vmul.f32 %v6279_v17, %v6283_v23 }
 0x38a   : > { %3828 = vst.msk [vmem:[%s5160_s14 + $0x10] sm:$0xff] %vm1209_vm3, %v3812_v50  ;;  %v3798_v5 = vadd.f32 %v3782_v45, %v3522_v53  ;;  %v3761_v4 = vmul.f32 %v6288_v19, %v3699_v0  ;;  %v3533_v17 = vadd.f32 %v6294_v29, %v3510_v40 }
 0x38b   : > { %v3815_v32 = vmax.f32 %v3799_v57, 0.0  ;;  %v3785_v33 = vadd.f32 %v6300_v27, %v3762_v59 }
 0x38c   : > { %v3814_v28 = vmax.f32 %v3798_v5, 0.0  ;;  %v3784_v8 = vadd.f32 %v6300_v27, %v3761_v4  ;;  %v4815_v51 = vpop.f32.mrb[40].mxu1  ;;  %v3532_v5 = vadd.f32 %v6294_v29, %v3509_v62 }
 0x38d   : > { %3831 = vst.msk [vmem:[%s5160_s14 + $0x28] sm:$0xff] %vm1209_vm3, %v3815_v32  ;;  %v3801_v58 = vadd.f32 %v3785_v33, %v3525_v24  ;;  %v3764_v49 = vmul.f32 %v4815_v51, %v6288_v19  ;;  %v3709_v54 = vpop.f32.mrb[41].mxu1 }
 0x38e   : > { %3830 = vst.msk [vmem:[%s5160_s14 + $0x20] sm:$0xff] %vm1209_vm3, %v3814_v28  ;;  %v3800_v9 = vadd.f32 %v3784_v8, %v3524_v63  ;;  %v3763_v35 = vmul.f32 %v6288_v19, %v3709_v54 }
 0x38f   : > { %v3817_v14 = vmax.f32 %v3801_v58, 0.0  ;;  %v3787_v3 = vadd.f32 %v6300_v27, %v3764_v49 }
 0x390   : > { %v3816_v47 = vmax.f32 %v3800_v9, 0.0  ;;  %v3786_v61 = vadd.f32 %v6300_v27, %v3763_v35  ;;  %v4818_v10 = vpop.f32.mrb[42].mxu1 }
 0x391   : > { %3833 = vst.msk [vmem:[%s5160_s14 + $0x38] sm:$0xff] %vm1209_vm3, %v3817_v14  ;;  %v3803_v12 = vadd.f32 %v3787_v3, %v3527_v37  ;;  %v3766_v52 = vmul.f32 %v4818_v10, %v6288_v19  ;;  %v3719_v22 = vpop.f32.mrb[43].mxu1 }
 0x392   : > { %3832 = vst.msk [vmem:[%s5160_s14 + $0x30] sm:$0xff] %vm1209_vm3, %v3816_v47  ;;  %v3802_v46 = vadd.f32 %v3786_v61, %v3526_v44  ;;  %v3765_v21 = vmul.f32 %v6288_v19, %v3719_v22 }
 0x393   : > { %v3819_v38 = vmax.f32 %v3803_v12, 0.0  ;;  %v3789_v55 = vadd.f32 %v6300_v27, %v3766_v52 }
 0x394   : > { %v3818_v34 = vmax.f32 %v3802_v46, 0.0  ;;  %v3788_v30 = vadd.f32 %v6300_v27, %v3765_v21  ;;  %v4821_v18 = vpop.f32.mrb[44].mxu1 }
 0x395   : > { %3835 = vst.msk [vmem:[%s5160_s14 + $0x48] sm:$0xff] %vm1209_vm3, %v3819_v38  ;;  %v3805_v13 = vadd.f32 %v3789_v55, %v3529_v31  ;;  %v3768_v60 = vmul.f32 %v4821_v18, %v6288_v19  ;;  %v3729_v16 = vpop.f32.mrb[45].mxu1 }
 0x396   : > { %3834 = vst.msk [vmem:[%s5160_s14 + $0x40] sm:$0xff] %vm1209_vm3, %v3818_v34  ;;  %v3804_v42 = vadd.f32 %v3788_v30, %v3528_v26  ;;  %v3767_v41 = vmul.f32 %v6288_v19, %v3729_v16 }
 0x397   : > { %v3821_v6 = vmax.f32 %v3805_v13, 0.0  ;;  %v3791_v2 = vadd.f32 %v6300_v27, %v3768_v60 }
 0x398   : > { %v3820_v53 = vmax.f32 %v3804_v42, 0.0  ;;  %v3790_v7 = vadd.f32 %v6300_v27, %v3767_v41  ;;  %v4824_v50 = vpop.f32.mrb[46].mxu1 }
 0x399   : > { %3837 = vst.msk [vmem:[%s5160_s14 + $0x58] sm:$0xff] %vm1209_vm3, %v3821_v6  ;;  %v3807_v45 = vadd.f32 %v3791_v2, %v3531_v43  ;;  %v3770_v11 = vmul.f32 %v4824_v50, %v6288_v19  ;;  %v3739_v20 = vpop.f32.mrb[47].mxu1 }
 0x39a   : > { %3836 = vst.msk [vmem:[%s5160_s14 + $0x50] sm:$0xff] %vm1209_vm3, %v3820_v53  ;;  %v3806_v57 = vadd.f32 %v3790_v7, %v3530_v25  ;;  %v3769_v59 = vmul.f32 %v6288_v19, %v3739_v20 }
 0x39b   : > { %v3823_v23 = vmax.f32 %v3807_v45, 0.0  ;;  %v3793_v0 = vadd.f32 %v6300_v27, %v3770_v11 }
 0x39c   : > { %v3822_v4 = vmax.f32 %v3806_v57, 0.0  ;;  %v3792_v24 = vadd.f32 %v6300_v27, %v3769_v59 }
 0x39d   : > { %3839 = vst.msk [vmem:[%s5160_s14 + $0x68] sm:$0xff] %vm1209_vm3, %v3823_v23  ;;  %v3809_v56 = vadd.f32 %v3793_v0, %v3533_v17 }
 0x39e   : > { %3838 = vst.msk [vmem:[%s5160_s14 + $0x60] sm:$0xff] %vm1209_vm3, %v3822_v4  ;;  %v3808_v32 = vadd.f32 %v3792_v24, %v3532_v5 }
 0x39f   : > { %v3825_v33 = vmax.f32 %v3809_v56, 0.0 }
 0x3a0   : > { %v3824_v63 = vmax.f32 %v3808_v32, 0.0 }
 0x3a1   : > { %3841 = vst.msk [vmem:[%s5160_s14 + $0x78] sm:$0xff] %vm1209_vm3, %v3825_v33 }
 0x3a2   : > { %3840 = vst.msk [vmem:[%s5160_s14 + $0x70] sm:$0xff] %vm1209_vm3, %v3824_v63 }
 0x3a3 PF: > { %s23_s29 = sadd.s32 1, %s5046_s29   ;;  %s6533_s25 = sld [smem:[#allocation3_spill]] }
 0x3a4   : > { %p20_p8 = scmp.ge.s32.totalorder %s23_s29, 6   ;;  %s6534_s26 = sld [smem:[#allocation4_spill]] }
 0x3a5   : > { %s6535_s27 = sld [smem:[#allocation5_spill]]  ;;  %s6536_s28 = sld [smem:[#allocation6_spill]] }
 0x3a6   :  { %22 = sbr.rel (!%p20_p8) target bundleno = 3 (0x3), region = 121 }

// kernel: _lambda_.4
= control target key start
LH: loop header
LB: loop body
LE: loop exit
PB: predicated region body
PF: predicated region fallthrough
CT: control target
= control target key end

     0   :  { %s4694_s13 = smov 0   ;;  %s4696_s14 = smov 0   ;;  %s5913_s0 = inlined_call_operand.vmem [shape: f32[2,16,16,8], index: 0, kind: input, shape index: {}]   ;;  %s5914_s1 = inlined_call_operand.vmem [shape: f32[8,8], index: 1, kind: input, shape index: {}]   ;;  %s5915_s2 = inlined_call_operand.vmem [shape: f32[1,8], index: 2, kind: input, shape index: {}]   ;;  %s5916_s3 = inlined_call_operand.vmem [shape: f32[1,8], index: 3, kind: input, shape index: {}]   ;;  %s5917_s4 = inlined_call_operand.vmem [shape: f32[3,3,8,8], index: 4, kind: input, shape index: {}]   ;;  %s5918_s5 = inlined_call_operand.vmem [shape: f32[1,8], index: 5, kind: input, shape index: {}]   ;;  %s5919_s6 = inlined_call_operand.vmem [shape: f32[1,8], index: 6, kind: input, shape index: {}]   ;;  %s5920_s7 = inlined_call_operand.vmem [shape: f32[8,8], index: 7, kind: input, shape index: {}]   ;;  %s5921_s8 = inlined_call_operand.vmem [shape: f32[1,8], index: 8, kind: input, shape index: {}]   ;;  %s5922_s9 = inlined_call_operand.vmem [shape: f32[1,8], index: 9, kind: input, shape index: {}]   ;;  %s5923_s10 = inlined_call_operand.vmem [shape: f32[2,16,16,8], index: 10, kind: output, shape index: {}]  }
   0x1   :  { %s4698_s15 = smov 0   ;;  %s4700_s16 = smov 0  }
   0x2   :  { %s4702_s17 = smov 0  }
   0x3 LB: > { %s29_s18 = sadd.s32 1, %s4628_s15  ;;  %s32_s19 = sadd.s32 1, %s4632_s16  ;;  %s4636_s17 = sphi %s4702_s17, %s20_s17   ;;  %s4632_s16 = sphi %s4700_s16, %s6017_s16   ;;  %s4628_s15 = sphi %s4698_s15, %s6016_s15   ;;  %s4624_s14 = sphi %s4696_s14, %s6015_s14   ;;  %s4620_s13 = sphi %s4694_s13, %s6014_s13  }
   0x4   : > { %p30_p0 = scmp.ge.s32.totalorder %s29_s18, 2  ;;  %p3622_p1 = scmp.ge.s32.totalorder %s4636_s17, 1 }
   0x5   : > { %p326_p2 = scmp.lt.s32.totalorder %s4636_s17, 5 }
   0x6   : > { %s6019_s18 = smov (%p30_p0, %s29_s18), 0  ;;  %s6021_s19 = smov (!%p30_p0, %s32_s19), %s4632_s16 }
   0x7   : > { %p327_p3 = pnand %p3622_p1, %p326_p2  ;;  %p34_p4 = scmp.ge.s32.totalorder %s6021_s19, 2 }
   0x9   : > { %s6023_s19 = smov (%p34_p4, %s6021_s19), 0  ;;  %330 = sbr.rel (%p327_p3) target bundleno = 884 (0x374), region = 60 }
   0xa   : > { %5956 = sst [smem:[#allocation3_spill]] %s6023_s19 }
  0x10   : > { %p369_p5 = scmp.lt.s32.totalorder %s4624_s14, 1  ;;  %s3625_s20 = sshll.u32 %s4620_s13, 3 }
  0x11   : > { %p377_p6 = scmp.lt.s32.totalorder %s3625_s20, 15  ;;  %p3629_p7 = scmp.ne.s32.totalorder %s4620_s13, 0 }
  0x12   : > { %s6025_s14 = smov (!%p369_p5, %s4624_s14), 1  ;;  %v4741_v0 = vld [vmem:[%s5914_s1] sm:$0xff] (!%p3629_p7)  ;;  %vm389_vm0 = vcmask (!%p3629_p7), 64512   ;;  %vm392_vm1 = vcmask (!%p3629_p7), 60416   ;;  %v4638_v5 = vmov (!%p3629_p7), 0.0  }
  0x13   : > { %s6027_s20 = smov (!%p377_p6, %s3625_s20), 15  ;;  %s3911_s21 = sshll.u32 %s6025_s14, 8  ;;  %4117 = vmatprep.subr.mxu0 (!%p3629_p7), %v4741_v0  ;;  %4143 = vmatprep.subr.mxu1 (!%p3629_p7), %v4741_v0  ;;  %390 = vst.msk [vmem:[#allocation2] sm:$0xff] (!%p3629_p7), %vm389_vm0, %v4638_v5  ;;  %391 = vst.msk [vmem:[#allocation2 + $0x8] sm:$0xff] (!%p3629_p7), %vm389_vm0, %v4638_v5  ;;  %v4886_v34 = vld [vmem:[%s5915_s2] ss:$0 sm:$0xff] (!%p3629_p7) }
  0x14   : > { %s3627_s22 = sshll.u32 %s6025_s14, 5  ;;  %s4730_s25 = scalar_lea.vmem %s5913_s0, %s3911_s21  ;;  %393 = vst.msk [vmem:[#allocation2 + $0x10] sm:$0xf] (!%p3629_p7), %vm392_vm1, %v4638_v5  ;;  %396 = vst.msk [vmem:[#allocation2 + $0x28] sm:$0xf] (!%p3629_p7), %vm392_vm1, %v4638_v5  ;;  %4118 = vmatpush3.msra.mxu0 (!%p3629_p7), %v4741_v0  ;;  %4144 = vmatpush3.msra.mxu1 (!%p3629_p7), %v4741_v0 }
  0x15   : > { %s3626_s26 = sshll.u32 %s6027_s20, 1  ;;  %388 = sbr.rel (%p3629_p7) target bundleno = 272 (0x110), region = 64  ;;  %v4744_v1 = vld [vmem:[%s4730_s25] sm:$0xff] (!%p3629_p7)  ;;  %v4752_v3 = vld [vmem:[%s4730_s25 + $0x8] sm:$0xff] (!%p3629_p7)  ;;  %394 = vst.msk [vmem:[#allocation2 + $0x18] sm:$0xff] (!%p3629_p7), %vm389_vm0, %v4638_v5  ;;  %395 = vst.msk [vmem:[#allocation2 + $0x20] sm:$0xff] (!%p3629_p7), %vm389_vm0, %v4638_v5 }
  0x16   : > { %s381_s27 = sadd.s32 %s3627_s22, %s3626_s26  ;;  %v4747_v2 = vld [vmem:[%s4730_s25 + $0x80] sm:$0xff] (!%p3629_p7)  ;;  %v4755_v4 = vld [vmem:[%s4730_s25 + $0x88] sm:$0xff] (!%p3629_p7)  ;;  %398 = vst.msk [vmem:[#allocation2 + $0x38] sm:$0xff] (!%p3629_p7), %vm389_vm0, %v4638_v5  ;;  %445 = vst.msk [vmem:[#allocation2 + $0x1b0] sm:$0xff] (!%p3629_p7), %vm389_vm0, %v4638_v5  ;;  %4119 = vmatprep.mubr.msk.f32.mxu0 (!%p3629_p7), %vm389_vm0, %v4744_v1 }
  0x17   : > { %s3628_s28 = sshll.u32 %s381_s27, 3  ;;  %399 = vst.msk [vmem:[#allocation2 + $0x40] sm:$0xf] (!%p3629_p7), %vm392_vm1, %v4638_v5  ;;  %447 = vst.msk [vmem:[#allocation2 + $0x1c0] sm:$0xf] (!%p3629_p7), %vm392_vm1, %v4638_v5  ;;  %v453_v6 = vld [vmem:[%s4730_s25 + $0x10] sm:$0xff] (!%p3629_p7)  ;;  %4145 = vmatprep.mubr.msk.f32.mxu1 (!%p3629_p7), %vm389_vm0, %v4747_v2  ;;  %4120 = vmatmul.mubr.msk.f32.vlgmr.msra.gmra.mrb[0].mxu0 (!%p3629_p7), %vm389_vm0, %v4752_v3 }
  0x18   : > { %s4735_s11 = scalar_lea.vmem %s5923_s10, %s3628_s28  ;;  %446 = vst.msk [vmem:[#allocation2 + $0x1b8] sm:$0xff] (!%p3629_p7), %vm389_vm0, %v4638_v5  ;;  %448 = vst.msk [vmem:[#allocation2 + $0x1c8] sm:$0xff] (!%p3629_p7), %vm389_vm0, %v4638_v5  ;;  %v3650_v7 = vld [vmem:[%s4730_s25 + $0x90] sm:$0xff] (!%p3629_p7)  ;;  %4146 = vmatmul.mubr.msk.f32.vlgmr.msra.gmra.mrb[0].mxu1 (!%p3629_p7), %vm389_vm0, %v4755_v4  ;;  %4122 = vmatprep.mubr.msk.f32.mxu0 (!%p3629_p7), %vm389_vm0, %v453_v6  ;;  %v454_v8 = vld [vmem:[%s4730_s25 + $0x18] sm:$0xff] (!%p3629_p7) }
  0x19   : > { %449 = vst.msk [vmem:[#allocation2 + $0x1d0] sm:$0xff] (!%p3629_p7), %vm389_vm0, %v4638_v5  ;;  %397 = vst.msk [vmem:[#allocation2 + $0x30] sm:$0xff] (!%p3629_p7), %vm389_vm0, %v4638_v5  ;;  %4148 = vmatprep.mubr.msk.f32.mxu1 (!%p3629_p7), %vm389_vm0, %v3650_v7  ;;  %v3651_v9 = vld [vmem:[%s4730_s25 + $0x98] sm:$0xff] (!%p3629_p7)  ;;  %v455_v10 = vld [vmem:[%s4730_s25 + $0x20] sm:$0xff] (!%p3629_p7) }
  0x1a   : > { %450 = vst.msk [vmem:[#allocation2 + $0x1d8] sm:$0xf] (!%p3629_p7), %vm392_vm1, %v4638_v5  ;;  %402 = vst.msk [vmem:[#allocation2 + $0x58] sm:$0xf] (!%p3629_p7), %vm392_vm1, %v4638_v5  ;;  %v3652_v11 = vld [vmem:[%s4730_s25 + $0xa0] sm:$0xff] (!%p3629_p7)  ;;  %v456_v12 = vld [vmem:[%s4730_s25 + $0x28] sm:$0xff] (!%p3629_p7) }
  0x1b   : > { %400 = vst.msk [vmem:[#allocation2 + $0x48] sm:$0xff] (!%p3629_p7), %vm389_vm0, %v4638_v5  ;;  %401 = vst.msk [vmem:[#allocation2 + $0x50] sm:$0xff] (!%p3629_p7), %vm389_vm0, %v4638_v5  ;;  %4123 = vmatmul.mubr.msk.f32.gmra.mrb[2].mxu0 (!%p3629_p7), %vm389_vm0, %v454_v8  ;;  %v3653_v13 = vld [vmem:[%s4730_s25 + $0xa8] sm:$0xff] (!%p3629_p7)  ;;  %v457_v14 = vld [vmem:[%s4730_s25 + $0x30] sm:$0xff] (!%p3629_p7) }
  0x1c   : > { %403 = vst.msk [vmem:[#allocation2 + $0x60] sm:$0xff] %vm389_vm0, %v4638_v5  ;;  %404 = vst.msk [vmem:[#allocation2 + $0x68] sm:$0xff] %vm389_vm0, %v4638_v5  ;;  %4149 = vmatmul.mubr.msk.f32.gmra.mrb[2].mxu1 %vm389_vm0, %v3651_v9  ;;  %4125 = vmatprep.mubr.msk.f32.mxu0 %vm389_vm0, %v455_v10  ;;  %v3654_v15 = vld [vmem:[%s4730_s25 + $0xb0] sm:$0xff]  ;;  %v458_v16 = vld [vmem:[%s4730_s25 + $0x38] sm:$0xff] }
  0x1d   : > { %405 = vst.msk [vmem:[#allocation2 + $0x70] sm:$0xf] %vm392_vm1, %v4638_v5  ;;  %408 = vst.msk [vmem:[#allocation2 + $0x88] sm:$0xf] %vm392_vm1, %v4638_v5  ;;  %4151 = vmatprep.mubr.msk.f32.mxu1 %vm389_vm0, %v3652_v11  ;;  %v3655_v17 = vld [vmem:[%s4730_s25 + $0xb8] sm:$0xff]  ;;  %v459_v18 = vld [vmem:[%s4730_s25 + $0x40] sm:$0xff] }
  0x1e   : > { %406 = vst.msk [vmem:[#allocation2 + $0x78] sm:$0xff] %vm389_vm0, %v4638_v5  ;;  %407 = vst.msk [vmem:[#allocation2 + $0x80] sm:$0xff] %vm389_vm0, %v4638_v5  ;;  %v3656_v19 = vld [vmem:[%s4730_s25 + $0xc0] sm:$0xff]  ;;  %v460_v20 = vld [vmem:[%s4730_s25 + $0x48] sm:$0xff] }
  0x1f   : > { %409 = vst.msk [vmem:[#allocation2 + $0x90] sm:$0xff] %vm389_vm0, %v4638_v5  ;;  %410 = vst.msk [vmem:[#allocation2 + $0x98] sm:$0xff] %vm389_vm0, %v4638_v5  ;;  %4126 = vmatmul.mubr.msk.f32.gmra.mrb[4].mxu0 %vm389_vm0, %v456_v12  ;;  %v3657_v21 = vld [vmem:[%s4730_s25 + $0xc8] sm:$0xff]  ;;  %v461_v22 = vld [vmem:[%s4730_s25 + $0x50] sm:$0xff] }
  0x20   : > { %411 = vst.msk [vmem:[#allocation2 + $0xa0] sm:$0xf] %vm392_vm1, %v4638_v5  ;;  %414 = vst.msk [vmem:[#allocation2 + $0xb8] sm:$0xf] %vm392_vm1, %v4638_v5  ;;  %4152 = vmatmul.mubr.msk.f32.gmra.mrb[4].mxu1 %vm389_vm0, %v3653_v13  ;;  %4128 = vmatprep.mubr.msk.f32.mxu0 %vm389_vm0, %v457_v14  ;;  %v3658_v23 = vld [vmem:[%s4730_s25 + $0xd0] sm:$0xff]  ;;  %v462_v24 = vld [vmem:[%s4730_s25 + $0x58] sm:$0xff] }
  0x21   : > { %412 = vst.msk [vmem:[#allocation2 + $0xa8] sm:$0xff] %vm389_vm0, %v4638_v5  ;;  %413 = vst.msk [vmem:[#allocation2 + $0xb0] sm:$0xff] %vm389_vm0, %v4638_v5  ;;  %4154 = vmatprep.mubr.msk.f32.mxu1 %vm389_vm0, %v3654_v15  ;;  %v3659_v25 = vld [vmem:[%s4730_s25 + $0xd8] sm:$0xff]  ;;  %v463_v26 = vld [vmem:[%s4730_s25 + $0x60] sm:$0xff] }
  0x22   : > { %415 = vst.msk [vmem:[#allocation2 + $0xc0] sm:$0xff] %vm389_vm0, %v4638_v5  ;;  %416 = vst.msk [vmem:[#allocation2 + $0xc8] sm:$0xff] %vm389_vm0, %v4638_v5  ;;  %v3660_v27 = vld [vmem:[%s4730_s25 + $0xe0] sm:$0xff]  ;;  %v464_v28 = vld [vmem:[%s4730_s25 + $0x68] sm:$0xff] }
  0x23   : > { %417 = vst.msk [vmem:[#allocation2 + $0xd0] sm:$0xf] %vm392_vm1, %v4638_v5  ;;  %420 = vst.msk [vmem:[#allocation2 + $0xe8] sm:$0xf] %vm392_vm1, %v4638_v5  ;;  %4129 = vmatmul.mubr.msk.f32.gmra.mrb[6].mxu0 %vm389_vm0, %v458_v16  ;;  %v3661_v29 = vld [vmem:[%s4730_s25 + $0xe8] sm:$0xff]  ;;  %v465_v30 = vld [vmem:[%s4730_s25 + $0x70] sm:$0xff] }
  0x24   : > { %418 = vst.msk [vmem:[#allocation2 + $0xd8] sm:$0xff] %vm389_vm0, %v4638_v5  ;;  %419 = vst.msk [vmem:[#allocation2 + $0xe0] sm:$0xff] %vm389_vm0, %v4638_v5  ;;  %4155 = vmatmul.mubr.msk.f32.gmra.mrb[6].mxu1 %vm389_vm0, %v3655_v17  ;;  %4131 = vmatprep.mubr.msk.f32.mxu0 %vm389_vm0, %v459_v18  ;;  %v3662_v31 = vld [vmem:[%s4730_s25 + $0xf0] sm:$0xff]  ;;  %v466_v32 = vld [vmem:[%s4730_s25 + $0x78] sm:$0xff] }
  0x25   : > { %421 = vst.msk [vmem:[#allocation2 + $0xf0] sm:$0xff] %vm389_vm0, %v4638_v5  ;;  %422 = vst.msk [vmem:[#allocation2 + $0xf8] sm:$0xff] %vm389_vm0, %v4638_v5  ;;  %4157 = vmatprep.mubr.msk.f32.mxu1 %vm389_vm0, %v3656_v19  ;;  %v3663_v33 = vld [vmem:[%s4730_s25 + $0xf8] sm:$0xff]  ;;  %v4891_v36 = vld [vmem:[%s5916_s3] ss:$0 sm:$0xff] }
  0x26   : > { %423 = vst.msk [vmem:[#allocation2 + $0x100] sm:$0xf] %vm392_vm1, %v4638_v5  ;;  %426 = vst.msk [vmem:[#allocation2 + $0x118] sm:$0xf] %vm392_vm1, %v4638_v5 }
  0x27   : > { %424 = vst.msk [vmem:[#allocation2 + $0x108] sm:$0xff] %vm389_vm0, %v4638_v5  ;;  %425 = vst.msk [vmem:[#allocation2 + $0x110] sm:$0xff] %vm389_vm0, %v4638_v5  ;;  %4132 = vmatmul.mubr.msk.f32.gmra.mrb[8].mxu0 %vm389_vm0, %v460_v20 }
  0x28   : > { %427 = vst.msk [vmem:[#allocation2 + $0x120] sm:$0xff] %vm389_vm0, %v4638_v5  ;;  %428 = vst.msk [vmem:[#allocation2 + $0x128] sm:$0xff] %vm389_vm0, %v4638_v5  ;;  %4158 = vmatmul.mubr.msk.f32.gmra.mrb[8].mxu1 %vm389_vm0, %v3657_v21  ;;  %4134 = vmatprep.mubr.msk.f32.mxu0 %vm389_vm0, %v461_v22 }
  0x29   : > { %429 = vst.msk [vmem:[#allocation2 + $0x130] sm:$0xf] %vm392_vm1, %v4638_v5  ;;  %432 = vst.msk [vmem:[#allocation2 + $0x148] sm:$0xf] %vm392_vm1, %v4638_v5  ;;  %4160 = vmatprep.mubr.msk.f32.mxu1 %vm389_vm0, %v3658_v23 }
  0x2a   : > { %430 = vst.msk [vmem:[#allocation2 + $0x138] sm:$0xff] %vm389_vm0, %v4638_v5  ;;  %431 = vst.msk [vmem:[#allocation2 + $0x140] sm:$0xff] %vm389_vm0, %v4638_v5 }
  0x2b   : > { %433 = vst.msk [vmem:[#allocation2 + $0x150] sm:$0xff] %vm389_vm0, %v4638_v5  ;;  %434 = vst.msk [vmem:[#allocation2 + $0x158] sm:$0xff] %vm389_vm0, %v4638_v5  ;;  %4135 = vmatmul.mubr.msk.f32.gmra.mrb[10].mxu0 %vm389_vm0, %v462_v24 }
  0x2c   : > { %435 = vst.msk [vmem:[#allocation2 + $0x160] sm:$0xf] %vm392_vm1, %v4638_v5  ;;  %438 = vst.msk [vmem:[#allocation2 + $0x178] sm:$0xf] %vm392_vm1, %v4638_v5  ;;  %4161 = vmatmul.mubr.msk.f32.gmra.mrb[10].mxu1 %vm389_vm0, %v3659_v25  ;;  %4137 = vmatprep.mubr.msk.f32.mxu0 %vm389_vm0, %v463_v26 }
  0x2d   : > { %436 = vst.msk [vmem:[#allocation2 + $0x168] sm:$0xff] %vm389_vm0, %v4638_v5  ;;  %437 = vst.msk [vmem:[#allocation2 + $0x170] sm:$0xff] %vm389_vm0, %v4638_v5  ;;  %4163 = vmatprep.mubr.msk.f32.mxu1 %vm389_vm0, %v3660_v27 }
  0x2e   : > { %439 = vst.msk [vmem:[#allocation2 + $0x180] sm:$0xff] %vm389_vm0, %v4638_v5  ;;  %440 = vst.msk [vmem:[#allocation2 + $0x188] sm:$0xff] %vm389_vm0, %v4638_v5 }
  0x2f   : > { %441 = vst.msk [vmem:[#allocation2 + $0x190] sm:$0xf] %vm392_vm1, %v4638_v5  ;;  %444 = vst.msk [vmem:[#allocation2 + $0x1a8] sm:$0xf] %vm392_vm1, %v4638_v5  ;;  %4138 = vmatmul.mubr.msk.f32.gmra.mrb[12].mxu0 %vm389_vm0, %v464_v28 }
  0x30   : > { %442 = vst.msk [vmem:[#allocation2 + $0x198] sm:$0xff] %vm389_vm0, %v4638_v5  ;;  %443 = vst.msk [vmem:[#allocation2 + $0x1a0] sm:$0xff] %vm389_vm0, %v4638_v5  ;;  %4164 = vmatmul.mubr.msk.f32.gmra.mrb[12].mxu1 %vm389_vm0, %v3661_v29  ;;  %4140 = vmatprep.mubr.msk.f32.mxu0 %vm389_vm0, %v465_v30 }
  0x31   : > { %4166 = vmatprep.mubr.msk.f32.mxu1 %vm389_vm0, %v3662_v31 }
  0x33   : > { %4141 = vmatmul.mubr.msk.f32.gmra.mrb[14].mxu0 %vm389_vm0, %v466_v32 }
  0x34   : > { %4167 = vmatmul.mubr.msk.f32.gmra.mrb[14].mxu1 %vm389_vm0, %v3663_v33 }
  0xea   : > { %v4121_v35 = vpop.f32.mrb[0].mxu0 }
  0xeb   : > { %v4147_v37 = vpop.f32.mrb[0].mxu1  ;;  %v669_v38 = vmul.f32 %v4121_v35, %v4886_v34  ;;  %v582_v40 = vpop.f32.mrb[1].mxu0 }
  0xec   : > { %v959_v39 = vmul.f32 %v4147_v37, %v4886_v34  ;;  %v872_v41 = vpop.f32.mrb[1].mxu1  ;;  %v668_v42 = vmul.f32 %v4886_v34, %v582_v40 }
  0xed   : > { %v958_v43 = vmul.f32 %v4886_v34, %v872_v41  ;;  %v692_v44 = vadd.f32 %v4891_v36, %v669_v38 }
  0xee   : > { %v982_v45 = vadd.f32 %v4891_v36, %v959_v39  ;;  %v691_v46 = vadd.f32 %v4891_v36, %v668_v42  ;;  %v4124_v48 = vpop.f32.mrb[2].mxu0 }
  0xef   : > { %v981_v47 = vadd.f32 %v4891_v36, %v958_v43  ;;  %v4150_v49 = vpop.f32.mrb[2].mxu1  ;;  %v708_v50 = vmax.f32 %v692_v44, 0.0  ;;  %v671_v52 = vmul.f32 %v4124_v48, %v4886_v34  ;;  %v592_v54 = vpop.f32.mrb[3].mxu0 }
  0xf0   : > { %v998_v51 = vmax.f32 %v982_v45, 0.0  ;;  %v961_v53 = vmul.f32 %v4150_v49, %v4886_v34  ;;  %v882_v55 = vpop.f32.mrb[3].mxu1  ;;  %v707_v56 = vmax.f32 %v691_v46, 0.0  ;;  %v670_v58 = vmul.f32 %v4886_v34, %v592_v54 }
  0xf1   : > { %v997_v57 = vmax.f32 %v981_v47, 0.0  ;;  %v960_v59 = vmul.f32 %v4886_v34, %v882_v55  ;;  %725 = vst.msk [vmem:[#allocation2 + $0x3a] sm:$0xff] %vm389_vm0, %v708_v50  ;;  %v694_v60 = vadd.f32 %v4891_v36, %v671_v52 }
  0xf2   : > { %1015 = vst.msk [vmem:[#allocation2 + $0xfa] sm:$0xff] %vm389_vm0, %v998_v51  ;;  %v984_v61 = vadd.f32 %v4891_v36, %v961_v53  ;;  %724 = vst.msk [vmem:[#allocation2 + $0x32] sm:$0xff] %vm389_vm0, %v707_v56  ;;  %v693_v62 = vadd.f32 %v4891_v36, %v670_v58  ;;  %v4127_v0 = vpop.f32.mrb[4].mxu0 }
  0xf3   : > { %1014 = vst.msk [vmem:[#allocation2 + $0xf2] sm:$0xff] %vm389_vm0, %v997_v57  ;;  %v983_v63 = vadd.f32 %v4891_v36, %v960_v59  ;;  %v4153_v1 = vpop.f32.mrb[4].mxu1  ;;  %v710_v2 = vmax.f32 %v694_v60, 0.0  ;;  %v673_v4 = vmul.f32 %v4127_v0, %v4886_v34  ;;  %v602_v6 = vpop.f32.mrb[5].mxu0 }
  0xf4   : > { %v1000_v3 = vmax.f32 %v984_v61, 0.0  ;;  %v963_v5 = vmul.f32 %v4153_v1, %v4886_v34  ;;  %v892_v7 = vpop.f32.mrb[5].mxu1  ;;  %v709_v8 = vmax.f32 %v693_v62, 0.0  ;;  %v672_v10 = vmul.f32 %v4886_v34, %v602_v6 }
  0xf5   : > { %v999_v9 = vmax.f32 %v983_v63, 0.0  ;;  %v962_v11 = vmul.f32 %v4886_v34, %v892_v7  ;;  %727 = vst.msk [vmem:[#allocation2 + $0x52] sm:$0xff] %vm389_vm0, %v710_v2  ;;  %v696_v12 = vadd.f32 %v4891_v36, %v673_v4 }
  0xf6   : > { %1017 = vst.msk [vmem:[#allocation2 + $0x112] sm:$0xff] %vm389_vm0, %v1000_v3  ;;  %v986_v13 = vadd.f32 %v4891_v36, %v963_v5  ;;  %726 = vst.msk [vmem:[#allocation2 + $0x4a] sm:$0xff] %vm389_vm0, %v709_v8  ;;  %v695_v14 = vadd.f32 %v4891_v36, %v672_v10  ;;  %v4130_v16 = vpop.f32.mrb[6].mxu0 }
  0xf7   : > { %1016 = vst.msk [vmem:[#allocation2 + $0x10a] sm:$0xff] %vm389_vm0, %v999_v9  ;;  %v985_v15 = vadd.f32 %v4891_v36, %v962_v11  ;;  %v4156_v17 = vpop.f32.mrb[6].mxu1  ;;  %v712_v18 = vmax.f32 %v696_v12, 0.0  ;;  %v675_v20 = vmul.f32 %v4130_v16, %v4886_v34  ;;  %v612_v22 = vpop.f32.mrb[7].mxu0 }
  0xf8   : > { %v1002_v19 = vmax.f32 %v986_v13, 0.0  ;;  %v965_v21 = vmul.f32 %v4156_v17, %v4886_v34  ;;  %v902_v23 = vpop.f32.mrb[7].mxu1  ;;  %v711_v24 = vmax.f32 %v695_v14, 0.0  ;;  %v674_v26 = vmul.f32 %v4886_v34, %v612_v22 }
  0xf9   : > { %v1001_v25 = vmax.f32 %v985_v15, 0.0  ;;  %v964_v27 = vmul.f32 %v4886_v34, %v902_v23  ;;  %729 = vst.msk [vmem:[#allocation2 + $0x6a] sm:$0xff] %vm389_vm0, %v712_v18  ;;  %v698_v28 = vadd.f32 %v4891_v36, %v675_v20 }
  0xfa   : > { %1019 = vst.msk [vmem:[#allocation2 + $0x12a] sm:$0xff] %vm389_vm0, %v1002_v19  ;;  %v988_v29 = vadd.f32 %v4891_v36, %v965_v21  ;;  %728 = vst.msk [vmem:[#allocation2 + $0x62] sm:$0xff] %vm389_vm0, %v711_v24  ;;  %v697_v30 = vadd.f32 %v4891_v36, %v674_v26  ;;  %v4133_v32 = vpop.f32.mrb[8].mxu0 }
  0xfb   : > { %1018 = vst.msk [vmem:[#allocation2 + $0x122] sm:$0xff] %vm389_vm0, %v1001_v25  ;;  %v987_v31 = vadd.f32 %v4891_v36, %v964_v27  ;;  %v4159_v33 = vpop.f32.mrb[8].mxu1  ;;  %v714_v35 = vmax.f32 %v698_v28, 0.0  ;;  %v677_v38 = vmul.f32 %v4133_v32, %v4886_v34  ;;  %v622_v40 = vpop.f32.mrb[9].mxu0 }
  0xfc   : > { %v1004_v37 = vmax.f32 %v988_v29, 0.0  ;;  %v967_v39 = vmul.f32 %v4159_v33, %v4886_v34  ;;  %v912_v41 = vpop.f32.mrb[9].mxu1  ;;  %v713_v42 = vmax.f32 %v697_v30, 0.0  ;;  %v676_v44 = vmul.f32 %v4886_v34, %v622_v40 }
  0xfd   : > { %v1003_v43 = vmax.f32 %v987_v31, 0.0  ;;  %v966_v45 = vmul.f32 %v4886_v34, %v912_v41  ;;  %731 = vst.msk [vmem:[#allocation2 + $0x82] sm:$0xff] %vm389_vm0, %v714_v35  ;;  %v700_v46 = vadd.f32 %v4891_v36, %v677_v38 }
  0xfe   : > { %1021 = vst.msk [vmem:[#allocation2 + $0x142] sm:$0xff] %vm389_vm0, %v1004_v37  ;;  %v990_v47 = vadd.f32 %v4891_v36, %v967_v39  ;;  %730 = vst.msk [vmem:[#allocation2 + $0x7a] sm:$0xff] %vm389_vm0, %v713_v42  ;;  %v699_v48 = vadd.f32 %v4891_v36, %v676_v44  ;;  %v4136_v50 = vpop.f32.mrb[10].mxu0 }
  0xff   : > { %1020 = vst.msk [vmem:[#allocation2 + $0x13a] sm:$0xff] %vm389_vm0, %v1003_v43  ;;  %v989_v49 = vadd.f32 %v4891_v36, %v966_v45  ;;  %v4162_v51 = vpop.f32.mrb[10].mxu1  ;;  %v716_v52 = vmax.f32 %v700_v46, 0.0  ;;  %v679_v54 = vmul.f32 %v4136_v50, %v4886_v34  ;;  %v632_v56 = vpop.f32.mrb[11].mxu0 }
 0x100   : > { %v1006_v53 = vmax.f32 %v990_v47, 0.0  ;;  %v969_v55 = vmul.f32 %v4162_v51, %v4886_v34  ;;  %v922_v57 = vpop.f32.mrb[11].mxu1  ;;  %v715_v58 = vmax.f32 %v699_v48, 0.0  ;;  %v678_v60 = vmul.f32 %v4886_v34, %v632_v56 }
 0x101   : > { %v1005_v59 = vmax.f32 %v989_v49, 0.0  ;;  %v968_v61 = vmul.f32 %v4886_v34, %v922_v57  ;;  %733 = vst.msk [vmem:[#allocation2 + $0x9a] sm:$0xff] %vm389_vm0, %v716_v52  ;;  %v702_v62 = vadd.f32 %v4891_v36, %v679_v54 }
 0x102   : > { %1023 = vst.msk [vmem:[#allocation2 + $0x15a] sm:$0xff] %vm389_vm0, %v1006_v53  ;;  %v992_v63 = vadd.f32 %v4891_v36, %v969_v55  ;;  %732 = vst.msk [vmem:[#allocation2 + $0x92] sm:$0xff] %vm389_vm0, %v715_v58  ;;  %v701_v0 = vadd.f32 %v4891_v36, %v678_v60  ;;  %v4139_v2 = vpop.f32.mrb[12].mxu0 }
 0x103   : > { %1022 = vst.msk [vmem:[#allocation2 + $0x152] sm:$0xff] %vm389_vm0, %v1005_v59  ;;  %v991_v1 = vadd.f32 %v4891_v36, %v968_v61  ;;  %v4165_v3 = vpop.f32.mrb[12].mxu1  ;;  %v718_v4 = vmax.f32 %v702_v62, 0.0  ;;  %v681_v6 = vmul.f32 %v4139_v2, %v4886_v34  ;;  %v642_v8 = vpop.f32.mrb[13].mxu0 }
 0x104   : > { %v1008_v5 = vmax.f32 %v992_v63, 0.0  ;;  %v971_v7 = vmul.f32 %v4165_v3, %v4886_v34  ;;  %v932_v9 = vpop.f32.mrb[13].mxu1  ;;  %v717_v10 = vmax.f32 %v701_v0, 0.0  ;;  %v680_v12 = vmul.f32 %v4886_v34, %v642_v8 }
 0x105   : > { %v1007_v11 = vmax.f32 %v991_v1, 0.0  ;;  %v970_v13 = vmul.f32 %v4886_v34, %v932_v9  ;;  %735 = vst.msk [vmem:[#allocation2 + $0xb2] sm:$0xff] %vm389_vm0, %v718_v4  ;;  %v704_v14 = vadd.f32 %v4891_v36, %v681_v6 }
 0x106   : > { %1025 = vst.msk [vmem:[#allocation2 + $0x172] sm:$0xff] %vm389_vm0, %v1008_v5  ;;  %v994_v15 = vadd.f32 %v4891_v36, %v971_v7  ;;  %734 = vst.msk [vmem:[#allocation2 + $0xaa] sm:$0xff] %vm389_vm0, %v717_v10  ;;  %v703_v16 = vadd.f32 %v4891_v36, %v680_v12  ;;  %v4142_v18 = vpop.f32.mrb[14].mxu0 }
 0x107   : > { %1024 = vst.msk [vmem:[#allocation2 + $0x16a] sm:$0xff] %vm389_vm0, %v1007_v11  ;;  %v993_v17 = vadd.f32 %v4891_v36, %v970_v13  ;;  %v4168_v19 = vpop.f32.mrb[14].mxu1  ;;  %v720_v20 = vmax.f32 %v704_v14, 0.0  ;;  %v683_v22 = vmul.f32 %v4142_v18, %v4886_v34  ;;  %v652_v24 = vpop.f32.mrb[15].mxu0 }
 0x108   : > { %v1010_v21 = vmax.f32 %v994_v15, 0.0  ;;  %v973_v23 = vmul.f32 %v4168_v19, %v4886_v34  ;;  %v942_v25 = vpop.f32.mrb[15].mxu1  ;;  %v719_v26 = vmax.f32 %v703_v16, 0.0  ;;  %v682_v28 = vmul.f32 %v4886_v34, %v652_v24 }
 0x109   : > { %v1009_v27 = vmax.f32 %v993_v17, 0.0  ;;  %v972_v29 = vmul.f32 %v4886_v34, %v942_v25  ;;  %737 = vst.msk [vmem:[#allocation2 + $0xca] sm:$0xff] %vm389_vm0, %v720_v20  ;;  %v706_v30 = vadd.f32 %v4891_v36, %v683_v22 }
 0x10a   : > { %1027 = vst.msk [vmem:[#allocation2 + $0x18a] sm:$0xff] %vm389_vm0, %v1010_v21  ;;  %v996_v31 = vadd.f32 %v4891_v36, %v973_v23  ;;  %736 = vst.msk [vmem:[#allocation2 + $0xc2] sm:$0xff] %vm389_vm0, %v719_v26  ;;  %v705_v32 = vadd.f32 %v4891_v36, %v682_v28 }
 0x10b   : > { %1026 = vst.msk [vmem:[#allocation2 + $0x182] sm:$0xff] %vm389_vm0, %v1009_v27  ;;  %v995_v33 = vadd.f32 %v4891_v36, %v972_v29  ;;  %v722_v35 = vmax.f32 %v706_v30, 0.0 }
 0x10c   : > { %v1012_v37 = vmax.f32 %v996_v31, 0.0  ;;  %v721_v38 = vmax.f32 %v705_v32, 0.0 }
 0x10d   : > { %v1011_v34 = vmax.f32 %v995_v33, 0.0  ;;  %739 = vst.msk [vmem:[#allocation2 + $0xe2] sm:$0xff] %vm389_vm0, %v722_v35 }
 0x10e   : > { %1029 = vst.msk [vmem:[#allocation2 + $0x1a2] sm:$0xff] %vm389_vm0, %v1012_v37  ;;  %738 = vst.msk [vmem:[#allocation2 + $0xda] sm:$0xff] %vm389_vm0, %v721_v38 }
 0x10f   : > { %1028 = vst.msk [vmem:[#allocation2 + $0x19a] sm:$0xff] %vm389_vm0, %v1011_v34 }
 0x110 PF: > { %v3777_v39 = vld [vmem:[%s5917_s4 + $0x20] sm:$0xff]  ;;  %v3684_v36 = vld [vmem:[%s5917_s4 + $0x8] sm:$0xff]  ;;  %s3683_s27 = smul.u32 192, %s4620_s13  ;;  %vm1082_vm2 = vcmask 1045504   ;;  %vm1125_vm3 = vcmask 64512   ;;  %v5045_v60 = vld [vmem:[%s5917_s4 + $0x30] sm:$0xff] }
 0x111   : > { %v3794_v40 = vld [vmem:[%s5917_s4 + $0x28] sm:$0xff]  ;;  %4273 = vmatprep.subr.mxu0 %v3777_v39  ;;  %4169 = vmatprep.subr.mxu1 %v3684_v36  ;;  %v1057_v41 = vld [vmem:[%s5917_s4] sm:$0xff]  ;;  %v5061_v3 = vld [vmem:[%s5917_s4 + $0x10] sm:$0xff]  ;;  %vm1480_vm4 = vcmask 1043456   ;;  %s3912_s22 = sshll.u32 %s4620_s13, 7 }
 0x112   : > { %4274 = vmatpush3.msra.mxu0 %v3777_v39  ;;  %4170 = vmatpush3.msra.mxu1 %v3684_v36  ;;  %s5002_s14 = scalar_lea.vmem [#allocation2], %s3683_s27  ;;  %s5811_s26 = scalar_lea.vmem %s4730_s25, %s3912_s22 }
 0x113   : > { %4299 = vmatprep.subr.mxu0 %v3794_v40  ;;  %4195 = vmatprep.subr.mxu1 %v1057_v41 }
 0x116   : > { %v5005_v42 = vld [vmem:[%s5002_s14] sm:$0xff]  ;;  %v5008_v43 = vld [vmem:[%s5002_s14 + $0x8] sm:$0xff]  ;;  %v5011_v44 = vld [vmem:[%s5002_s14 + $0x30] sm:$0xff] }
 0x117   : > { %5957 = vst [vmem:[#allocation4_spill] sm:$0xff] %v5005_v42  ;;  %v1083_v45 = vrot.slane %v5005_v42, 2  ;;  %v1084_v46 = vrot.slane %v5008_v43, 2  ;;  %v5016_v47 = vld [vmem:[%s5002_s14 + $0x38] sm:$0xff]  ;;  %v1962_v48 = vrot.slane %v5011_v44, 2  ;;  %v5033_v56 = vld [vmem:[%s5002_s14 + $0x20] sm:$0xff] }
 0x118   : > { %v5020_v49 = vld [vmem:[%s5002_s14 + $0x10] sm:$0xf]  ;;  %v1963_v50 = vrot.slane %v5016_v47, 2  ;;  %v5025_v52 = vld [vmem:[%s5002_s14 + $0x40] sm:$0xf]  ;;  %v5028_v53 = vld [vmem:[%s5002_s14 + $0x18] sm:$0xff] }
 0x119   : > { %5958 = vst [vmem:[#allocation5_spill] sm:$0xff] %v5020_v49  ;;  %v1086_v51 = vrot.slane %v5020_v49, 2  ;;  %v1085_v54 = vsel %vm1082_vm2, %v1083_v45, %v1084_v46  ;;  %v1965_v55 = vrot.slane %v5025_v52, 2  ;;  %v1088_v57 = vrot.slane %v5028_v53, 2  ;;  %v5037_v58 = vld [vmem:[%s5002_s14 + $0x48] sm:$0xff]  ;;  %v5040_v59 = vld [vmem:[%s5002_s14 + $0x50] sm:$0xff] }
 0x11a   : > { %4171 = vmatprep.mubr.msk.f32.mxu1 %vm1125_vm3, %v1085_v54  ;;  %v1964_v61 = vsel %vm1082_vm2, %v1962_v48, %v1963_v50  ;;  %v1089_v63 = vrot.slane %v5033_v56, 2  ;;  %v1967_v0 = vrot.slane %v5037_v58, 2  ;;  %v5053_v1 = vld [vmem:[%s5002_s14 + $0x28] sm:$0xf]  ;;  %v5056_v2 = vld [vmem:[%s5002_s14 + $0x58] sm:$0xf] }
 0x11b   : > { %v1087_v62 = vsel %vm1082_vm2, %v1084_v46, %v1086_v51  ;;  %5959 = vst [vmem:[#allocation6_spill] sm:$0xff] %v5053_v1  ;;  %4275 = vmatprep.mubr.msk.f32.mxu0 %vm1125_vm3, %v1964_v61  ;;  %v1966_v4 = vsel %vm1082_vm2, %v1963_v50, %v1965_v55  ;;  %v1968_v5 = vrot.slane %v5040_v59, 2  ;;  %v1091_v6 = vrot.slane %v5053_v1, 2  ;;  %v5070_v8 = vld [vmem:[%s5002_s14 + $0x60] sm:$0xff]  ;;  %v5073_v9 = vld [vmem:[%s5002_s14 + $0x68] sm:$0xff]  ;;  %v5076_v10 = vld [vmem:[%s5002_s14 + $0x78] sm:$0xff] }
 0x11c   : > { %4172 = vmatmul.mubr.msk.f32.vlgmr.msra.gmra.mrb[0].mxu1 %vm1125_vm3, %v1087_v62  ;;  %v1970_v7 = vrot.slane %v5056_v2, 2  ;;  %4276 = vmatmul.mubr.msk.f32.vlgmr.msra.gmra.mrb[0].mxu0 %vm1125_vm3, %v1966_v4  ;;  %v1090_v11 = vsel %vm1082_vm2, %v1088_v57, %v1089_v63  ;;  %v1972_v12 = vrot.slane %v5070_v8, 2  ;;  %v5082_v13 = vrot.slane %v5073_v9, 2  ;;  %v5085_v14 = vld [vmem:[%s5002_s14 + $0x40] sm:$0xf]  ;;  %v5117_v27 = vld [vmem:[%s5002_s14 + $0x90] sm:$0xff] }
 0x11d   : > { %5960 = vst [vmem:[#allocation7_spill] sm:$0xff] %v5085_v14  ;;  %v5088_v15 = vld [vmem:[%s5002_s14 + $0x70] sm:$0xf]  ;;  %4196 = vmatpush3.msra.mxu1 %v1057_v41  ;;  %4300 = vmatpush3.msra.mxu0 %v3794_v40  ;;  %v1969_v16 = vsel %vm1082_vm2, %v1967_v0, %v1968_v5  ;;  %v1092_v17 = vsel %vm1082_vm2, %v1089_v63, %v1091_v6  ;;  %v1096_v19 = vrot.slane %v5085_v14, 2  ;;  %v5096_v20 = vld [vmem:[%s5002_s14 + $0x80] sm:$0xff]  ;;  %v1977_v24 = vrot.slane %v5076_v10, 2 }
 0x11e   : > { %4174 = vmatprep.mubr.msk.f32.mxu1 %vm1125_vm3, %v1090_v11  ;;  %v1971_v18 = vsel %vm1082_vm2, %v1968_v5, %v1970_v7  ;;  %5961 = vst [vmem:[#allocation8_spill] sm:$0xff] %v5096_v20  ;;  %v5099_v21 = vld [vmem:[%s5002_s14 + $0x58] sm:$0xf]  ;;  %4278 = vmatprep.mubr.msk.f32.mxu0 %vm1125_vm3, %v1969_v16  ;;  %v5104_v22 = vsel %vm1082_vm2, %v1972_v12, %v5082_v13  ;;  %v1975_v23 = vrot.slane %v5088_v15, 2  ;;  %v5109_v25 = vrot.slane %v5096_v20, 2  ;;  %v5148_v39 = vld [vmem:[%s5002_s14 + $0xa8] sm:$0xff] }
 0x11f   : > { %5962 = vst [vmem:[#allocation9_spill] sm:$0xff] %v5099_v21  ;;  %5963 = vst [vmem:[#allocation10_spill] sm:$0xff] %v5104_v22  ;;  %v5112_v26 = vld [vmem:[%s5002_s14 + $0x88] sm:$0xf]  ;;  %4325 = vmatprep.subr.mxu0 %v5045_v60  ;;  %v5120_v28 = vld [vmem:[%s5002_s14 + $0x98] sm:$0xff]  ;;  %4221 = vmatprep.subr.mxu1 %v5061_v3  ;;  %v1097_v29 = vsel %vm1082_vm2, %v1963_v50, %v1096_v19  ;;  %v1101_v30 = vrot.slane %v5099_v21, 2 }
 0x120   : > { %4175 = vmatmul.mubr.msk.f32.gmra.mrb[2].mxu1 %vm1125_vm3, %v1092_v17  ;;  %5964 = vst [vmem:[#allocation11_spill] sm:$0xff] %v5120_v28  ;;  %4279 = vmatmul.mubr.msk.f32.gmra.mrb[2].mxu0 %vm1125_vm3, %v1971_v18  ;;  %v1976_v31 = vsel %vm1082_vm2, %v5082_v13, %v1975_v23  ;;  %v1980_v32 = vrot.slane %v5112_v26, 2  ;;  %v5133_v33 = vld [vmem:[%s5002_s14 + $0x70] sm:$0xf]  ;;  %v5137_v35 = vsel %vm1082_vm2, %v1977_v24, %v5109_v25  ;;  %v1982_v37 = vrot.slane %v5117_v27, 2  ;;  %v5178_v57 = vld [vmem:[%s5002_s14 + $0xc0] sm:$0xff] }
 0x121   : > { %4177 = vmatprep.mubr.msk.f32.mxu1 %vm1125_vm3, %v1964_v61  ;;  %4281 = vmatprep.mubr.msk.f32.mxu0 %vm1125_vm3, %v5104_v22  ;;  %5965 = vst [vmem:[#allocation12_spill] sm:$0xff] %v5133_v33  ;;  %5966 = vst [vmem:[#allocation13_spill] sm:$0xff] %v5137_v35  ;;  %v5141_v38 = vrot.slane %v5120_v28, 2  ;;  %v5144_v34 = vld [vmem:[%s5002_s14 + $0xa0] sm:$0xf]  ;;  %v5151_v36 = vld [vmem:[%s5002_s14 + $0xb0] sm:$0xff]  ;;  %v1102_v40 = vsel %vm1082_vm2, %v1968_v5, %v1101_v30 }
 0x122   : > { %5967 = vst [vmem:[#allocation14_spill] sm:$0xff] %v5151_v36  ;;  %v1106_v41 = vrot.slane %v5133_v33, 2  ;;  %v1981_v45 = vsel %vm1082_vm2, %v5109_v25, %v1980_v32  ;;  %v1985_v46 = vrot.slane %v5144_v34, 2  ;;  %v5163_v48 = vld [vmem:[%s5002_s14 + $0x88] sm:$0xf]  ;;  %v1987_v51 = vrot.slane %v5148_v39, 2 }
 0x123   : > { %5968 = vst [vmem:[#allocation15_spill] sm:$0xff] %v5163_v48  ;;  %v5167_v50 = vsel %vm1082_vm2, %v1982_v37, %v5141_v38  ;;  %v5171_v54 = vrot.slane %v5151_v36, 2  ;;  %v5174_v55 = vld [vmem:[%s5002_s14 + $0xb8] sm:$0xf]  ;;  %v5181_v61 = vld [vmem:[%s5002_s14 + $0xc8] sm:$0xff]  ;;  %v1111_v63 = vrot.slane %v5163_v48, 2 }
 0x124   : > { %4178 = vmatmul.mubr.msk.f32.gmra.mrb[4].mxu1 %vm1125_vm3, %v1097_v29  ;;  %4282 = vmatmul.mubr.msk.f32.gmra.mrb[4].mxu0 %vm1125_vm3, %v1976_v31  ;;  %5969 = vst [vmem:[#allocation16_spill] sm:$0xff] %v5167_v50  ;;  %5970 = vst [vmem:[#allocation17_spill] sm:$0xff] %v5181_v61  ;;  %v1107_v62 = vsel %vm1082_vm2, %v5082_v13, %v1106_v41  ;;  %v1986_v0 = vsel %vm1082_vm2, %v5141_v38, %v1985_v46  ;;  %v1990_v4 = vrot.slane %v5174_v55, 2  ;;  %v5195_v5 = vld [vmem:[%s5002_s14 + $0xa0] sm:$0xf] }
 0x125   : > { %4180 = vmatprep.mubr.msk.f32.mxu1 %vm1125_vm3, %v1969_v16  ;;  %4284 = vmatprep.mubr.msk.f32.mxu0 %vm1125_vm3, %v5137_v35  ;;  %5971 = vst [vmem:[#allocation18_spill] sm:$0xff] %v5195_v5  ;;  %v5199_v6 = vsel %vm1082_vm2, %v1987_v51, %v5171_v54  ;;  %v1992_v7 = vrot.slane %v5178_v57, 2  ;;  %v5203_v11 = vrot.slane %v5181_v61, 2  ;;  %v5206_v12 = vld [vmem:[%s5002_s14 + $0xd0] sm:$0xf]  ;;  %v5210_v16 = vld [vmem:[%s5002_s14 + $0xd8] sm:$0xff]  ;;  %v1112_v18 = vsel %vm1082_vm2, %v5109_v25, %v1111_v63 }
 0x126   : > { %5972 = vst [vmem:[#allocation19_spill] sm:$0xff] %v5199_v6  ;;  %v5213_v17 = vld [vmem:[%s5002_s14 + $0xe0] sm:$0xff]  ;;  %v1116_v19 = vrot.slane %v5195_v5, 2  ;;  %v5222_v23 = vld [vmem:[%s5002_s14 + $0xb8] sm:$0xf]  ;;  %v1991_v29 = vsel %vm1082_vm2, %v5171_v54, %v1990_v4  ;;  %v1995_v30 = vrot.slane %v5206_v12, 2 }
 0x127   : > { %5973 = vst [vmem:[#allocation20_spill] sm:$0xff] %v5213_v17  ;;  %5974 = vst [vmem:[#allocation21_spill] sm:$0xff] %v5222_v23  ;;  %v5225_v24 = vld [vmem:[%s5002_s14 + $0xe8] sm:$0xf]  ;;  %v2200_v31 = vrot.slane %v5025_v52, 4  ;;  %v5235_v32 = vsel %vm1082_vm2, %v1992_v7, %v5203_v11  ;;  %v1997_v37 = vrot.slane %v5210_v16, 2 }
 0x128   : > { %4181 = vmatmul.mubr.msk.f32.gmra.mrb[6].mxu1 %vm1125_vm3, %v1102_v40  ;;  %4285 = vmatmul.mubr.msk.f32.gmra.mrb[6].mxu0 %vm1125_vm3, %v1981_v45  ;;  %5975 = vst [vmem:[#allocation22_spill] sm:$0xff] %v5225_v24  ;;  %5976 = vst [vmem:[#allocation23_spill] sm:$0xff] %v5235_v32  ;;  %v5239_v40 = vrot.slane %v5213_v17, 2  ;;  %v1121_v41 = vrot.slane %v5222_v23, 2  ;;  %v2000_v45 = vrot.slane %v5225_v24, 2  ;;  %v2197_v46 = vrot.slane %v5011_v44, 4 }
 0x129   : > { %4183 = vmatprep.mubr.msk.f32.mxu1 %vm1125_vm3, %v5104_v22  ;;  %4287 = vmatprep.mubr.msk.f32.mxu0 %vm1125_vm3, %v5167_v50  ;;  %v5246_v51 = vrot.slane %v5016_v47, 4  ;;  %v1117_v52 = vsel %vm1082_vm2, %v5141_v38, %v1116_v19  ;;  %v5255_v63 = vrot.slane %v5040_v59, 4  ;;  %v1996_v4 = vsel %vm1082_vm2, %v5203_v11, %v1995_v30  ;;  %v5309_v22 = vld [vmem:[%s5002_s14 + $0xa0] sm:$0xf]  ;;  %v3824_v23 = vld [vmem:[%s5002_s14 + $0xb8] sm:$0xf] }
 0x12a   : > { %v2207_v7 = vrot.slane %v5070_v8, 4  ;;  %v5268_v19 = vsel %vm1082_vm2, %v1997_v37, %v5239_v40  ;;  %v5286_v37 = vld [vmem:[%s5002_s14 + $0x70] sm:$0xf]  ;;  %v5329_v5 = vrot.slane %v5151_v36, 4  ;;  %v5339_v33 = vrot.slane %v5213_v17, 4 }
 0x12b   : > { %5977 = vst [vmem:[#allocation24_spill] sm:$0xff] %v5246_v51  ;;  %5978 = vst [vmem:[#allocation25_spill] sm:$0xff] %v5255_v63  ;;  %v5277_v30 = vsel %vm1480_vm4, %v2197_v46, %v5246_v51  ;;  %v3827_v48 = vld [vmem:[%s5002_s14 + $0xd0] sm:$0xf]  ;;  %v2681_v17 = vrot.slane %v5286_v37, 2  ;;  %v2691_v36 = vrot.slane %v5309_v22, 2 }
 0x12c   : > { %4184 = vmatmul.mubr.msk.f32.gmra.mrb[8].mxu1 %vm1125_vm3, %v1107_v62  ;;  %4288 = vmatmul.mubr.msk.f32.gmra.mrb[8].mxu0 %vm1125_vm3, %v1986_v0  ;;  %v2202_v62 = vrot.slane %v5037_v58, 4  ;;  %v2205_v0 = vrot.slane %v5056_v2, 4  ;;  %5979 = vst [vmem:[#allocation26_spill] sm:$0xff] %v5268_v19  ;;  %v1122_v2 = vsel %vm1082_vm2, %v5171_v54, %v1121_v41  ;;  %v2201_v41 = vsel %vm1480_vm4, %v5246_v51, %v2200_v31 }
 0x12d   : > { %4186 = vmatprep.mubr.msk.f32.mxu1 %vm1125_vm3, %v5137_v35  ;;  %4290 = vmatprep.mubr.msk.f32.mxu0 %vm1125_vm3, %v5199_v6  ;;  %v5303_v35 = vld [vmem:[%s5002_s14 + $0x108] sm:$0xff]  ;;  %v2701_v49 = vrot.slane %v3827_v48, 2 }
 0x12e   : > { %v5299_v46 = vsel %vm1480_vm4, %v5255_v63, %v2205_v0  ;;  %5982 = vst [vmem:[#allocation29_spill] sm:$0xff] %v5303_v35  ;;  %v5319_v0 = vrot.slane %v5096_v20, 4  ;;  %v2713_v51 = vrot.slane %v5303_v35, 2  ;;  %v2948_v14 = vrot.slane %v5303_v35, 4 }
 0x12f   : > { %v5360_v35 = vsel %vm1082_vm2, %v5082_v13, %v2681_v17  ;;  %v5378_v13 = vsel %vm1082_vm2, %v5141_v38, %v2691_v36 }
 0x130   : > { %4187 = vmatmul.mubr.msk.f32.gmra.mrb[10].mxu1 %vm1125_vm3, %v1112_v18  ;;  %4291 = vmatmul.mubr.msk.f32.gmra.mrb[10].mxu0 %vm1125_vm3, %v1991_v29  ;;  %v5264_v18 = vrot.slane %v5073_v9, 4  ;;  %v2001_v29 = vsel %vm1082_vm2, %v5239_v40, %v2000_v45  ;;  %v5295_v45 = vsel %vm1480_vm4, %v2202_v62, %v5255_v63 }
 0x131   : > { %4189 = vmatprep.mubr.msk.f32.mxu1 %vm1125_vm3, %v5167_v50  ;;  %4293 = vmatprep.mubr.msk.f32.mxu0 %vm1125_vm3, %v5235_v32  ;;  %v5280_v32 = vld [vmem:[%s5002_s14 + $0xf0] sm:$0xff]  ;;  %v5283_v50 = vld [vmem:[%s5002_s14 + $0xf8] sm:$0xff] }
 0x132   : > { %5980 = vst [vmem:[#allocation27_spill] sm:$0xff] %v5280_v32  ;;  %5981 = vst [vmem:[#allocation28_spill] sm:$0xff] %v5283_v50  ;;  %v5315_v31 = vsel %vm1480_vm4, %v2207_v7, %v5264_v18  ;;  %v2708_v7 = vrot.slane %v5280_v32, 2  ;;  %v2709_v62 = vrot.slane %v5283_v50, 2  ;;  %v2943_v63 = vrot.slane %v5280_v32, 4 }
 0x133   : > { %v2944_v21 = vrot.slane %v5283_v50, 4  ;;  %v3833_v32 = vld [vmem:[%s5002_s14 + $0x100] sm:$0xf] }
 0x134   : > { %4190 = vmatmul.mubr.msk.f32.gmra.mrb[12].mxu1 %vm1125_vm3, %v1117_v52  ;;  %4294 = vmatmul.mubr.msk.f32.gmra.mrb[12].mxu0 %vm1125_vm3, %v1996_v4  ;;  %v5306_v4 = vld [vmem:[%s5002_s14 + $0x88] sm:$0xf]  ;;  %v5322_v52 = vrot.slane %v5120_v28, 4  ;;  %v3836_v28 = vld [vmem:[%s5002_s14 + $0x118] sm:$0xf]  ;;  %v5367_v20 = vsel %vm1082_vm2, %v2708_v7, %v2709_v62  ;;  %v2711_v17 = vrot.slane %v3833_v32, 2 }
 0x135   : > { %4192 = vmatprep.mubr.msk.f32.mxu1 %vm1125_vm3, %v5199_v6  ;;  %4296 = vmatprep.mubr.msk.f32.mxu0 %vm1125_vm3, %v5268_v19  ;;  %v5325_v6 = vld [vmem:[%s5002_s14 + $0x110] sm:$0xff]  ;;  %v5332_v19 = vrot.slane %v5181_v61, 4  ;;  %v3830_v61 = vld [vmem:[%s5002_s14 + $0xe8] sm:$0xf]  ;;  %v2686_v1 = vrot.slane %v5306_v4, 2  ;;  %v5394_v7 = vld [vmem:[%s5917_s4 + $0x18] sm:$0xff] }
 0x136   : > { %5983 = vst [vmem:[#allocation30_spill] sm:$0xff] %v5325_v6  ;;  %v2949_v50 = vrot.slane %v5325_v6, 4  ;;  %v2706_v24 = vrot.slane %v3830_v61, 2 }
 0x138   : > { %4193 = vmatmul.mubr.msk.f32.gmra.mrb[14].mxu1 %vm1125_vm3, %v1122_v2  ;;  %4297 = vmatmul.mubr.msk.f32.gmra.mrb[14].mxu0 %vm1125_vm3, %v2001_v29  ;;  %v2714_v2 = vrot.slane %v5325_v6, 2  ;;  %v2696_v29 = vrot.slane %v3824_v23, 2  ;;  %v5374_v6 = vld [vmem:[%s5917_s4 + $0x38] sm:$0xff]  ;;  %v5398_v38 = vsel %vm1082_vm2, %v5239_v40, %v2706_v24  ;;  %v2931_v24 = vrot.slane %v3824_v23, 4 }
 0x139   : > { %4197 = vmatprep.mubr.msk.f32.mxu1 %vm1125_vm3, %v5005_v42  ;;  %4301 = vmatprep.mubr.msk.f32.mxu0 %vm1125_vm3, %v5277_v30  ;;  %v5364_v42 = vsel %vm1082_vm2, %v5109_v25, %v2686_v1  ;;  %v5386_v25 = vsel %vm1082_vm2, %v5203_v11, %v2701_v49  ;;  %v2716_v49 = vrot.slane %v3836_v28, 2  ;;  %v5408_v11 = vsel %vm1082_vm2, %v2709_v62, %v2711_v17 }
 0x13a   : > { %v5382_v1 = vsel %vm1082_vm2, %v5171_v54, %v2696_v29  ;;  %v5401_v36 = vsel %vm1082_vm2, %v2713_v51, %v2714_v2  ;;  %v2916_v54 = vrot.slane %v5286_v37, 4  ;;  %v2926_v29 = vrot.slane %v5309_v22, 4 }
 0x13b   : > { %v5415_v40 = vsel %vm1082_vm2, %v2714_v2, %v2716_v49  ;;  %v2936_v51 = vrot.slane %v3827_v48, 4  ;;  %v2941_v37 = vrot.slane %v3830_v61, 4  ;;  %v5434_v23 = vsel %vm1480_vm4, %v5329_v5, %v2931_v24 }
 0x13c   : > { %4198 = vmatmul.mubr.msk.f32.vlgmr.msra.gmra.mrb[0].mxu1 %vm1125_vm3, %v5008_v43  ;;  %4302 = vmatmul.mubr.msk.f32.vlgmr.msra.gmra.mrb[0].mxu0 %vm1125_vm3, %v2201_v41  ;;  %v2921_v41 = vrot.slane %v5306_v4, 4  ;;  %v2946_v4 = vrot.slane %v3833_v32, 4  ;;  %v5449_v62 = vsel %vm1480_vm4, %v2943_v63, %v2944_v21  ;;  %v2951_v2 = vrot.slane %v3836_v28, 4 }
 0x13d   : > { %4200 = vmatprep.mubr.msk.f32.mxu1 %vm1125_vm3, %v5028_v53  ;;  %4326 = vmatpush3.msra.mxu0 %v5045_v60  ;;  %v5419_v60 = vsel %vm1480_vm4, %v5264_v18, %v2916_v54  ;;  %v5442_v48 = vsel %vm1480_vm4, %v5332_v19, %v2936_v51  ;;  %v5446_v61 = vsel %vm1480_vm4, %v5339_v33, %v2941_v37  ;;  %v5984_v32 = vrot.slane %v5088_v15, 4 }
 0x13e   : > { %4304 = vmatprep.mubr.msk.f32.mxu0 %vm1125_vm3, %v5295_v45  ;;  %4222 = vmatpush3.msra.mxu1 %v5061_v3  ;;  %v5426_v22 = vsel %vm1480_vm4, %v5319_v0, %v2921_v41  ;;  %v5430_v3 = vsel %vm1480_vm4, %v5322_v52, %v2926_v29  ;;  %v2215_v17 = vrot.slane %v5112_v26, 4  ;;  %v5459_v49 = vsel %vm1480_vm4, %v2944_v21, %v2946_v4 }
 0x13f   : > { %4351 = vmatprep.subr.mxu0 %v5374_v6  ;;  %4247 = vmatprep.subr.mxu1 %v5394_v7  ;;  %v5462_v54 = vsel %vm1480_vm4, %v2948_v14, %v2949_v50  ;;  %v5985_v63 = vrot.slane %v5076_v10, 4  ;;  %v2217_v41 = vrot.slane %v5117_v27, 4  ;;  %v5472_v15 = vsel %vm1480_vm4, %v2949_v50, %v2951_v2 }
 0x140   : > { %4201 = vmatmul.mubr.msk.f32.gmra.mrb[2].mxu1 %vm1125_vm3, %v5033_v56  ;;  %4305 = vmatmul.mubr.msk.f32.gmra.mrb[2].mxu0 %vm1125_vm3, %v5299_v46  ;;  %v2211_v46 = vsel %vm1480_vm4, %v5264_v18, %v5984_v32  ;;  %v2216_v14 = vsel %vm1480_vm4, %v5319_v0, %v2215_v17  ;;  %v2220_v21 = vrot.slane %v5144_v34, 4  ;;  %v2222_v50 = vrot.slane %v5148_v39, 4  ;;  %v5986_v32 = vld [vmem:[#allocation8_spill] sm:$0xff] }
 0x141   : > { %4203 = vmatprep.mubr.msk.f32.mxu1 %vm1125_vm3, %v5011_v44  ;;  %4307 = vmatprep.mubr.msk.f32.mxu0 %vm1125_vm3, %v5315_v31  ;;  %v5468_v28 = vsel %vm1480_vm4, %v5985_v63, %v5319_v0  ;;  %v5486_v26 = vsel %vm1480_vm4, %v2217_v41, %v5322_v52  ;;  %v2225_v29 = vrot.slane %v5174_v55, 4  ;;  %v2227_v51 = vrot.slane %v5178_v57, 4  ;;  %v5988_v63 = vld [vmem:[#allocation4_spill] sm:$0xff] }
 0x142   : > { %v2221_v34 = vsel %vm1480_vm4, %v5322_v52, %v2220_v21  ;;  %v5501_v24 = vsel %vm1480_vm4, %v2222_v50, %v5329_v5  ;;  %v2230_v37 = vrot.slane %v5206_v12, 4  ;;  %v2232_v2 = vrot.slane %v5210_v16, 4  ;;  %v5989_v50 = vld [vmem:[#allocation11_spill] sm:$0xff] }
 0x143   : > { %v2226_v55 = vsel %vm1480_vm4, %v5329_v5, %v2225_v29  ;;  %v5516_v4 = vsel %vm1480_vm4, %v2227_v51, %v5332_v19  ;;  %v1481_v41 = vrot.slane %v5988_v63, 4  ;;  %v1486_v51 = vrot.slane %v5028_v53, 4  ;;  %v3871_v53 = vld [vmem:[%s5917_s4 + $0x40] sm:$0xff] }
 0x144   : > { %4204 = vmatmul.mubr.msk.f32.gmra.mrb[4].mxu1 %vm1125_vm3, %v5016_v47  ;;  %4308 = vmatmul.mubr.msk.f32.gmra.mrb[4].mxu0 %vm1125_vm3, %v2211_v46  ;;  %v2231_v12 = vsel %vm1480_vm4, %v5332_v19, %v2230_v37  ;;  %v5987_v46 = vld [vmem:[#allocation22_spill] sm:$0xff]  ;;  %v5533_v21 = vsel %vm1480_vm4, %v2232_v2, %v5339_v33 }
 0x145   : > { %4206 = vmatprep.mubr.msk.f32.mxu1 %vm1125_vm3, %v5037_v58  ;;  %4310 = vmatprep.mubr.msk.f32.mxu0 %vm1125_vm3, %v5468_v28  ;;  %v2235_v17 = vrot.slane %v5987_v46, 4  ;;  %v5991_v37 = vld [vmem:[#allocation14_spill] sm:$0xff] }
 0x148   : > { %4207 = vmatmul.mubr.msk.f32.gmra.mrb[6].mxu1 %vm1125_vm3, %v5040_v59  ;;  %4311 = vmatmul.mubr.msk.f32.gmra.mrb[6].mxu0 %vm1125_vm3, %v2216_v14  ;;  %v1482_v14 = vrot.slane %v5008_v43, 4  ;;  %v2236_v43 = vsel %vm1480_vm4, %v5339_v33, %v2235_v17  ;;  %v5993_v17 = vld [vmem:[#allocation7_spill] sm:$0xff] }
 0x149   : > { %4209 = vmatprep.mubr.msk.f32.mxu1 %vm1125_vm3, %v5070_v8  ;;  %4313 = vmatprep.mubr.msk.f32.mxu0 %vm1125_vm3, %v5486_v26  ;;  %v1494_v63 = vrot.slane %v5993_v17, 4 }
 0x14a   : > { %v1483_v19 = vsel %vm1480_vm4, %v1481_v41, %v1482_v14  ;;  %v5994_v41 = vld [vmem:[#allocation24_spill] sm:$0xff] }
 0x14c   : > { %4210 = vmatmul.mubr.msk.f32.gmra.mrb[8].mxu1 %vm1125_vm3, %v5073_v9  ;;  %4314 = vmatmul.mubr.msk.f32.gmra.mrb[8].mxu0 %vm1125_vm3, %v2221_v34  ;;  %v5990_v34 = vld [vmem:[#allocation5_spill] sm:$0xff] }
 0x14d   : > { %4212 = vmatprep.mubr.msk.f32.mxu1 %vm1125_vm3, %v5076_v10  ;;  %4316 = vmatprep.mubr.msk.f32.mxu0 %vm1125_vm3, %v5501_v24  ;;  %v1484_v29 = vrot.slane %v5990_v34, 4  ;;  %v5995_v34 = vld [vmem:[#allocation9_spill] sm:$0xff] }
 0x14f   : > { %v1485_v2 = vsel %vm1480_vm4, %v1482_v14, %v1484_v29  ;;  %v1495_v14 = vsel %vm1480_vm4, %v5994_v41, %v1494_v63  ;;  %v1499_v29 = vrot.slane %v5995_v34, 4  ;;  %v6003_v63 = vld [vmem:[#allocation27_spill] sm:$0xff]  ;;  %v6007_v34 = vld [vmem:[#allocation10_spill] sm:$0xff] }
 0x150   : > { %4213 = vmatmul.mubr.msk.f32.gmra.mrb[10].mxu1 %vm1125_vm3, %v5986_v32  ;;  %4317 = vmatmul.mubr.msk.f32.gmra.mrb[10].mxu0 %vm1125_vm3, %v2226_v55  ;;  %v1487_v55 = vrot.slane %v5033_v56, 4 }
 0x151   : > { %4215 = vmatprep.mubr.msk.f32.mxu1 %vm1125_vm3, %v5117_v27  ;;  %4319 = vmatprep.mubr.msk.f32.mxu0 %vm1125_vm3, %v5516_v4 }
 0x152   : > { %v1488_v33 = vsel %vm1480_vm4, %v1486_v51, %v1487_v55 }
 0x154   : > { %4216 = vmatmul.mubr.msk.f32.gmra.mrb[12].mxu1 %vm1125_vm3, %v5989_v50  ;;  %4320 = vmatmul.mubr.msk.f32.gmra.mrb[12].mxu0 %vm1125_vm3, %v2231_v12  ;;  %v5992_v12 = vld [vmem:[#allocation6_spill] sm:$0xff] }
 0x155   : > { %4218 = vmatprep.mubr.msk.f32.mxu1 %vm1125_vm3, %v5148_v39  ;;  %4322 = vmatprep.mubr.msk.f32.mxu0 %vm1125_vm3, %v5533_v21  ;;  %v1489_v46 = vrot.slane %v5992_v12, 4  ;;  %v6000_v12 = vld [vmem:[#allocation18_spill] sm:$0xff] }
 0x157   : > { %v1490_v56 = vsel %vm1480_vm4, %v1487_v55, %v1489_v46  ;;  %v5999_v55 = vld [vmem:[#allocation17_spill] sm:$0xff]  ;;  %v1514_v46 = vrot.slane %v6000_v12, 4 }
 0x158   : > { %4219 = vmatmul.mubr.msk.f32.gmra.mrb[14].mxu1 %vm1125_vm3, %v5991_v37  ;;  %4323 = vmatmul.mubr.msk.f32.gmra.mrb[14].mxu0 %vm1125_vm3, %v2236_v43 }
 0x159   : > { %4223 = vmatprep.mubr.msk.f32.mxu1 %vm1125_vm3, %v1483_v19  ;;  %4327 = vmatprep.mubr.msk.f32.mxu0 %vm1125_vm3, %v5070_v8 }
 0x15c   : > { %4224 = vmatmul.mubr.msk.f32.vlgmr.msra.gmra.mrb[0].mxu1 %vm1125_vm3, %v1485_v2  ;;  %4328 = vmatmul.mubr.msk.f32.vlgmr.msra.gmra.mrb[0].mxu0 %vm1125_vm3, %v5073_v9 }
 0x15d   : > { %4226 = vmatprep.mubr.msk.f32.mxu1 %vm1125_vm3, %v1488_v33  ;;  %4352 = vmatpush3.msra.mxu0 %v5374_v6  ;;  %v5996_v6 = vld [vmem:[#allocation25_spill] sm:$0xff]  ;;  %v1515_v33 = vsel %vm1480_vm4, %v5322_v52, %v1514_v46  ;;  %v6006_v52 = vld [vmem:[#allocation30_spill] sm:$0xff] }
 0x15e   : > { %4330 = vmatprep.mubr.msk.f32.mxu0 %vm1125_vm3, %v5076_v10  ;;  %4248 = vmatpush3.msra.mxu1 %v5394_v7  ;;  %v1500_v7 = vsel %vm1480_vm4, %v5996_v6, %v1499_v29 }
 0x15f   : > { %4377 = vmatprep.subr.mxu0 %v3871_v53 }
 0x160   : > { %4227 = vmatmul.mubr.msk.f32.gmra.mrb[2].mxu1 %vm1125_vm3, %v1490_v56  ;;  %4331 = vmatmul.mubr.msk.f32.gmra.mrb[2].mxu0 %vm1125_vm3, %v5986_v32  ;;  %v6002_v56 = vld [vmem:[#allocation21_spill] sm:$0xff] }
 0x161   : > { %4229 = vmatprep.mubr.msk.f32.mxu1 %vm1125_vm3, %v5277_v30  ;;  %4333 = vmatprep.mubr.msk.f32.mxu0 %vm1125_vm3, %v5117_v27  ;;  %v5997_v30 = vld [vmem:[#allocation12_spill] sm:$0xff]  ;;  %v1519_v17 = vrot.slane %v6002_v56, 4 }
 0x162   : > { %v1504_v43 = vrot.slane %v5997_v30, 4 }
 0x163   : > { %v1520_v41 = vsel %vm1480_vm4, %v5329_v5, %v1519_v17  ;;  %v6008_v5 = vld [vmem:[#allocation13_spill] sm:$0xff] }
 0x164   : > { %4230 = vmatmul.mubr.msk.f32.gmra.mrb[4].mxu1 %vm1125_vm3, %v1495_v14  ;;  %4334 = vmatmul.mubr.msk.f32.gmra.mrb[4].mxu0 %vm1125_vm3, %v5989_v50  ;;  %v1505_v19 = vsel %vm1480_vm4, %v5264_v18, %v1504_v43  ;;  %v6001_v18 = vld [vmem:[#allocation20_spill] sm:$0xff]  ;;  %v6005_v14 = vld [vmem:[#allocation29_spill] sm:$0xff] }
 0x165   : > { %4232 = vmatprep.mubr.msk.f32.mxu1 %vm1125_vm3, %v5295_v45  ;;  %4336 = vmatprep.mubr.msk.f32.mxu0 %vm1125_vm3, %v5148_v39  ;;  %v5998_v45 = vld [vmem:[#allocation15_spill] sm:$0xff] }
 0x166   : > { %v1509_v51 = vrot.slane %v5998_v45, 4 }
 0x168   : > { %4233 = vmatmul.mubr.msk.f32.gmra.mrb[6].mxu1 %vm1125_vm3, %v1500_v7  ;;  %4337 = vmatmul.mubr.msk.f32.gmra.mrb[6].mxu0 %vm1125_vm3, %v5991_v37  ;;  %v1510_v2 = vsel %vm1480_vm4, %v5319_v0, %v1509_v51  ;;  %v6004_v0 = vld [vmem:[#allocation28_spill] sm:$0xff] }
 0x169   : > { %4235 = vmatprep.mubr.msk.f32.mxu1 %vm1125_vm3, %v5315_v31  ;;  %4339 = vmatprep.mubr.msk.f32.mxu0 %vm1125_vm3, %v5178_v57 }
 0x16c   : > { %4236 = vmatmul.mubr.msk.f32.gmra.mrb[8].mxu1 %vm1125_vm3, %v1505_v19  ;;  %4340 = vmatmul.mubr.msk.f32.gmra.mrb[8].mxu0 %vm1125_vm3, %v5999_v55 }
 0x16d   : > { %4238 = vmatprep.mubr.msk.f32.mxu1 %vm1125_vm3, %v5468_v28  ;;  %4342 = vmatprep.mubr.msk.f32.mxu0 %vm1125_vm3, %v5210_v16 }
 0x170   : > { %4239 = vmatmul.mubr.msk.f32.gmra.mrb[10].mxu1 %vm1125_vm3, %v1510_v2  ;;  %4343 = vmatmul.mubr.msk.f32.gmra.mrb[10].mxu0 %vm1125_vm3, %v6001_v18 }
 0x171   : > { %4241 = vmatprep.mubr.msk.f32.mxu1 %vm1125_vm3, %v5486_v26  ;;  %4345 = vmatprep.mubr.msk.f32.mxu0 %vm1125_vm3, %v6003_v63 }
 0x174   : > { %4242 = vmatmul.mubr.msk.f32.gmra.mrb[12].mxu1 %vm1125_vm3, %v1515_v33  ;;  %4346 = vmatmul.mubr.msk.f32.gmra.mrb[12].mxu0 %vm1125_vm3, %v6004_v0 }
 0x175   : > { %4244 = vmatprep.mubr.msk.f32.mxu1 %vm1125_vm3, %v5501_v24  ;;  %4348 = vmatprep.mubr.msk.f32.mxu0 %vm1125_vm3, %v6005_v14 }
 0x178   : > { %4245 = vmatmul.mubr.msk.f32.gmra.mrb[14].mxu1 %vm1125_vm3, %v1520_v41  ;;  %4349 = vmatmul.mubr.msk.f32.gmra.mrb[14].mxu0 %vm1125_vm3, %v6006_v52 }
 0x179   : > { %4249 = vmatprep.mubr.msk.f32.mxu1 %vm1125_vm3, %v5011_v44  ;;  %4353 = vmatprep.mubr.msk.f32.mxu0 %vm1125_vm3, %v6007_v34  ;;  %v6009_v44 = vld [vmem:[#allocation16_spill] sm:$0xff] }
 0x17c   : > { %4250 = vmatmul.mubr.msk.f32.vlgmr.msra.gmra.mrb[0].mxu1 %vm1125_vm3, %v5016_v47  ;;  %4354 = vmatmul.mubr.msk.f32.vlgmr.msra.gmra.mrb[0].mxu0 %vm1125_vm3, %v5360_v35  ;;  %v6010_v47 = vld [vmem:[#allocation19_spill] sm:$0xff] }
 0x17d   : > { %4252 = vmatprep.mubr.msk.f32.mxu1 %vm1125_vm3, %v5037_v58  ;;  %4378 = vmatpush3.msra.mxu0 %v3871_v53  ;;  %v6012_v58 = vld [vmem:[#allocation26_spill] sm:$0xff] }
 0x17e   : > { %4356 = vmatprep.mubr.msk.f32.mxu0 %vm1125_vm3, %v6008_v5 }
 0x180   : > { %4253 = vmatmul.mubr.msk.f32.gmra.mrb[2].mxu1 %vm1125_vm3, %v5040_v59  ;;  %4357 = vmatmul.mubr.msk.f32.gmra.mrb[2].mxu0 %vm1125_vm3, %v5364_v42  ;;  %v6011_v42 = vld [vmem:[#allocation23_spill] sm:$0xff]  ;;  %v3210_v59 = vld [vmem:[%s5920_s7] sm:$0xff] }
 0x181   : > { %4255 = vmatprep.mubr.msk.f32.mxu1 %vm1125_vm3, %v5070_v8  ;;  %4359 = vmatprep.mubr.msk.f32.mxu0 %vm1125_vm3, %v6009_v44 }
 0x182   : > { %4403 = vmatprep.subr.mxu1 %v3210_v59 }
 0x183   : > { %4404 = vmatpush3.msra.mxu1 %v3210_v59 }
 0x184   : > { %4256 = vmatmul.mubr.msk.f32.gmra.mrb[4].mxu1 %vm1125_vm3, %v5073_v9  ;;  %4360 = vmatmul.mubr.msk.f32.gmra.mrb[4].mxu0 %vm1125_vm3, %v5378_v13 }
 0x185   : > { %4258 = vmatprep.mubr.msk.f32.mxu1 %vm1125_vm3, %v5076_v10  ;;  %4362 = vmatprep.mubr.msk.f32.mxu0 %vm1125_vm3, %v6010_v47 }
 0x188   : > { %4259 = vmatmul.mubr.msk.f32.gmra.mrb[6].mxu1 %vm1125_vm3, %v5986_v32  ;;  %4363 = vmatmul.mubr.msk.f32.gmra.mrb[6].mxu0 %vm1125_vm3, %v5382_v1 }
 0x189   : > { %4261 = vmatprep.mubr.msk.f32.mxu1 %vm1125_vm3, %v5117_v27  ;;  %4365 = vmatprep.mubr.msk.f32.mxu0 %vm1125_vm3, %v6011_v42 }
 0x18c   : > { %4262 = vmatmul.mubr.msk.f32.gmra.mrb[8].mxu1 %vm1125_vm3, %v5989_v50  ;;  %4366 = vmatmul.mubr.msk.f32.gmra.mrb[8].mxu0 %vm1125_vm3, %v5386_v25 }
 0x18d   : > { %4264 = vmatprep.mubr.msk.f32.mxu1 %vm1125_vm3, %v5148_v39  ;;  %4368 = vmatprep.mubr.msk.f32.mxu0 %vm1125_vm3, %v6012_v58 }
 0x190   : > { %4265 = vmatmul.mubr.msk.f32.gmra.mrb[10].mxu1 %vm1125_vm3, %v5991_v37  ;;  %4369 = vmatmul.mubr.msk.f32.gmra.mrb[10].mxu0 %vm1125_vm3, %v5398_v38 }
 0x191   : > { %4267 = vmatprep.mubr.msk.f32.mxu1 %vm1125_vm3, %v5178_v57  ;;  %4371 = vmatprep.mubr.msk.f32.mxu0 %vm1125_vm3, %v5367_v20 }
 0x194   : > { %4268 = vmatmul.mubr.msk.f32.gmra.mrb[12].mxu1 %vm1125_vm3, %v5999_v55  ;;  %4372 = vmatmul.mubr.msk.f32.gmra.mrb[12].mxu0 %vm1125_vm3, %v5408_v11 }
 0x195   : > { %4270 = vmatprep.mubr.msk.f32.mxu1 %vm1125_vm3, %v5210_v16  ;;  %4374 = vmatprep.mubr.msk.f32.mxu0 %vm1125_vm3, %v5401_v36 }
 0x198   : > { %4271 = vmatmul.mubr.msk.f32.gmra.mrb[14].mxu1 %vm1125_vm3, %v6001_v18  ;;  %4375 = vmatmul.mubr.msk.f32.gmra.mrb[14].mxu0 %vm1125_vm3, %v5415_v40 }
 0x199   : > { %4379 = vmatprep.mubr.msk.f32.mxu0 %vm1125_vm3, %v5315_v31 }
 0x19c   : > { %4380 = vmatmul.mubr.msk.f32.vlgmr.msra.gmra.mrb[0].mxu0 %vm1125_vm3, %v5419_v60  ;;  %v5744_v60 = vld [vmem:[%s5918_s5] ss:$0 sm:$0xff] }
 0x19d   : > { %4382 = vmatprep.mubr.msk.f32.mxu0 %vm1125_vm3, %v5468_v28 }
 0x1a0   : > { %4383 = vmatmul.mubr.msk.f32.gmra.mrb[2].mxu0 %vm1125_vm3, %v5426_v22 }
 0x1a1   : > { %4385 = vmatprep.mubr.msk.f32.mxu0 %vm1125_vm3, %v5486_v26 }
 0x1a4   : > { %4386 = vmatmul.mubr.msk.f32.gmra.mrb[4].mxu0 %vm1125_vm3, %v5430_v3 }
 0x1a5   : > { %4388 = vmatprep.mubr.msk.f32.mxu0 %vm1125_vm3, %v5501_v24 }
 0x1a8   : > { %4389 = vmatmul.mubr.msk.f32.gmra.mrb[6].mxu0 %vm1125_vm3, %v5434_v23  ;;  %v5749_v23 = vld [vmem:[%s5919_s6] ss:$0 sm:$0xff] }
 0x1a9   : > { %4391 = vmatprep.mubr.msk.f32.mxu0 %vm1125_vm3, %v5516_v4 }
 0x1ac   : > { %4392 = vmatmul.mubr.msk.f32.gmra.mrb[8].mxu0 %vm1125_vm3, %v5442_v48 }
 0x1ad   : > { %4394 = vmatprep.mubr.msk.f32.mxu0 %vm1125_vm3, %v5533_v21 }
 0x1b0   : > { %4395 = vmatmul.mubr.msk.f32.gmra.mrb[10].mxu0 %vm1125_vm3, %v5446_v61 }
 0x1b1   : > { %4397 = vmatprep.mubr.msk.f32.mxu0 %vm1125_vm3, %v5449_v62 }
 0x1b4   : > { %4398 = vmatmul.mubr.msk.f32.gmra.mrb[12].mxu0 %vm1125_vm3, %v5459_v49 }
 0x1b5   : > { %4400 = vmatprep.mubr.msk.f32.mxu0 %vm1125_vm3, %v5462_v54 }
 0x1b8   : > { %4401 = vmatmul.mubr.msk.f32.gmra.mrb[14].mxu0 %vm1125_vm3, %v5472_v15 }
 0x24f   : > { %v4251_v8 = vpop.f32.mrb[0].mxu1 }
 0x250   : > { %v1859_v9 = vpop.f32.mrb[1].mxu1 }
 0x253   : > { %v4254_v10 = vpop.f32.mrb[2].mxu1 }
 0x254   : > { %v1869_v20 = vpop.f32.mrb[3].mxu1 }
 0x257   : > { %v4257_v27 = vpop.f32.mrb[4].mxu1 }
 0x258   : > { %v1879_v35 = vpop.f32.mrb[5].mxu1 }
 0x25b   : > { %v4260_v39 = vpop.f32.mrb[6].mxu1 }
 0x25c   : > { %v1889_v57 = vpop.f32.mrb[7].mxu1 }
 0x25f   : > { %v4263_v16 = vpop.f32.mrb[8].mxu1 }
 0x260   : > { %v1899_v31 = vpop.f32.mrb[9].mxu1 }
 0x263   : > { %v4266_v13 = vpop.f32.mrb[10].mxu1 }
 0x264   : > { %v5731_v1 = vpop.f32.mrb[11].mxu1 }
 0x267   : > { %v5733_v25 = vpop.f32.mrb[12].mxu1 }
 0x268   : > { %v5735_v38 = vpop.f32.mrb[13].mxu1 }
 0x26b   : > { %v5737_v36 = vpop.f32.mrb[14].mxu1 }
 0x26c   : > { %v5739_v11 = vpop.f32.mrb[15].mxu1 }
 0x26f   : > { %v4381_v40 = vpop.f32.mrb[0].mxu0 }
 0x270   : > { %v4429_v22 = vadd.f32 %v4381_v40, %v4251_v8  ;;  %v3053_v3 = vpop.f32.mrb[1].mxu0 }
 0x271   : > { %v4430_v48 = vadd.f32 %v3053_v3, %v1859_v9 }
 0x272   : > { %v3156_v61 = vmul.f32 %v4429_v22, %v5744_v60 }
 0x273   : > { %v3155_v62 = vmul.f32 %v4430_v48, %v5744_v60  ;;  %v4384_v49 = vpop.f32.mrb[2].mxu0 }
 0x274   : > { %v3179_v54 = vadd.f32 %v5749_v23, %v3156_v61  ;;  %v4431_v28 = vadd.f32 %v4384_v49, %v4254_v10  ;;  %v3063_v15 = vpop.f32.mrb[3].mxu0 }
 0x275   : > { %v3178_v26 = vadd.f32 %v5749_v23, %v3155_v62  ;;  %v4432_v24 = vadd.f32 %v3063_v15, %v1869_v20 }
 0x276   : > { %v3158_v4 = vmul.f32 %v4431_v28, %v5744_v60  ;;  %v3195_v37 = vmax.f32 %v3179_v54, 0.0 }
 0x277   : > { %v3194_v32 = vmax.f32 %v3178_v26, 0.0  ;;  %v3157_v21 = vmul.f32 %v4432_v24, %v5744_v60  ;;  %v4387_v50 = vpop.f32.mrb[4].mxu0 }
 0x278   : > { %v3181_v53 = vadd.f32 %v5749_v23, %v3158_v4  ;;  %v4433_v29 = vadd.f32 %v4387_v50, %v4257_v27  ;;  %v3073_v6 = vpop.f32.mrb[5].mxu0 }
 0x279   : > { %v3180_v7 = vadd.f32 %v5749_v23, %v3157_v21  ;;  %v4434_v30 = vadd.f32 %v3073_v6, %v1879_v35  ;;  %4405 = vmatprep.mubr.msk.f32.mxu1 %vm1125_vm3, %v3194_v32 }
 0x27a   : > { %v3160_v43 = vmul.f32 %v4433_v29, %v5744_v60  ;;  %4406 = vmatmul.mubr.msk.f32.vlgmr.msra.gmra.mrb[16].mxu1 %vm1125_vm3, %v3195_v37  ;;  %v3197_v55 = vmax.f32 %v3181_v53, 0.0  ;;  %v5816_v29 = vld [vmem:[%s5922_s9] ss:$0 sm:$0xff] }
 0x27b   : > { %v3196_v19 = vmax.f32 %v3180_v7, 0.0  ;;  %v3159_v45 = vmul.f32 %v4434_v30, %v5744_v60  ;;  %v4390_v51 = vpop.f32.mrb[6].mxu0  ;;  %v3453_v30 = vld [vmem:[%s5811_s26 + $0x8] sm:$0xff] }
 0x27c   : > { %v3183_v2 = vadd.f32 %v5749_v23, %v3160_v43  ;;  %v4435_v12 = vadd.f32 %v4390_v51, %v4260_v39  ;;  %v3083_v46 = vpop.f32.mrb[7].mxu0 }
 0x27d   : > { %v3182_v18 = vadd.f32 %v5749_v23, %v3159_v45  ;;  %v4436_v33 = vadd.f32 %v3083_v46, %v1889_v57  ;;  %4408 = vmatprep.mubr.msk.f32.mxu1 %vm1125_vm3, %v3196_v19  ;;  %v3452_v45 = vld [vmem:[%s5811_s26] sm:$0xff] }
 0x27e   : > { %v3162_v56 = vmul.f32 %v4435_v12, %v5744_v60  ;;  %4409 = vmatmul.mubr.msk.f32.gmra.mrb[18].mxu1 %vm1125_vm3, %v3197_v55  ;;  %v3199_v41 = vmax.f32 %v3183_v2, 0.0 }
 0x27f   : > { %v3198_v17 = vmax.f32 %v3182_v18, 0.0  ;;  %v3161_v63 = vmul.f32 %v4436_v33, %v5744_v60  ;;  %v4393_v0 = vpop.f32.mrb[8].mxu0  ;;  %v3455_v33 = vld [vmem:[%s5811_s26 + $0x18] sm:$0xff] }
 0x280   : > { %v3185_v14 = vadd.f32 %v5749_v23, %v3162_v56  ;;  %v4437_v52 = vadd.f32 %v4393_v0, %v4263_v16  ;;  %v3093_v34 = vpop.f32.mrb[9].mxu0  ;;  %v3454_v0 = vld [vmem:[%s5811_s26 + $0x10] sm:$0xff] }
 0x281   : > { %v3184_v5 = vadd.f32 %v5749_v23, %v3161_v63  ;;  %v4438_v44 = vadd.f32 %v3093_v34, %v1899_v31  ;;  %4411 = vmatprep.mubr.msk.f32.mxu1 %vm1125_vm3, %v3198_v17 }
 0x282   : > { %v3164_v47 = vmul.f32 %v4437_v52, %v5744_v60  ;;  %4412 = vmatmul.mubr.msk.f32.gmra.mrb[20].mxu1 %vm1125_vm3, %v3199_v41  ;;  %v3201_v8 = vmax.f32 %v3185_v14, 0.0 }
 0x283   : > { %v3200_v42 = vmax.f32 %v3184_v5, 0.0  ;;  %v3163_v58 = vmul.f32 %v4438_v44, %v5744_v60  ;;  %v4396_v59 = vpop.f32.mrb[10].mxu0 }
 0x284   : > { %v3187_v9 = vadd.f32 %v5749_v23, %v3164_v47  ;;  %v4439_v10 = vadd.f32 %v4396_v59, %v4266_v13  ;;  %v3103_v20 = vpop.f32.mrb[11].mxu0 }
 0x285   : > { %v3186_v27 = vadd.f32 %v5749_v23, %v3163_v58  ;;  %v4440_v35 = vadd.f32 %v3103_v20, %v5731_v1  ;;  %4414 = vmatprep.mubr.msk.f32.mxu1 %vm1125_vm3, %v3200_v42  ;;  %v3457_v42 = vld [vmem:[%s5811_s26 + $0x28] sm:$0xff] }
 0x286   : > { %v3166_v39 = vmul.f32 %v4439_v10, %v5744_v60  ;;  %4415 = vmatmul.mubr.msk.f32.gmra.mrb[22].mxu1 %vm1125_vm3, %v3201_v8  ;;  %v3203_v40 = vmax.f32 %v3187_v9, 0.0  ;;  %v3456_v9 = vld [vmem:[%s5811_s26 + $0x20] sm:$0xff] }
 0x287   : > { %v3202_v57 = vmax.f32 %v3186_v27, 0.0  ;;  %v3165_v16 = vmul.f32 %v4440_v35, %v5744_v60  ;;  %v4399_v31 = vpop.f32.mrb[12].mxu0 }
 0x288   : > { %v3189_v22 = vadd.f32 %v5749_v23, %v3166_v39  ;;  %v4441_v13 = vadd.f32 %v4399_v31, %v5733_v25  ;;  %v3113_v3 = vpop.f32.mrb[13].mxu0  ;;  %v3459_v31 = vld [vmem:[%s5811_s26 + $0x38] sm:$0xff] }
 0x289   : > { %v3188_v48 = vadd.f32 %v5749_v23, %v3165_v16  ;;  %v4442_v1 = vadd.f32 %v3113_v3, %v5735_v38  ;;  %4417 = vmatprep.mubr.msk.f32.mxu1 %vm1125_vm3, %v3202_v57  ;;  %v3458_v3 = vld [vmem:[%s5811_s26 + $0x30] sm:$0xff] }
 0x28a   : > { %v3168_v61 = vmul.f32 %v4441_v13, %v5744_v60  ;;  %4418 = vmatmul.mubr.msk.f32.gmra.mrb[24].mxu1 %vm1125_vm3, %v3203_v40  ;;  %v3205_v28 = vmax.f32 %v3189_v22, 0.0 }
 0x28b   : > { %v3204_v62 = vmax.f32 %v3188_v48, 0.0  ;;  %v3167_v49 = vmul.f32 %v4442_v1, %v5744_v60  ;;  %v4402_v54 = vpop.f32.mrb[14].mxu0 }
 0x28c   : > { %v3191_v15 = vadd.f32 %v5749_v23, %v3168_v61  ;;  %v4443_v25 = vadd.f32 %v4402_v54, %v5737_v36  ;;  %v3123_v26 = vpop.f32.mrb[15].mxu0 }
 0x28d   : > { %v3190_v24 = vadd.f32 %v5749_v23, %v3167_v49  ;;  %v4444_v38 = vadd.f32 %v3123_v26, %v5739_v11  ;;  %4420 = vmatprep.mubr.msk.f32.mxu1 %vm1125_vm3, %v3204_v62 }
 0x28e   : > { %v3170_v4 = vmul.f32 %v4443_v25, %v5744_v60  ;;  %4421 = vmatmul.mubr.msk.f32.gmra.mrb[26].mxu1 %vm1125_vm3, %v3205_v28  ;;  %v3207_v50 = vmax.f32 %v3191_v15, 0.0  ;;  %v3461_v15 = vld [vmem:[%s5811_s26 + $0x48] sm:$0xff] }
 0x28f   : > { %v3206_v32 = vmax.f32 %v3190_v24, 0.0  ;;  %v3169_v21 = vmul.f32 %v4444_v38, %v5744_v60  ;;  %v5808_v60 = vld [vmem:[%s5921_s8] ss:$0 sm:$0xff] }
 0x290   : > { %v3193_v37 = vadd.f32 %v5749_v23, %v3170_v4  ;;  %v3460_v38 = vld [vmem:[%s5811_s26 + $0x40] sm:$0xff] }
 0x291   : > { %v3192_v36 = vadd.f32 %v5749_v23, %v3169_v21  ;;  %4423 = vmatprep.mubr.msk.f32.mxu1 %vm1125_vm3, %v3206_v32 }
 0x292   : > { %4424 = vmatmul.mubr.msk.f32.gmra.mrb[28].mxu1 %vm1125_vm3, %v3207_v50  ;;  %v3209_v53 = vmax.f32 %v3193_v37, 0.0 }
 0x293   : > { %v3208_v11 = vmax.f32 %v3192_v36, 0.0 }
 0x295   : > { %4426 = vmatprep.mubr.msk.f32.mxu1 %vm1125_vm3, %v3208_v11 }
 0x296   : > { %4427 = vmatmul.mubr.msk.f32.gmra.mrb[30].mxu1 %vm1125_vm3, %v3209_v53  ;;  %v3463_v53 = vld [vmem:[%s5811_s26 + $0x58] sm:$0xff] }
 0x34d   : > { %v4407_v23 = vpop.f32.mrb[16].mxu1 }
 0x34e   : > { %v3412_v6 = vmul.f32 %v4407_v23, %v5808_v60  ;;  %v3325_v7 = vpop.f32.mrb[17].mxu1 }
 0x34f   : > { %v3411_v43 = vmul.f32 %v5808_v60, %v3325_v7 }
 0x350   : > { %v3435_v19 = vadd.f32 %v5816_v29, %v3412_v6 }
 0x351   : > { %v3434_v51 = vadd.f32 %v5816_v29, %v3411_v43  ;;  %v4410_v55 = vpop.f32.mrb[18].mxu1 }
 0x352   : > { %v3469_v2 = vadd.f32 %v3453_v30, %v3435_v19  ;;  %v3414_v12 = vmul.f32 %v4410_v55, %v5808_v60  ;;  %v3335_v46 = vpop.f32.mrb[19].mxu1  ;;  %v3462_v30 = vld [vmem:[%s5811_s26 + $0x50] sm:$0xff] }
 0x353   : > { %v3468_v18 = vadd.f32 %v3452_v45, %v3434_v51  ;;  %v3413_v56 = vmul.f32 %v5808_v60, %v3335_v46  ;;  %v3465_v46 = vld [vmem:[%s5811_s26 + $0x68] sm:$0xff] }
 0x354   : > { %v3485_v17 = vmax.f32 %v3469_v2, 0.0  ;;  %v3437_v63 = vadd.f32 %v5816_v29, %v3414_v12 }
 0x355   : > { %v3484_v41 = vmax.f32 %v3468_v18, 0.0  ;;  %v3436_v14 = vadd.f32 %v5816_v29, %v3413_v56  ;;  %v4413_v52 = vpop.f32.mrb[20].mxu1 }
 0x356   : > { %3501 = vst.msk [vmem:[%s4735_s11 + $0x8] sm:$0xff] %vm1125_vm3, %v3485_v17  ;;  %v3471_v34 = vadd.f32 %v3455_v33, %v3437_v63  ;;  %v3416_v5 = vmul.f32 %v4413_v52, %v5808_v60  ;;  %v3345_v44 = vpop.f32.mrb[21].mxu1  ;;  %v3464_v17 = vld [vmem:[%s5811_s26 + $0x60] sm:$0xff] }
 0x357   : > { %3500 = vst.msk [vmem:[%s4735_s11] sm:$0xff] %vm1125_vm3, %v3484_v41  ;;  %v3470_v47 = vadd.f32 %v3454_v0, %v3436_v14  ;;  %v3415_v58 = vmul.f32 %v5808_v60, %v3345_v44  ;;  %v3467_v44 = vld [vmem:[%s5811_s26 + $0x78] sm:$0xff] }
 0x358   : > { %v3487_v59 = vmax.f32 %v3471_v34, 0.0  ;;  %v3439_v8 = vadd.f32 %v5816_v29, %v3416_v5 }
 0x359   : > { %v3486_v10 = vmax.f32 %v3470_v47, 0.0  ;;  %v3438_v20 = vadd.f32 %v5816_v29, %v3415_v58  ;;  %v4416_v27 = vpop.f32.mrb[22].mxu1 }
 0x35a   : > { %3503 = vst.msk [vmem:[%s4735_s11 + $0x18] sm:$0xff] %vm1125_vm3, %v3487_v59  ;;  %v3473_v35 = vadd.f32 %v3457_v42, %v3439_v8  ;;  %v3418_v39 = vmul.f32 %v4416_v27, %v5808_v60  ;;  %v3355_v57 = vpop.f32.mrb[23].mxu1  ;;  %v3466_v59 = vld [vmem:[%s5811_s26 + $0x70] sm:$0xff] }
 0x35b   : > { %3502 = vst.msk [vmem:[%s4735_s11 + $0x10] sm:$0xff] %vm1125_vm3, %v3486_v10  ;;  %v3472_v16 = vadd.f32 %v3456_v9, %v3438_v20  ;;  %v3417_v40 = vmul.f32 %v5808_v60, %v3355_v57 }
 0x35c   : > { %v3489_v22 = vmax.f32 %v3473_v35, 0.0  ;;  %v3441_v13 = vadd.f32 %v5816_v29, %v3418_v39 }
 0x35d   : > { %v3488_v48 = vmax.f32 %v3472_v16, 0.0  ;;  %v3440_v1 = vadd.f32 %v5816_v29, %v3417_v40  ;;  %v4419_v61 = vpop.f32.mrb[24].mxu1 }
 0x35e   : > { %3505 = vst.msk [vmem:[%s4735_s11 + $0x28] sm:$0xff] %vm1125_vm3, %v3489_v22  ;;  %v3475_v62 = vadd.f32 %v3459_v31, %v3441_v13  ;;  %v3420_v49 = vmul.f32 %v4419_v61, %v5808_v60  ;;  %v3365_v54 = vpop.f32.mrb[25].mxu1 }
 0x35f   : > { %3504 = vst.msk [vmem:[%s4735_s11 + $0x20] sm:$0xff] %vm1125_vm3, %v3488_v48  ;;  %v3474_v28 = vadd.f32 %v3458_v3, %v3440_v1  ;;  %v3419_v25 = vmul.f32 %v5808_v60, %v3365_v54 }
 0x360   : > { %v3491_v26 = vmax.f32 %v3475_v62, 0.0  ;;  %v3443_v24 = vadd.f32 %v5816_v29, %v3420_v49 }
 0x361   : > { %v3490_v4 = vmax.f32 %v3474_v28, 0.0  ;;  %v3442_v32 = vadd.f32 %v5816_v29, %v3419_v25  ;;  %v4422_v21 = vpop.f32.mrb[26].mxu1 }
 0x362   : > { %3507 = vst.msk [vmem:[%s4735_s11 + $0x38] sm:$0xff] %vm1125_vm3, %v3491_v26  ;;  %v3477_v50 = vadd.f32 %v3461_v15, %v3443_v24  ;;  %v3422_v37 = vmul.f32 %v4422_v21, %v5808_v60  ;;  %v3375_v36 = vpop.f32.mrb[27].mxu1 }
 0x363   : > { %3506 = vst.msk [vmem:[%s4735_s11 + $0x30] sm:$0xff] %vm1125_vm3, %v3490_v4  ;;  %v3476_v11 = vadd.f32 %v3460_v38, %v3442_v32  ;;  %v3421_v23 = vmul.f32 %v5808_v60, %v3375_v36 }
 0x364   : > { %v3493_v6 = vmax.f32 %v3477_v50, 0.0  ;;  %v3445_v7 = vadd.f32 %v5816_v29, %v3422_v37 }
 0x365   : > { %v3492_v43 = vmax.f32 %v3476_v11, 0.0  ;;  %v3444_v19 = vadd.f32 %v5816_v29, %v3421_v23  ;;  %v4425_v45 = vpop.f32.mrb[28].mxu1 }
 0x366   : > { %3509 = vst.msk [vmem:[%s4735_s11 + $0x48] sm:$0xff] %vm1125_vm3, %v3493_v6  ;;  %v3479_v51 = vadd.f32 %v3463_v53, %v3445_v7  ;;  %v3424_v55 = vmul.f32 %v4425_v45, %v5808_v60  ;;  %v3385_v2 = vpop.f32.mrb[29].mxu1 }
 0x367   : > { %3508 = vst.msk [vmem:[%s4735_s11 + $0x40] sm:$0xff] %vm1125_vm3, %v3492_v43  ;;  %v3478_v12 = vadd.f32 %v3462_v30, %v3444_v19  ;;  %v3423_v18 = vmul.f32 %v5808_v60, %v3385_v2 }
 0x368   : > { %v3495_v33 = vmax.f32 %v3479_v51, 0.0  ;;  %v3447_v56 = vadd.f32 %v5816_v29, %v3424_v55 }
 0x369   : > { %v3494_v63 = vmax.f32 %v3478_v12, 0.0  ;;  %v3446_v0 = vadd.f32 %v5816_v29, %v3423_v18  ;;  %v4428_v41 = vpop.f32.mrb[30].mxu1 }
 0x36a   : > { %3511 = vst.msk [vmem:[%s4735_s11 + $0x58] sm:$0xff] %vm1125_vm3, %v3495_v33  ;;  %v3481_v14 = vadd.f32 %v3465_v46, %v3447_v56  ;;  %v3426_v52 = vmul.f32 %v4428_v41, %v5808_v60  ;;  %v3395_v34 = vpop.f32.mrb[31].mxu1 }
 0x36b   : > { %3510 = vst.msk [vmem:[%s4735_s11 + $0x50] sm:$0xff] %vm1125_vm3, %v3494_v63  ;;  %v3480_v5 = vadd.f32 %v3464_v17, %v3446_v0  ;;  %v3425_v47 = vmul.f32 %v5808_v60, %v3395_v34 }
 0x36c   : > { %v3497_v42 = vmax.f32 %v3481_v14, 0.0  ;;  %v3449_v58 = vadd.f32 %v5816_v29, %v3426_v52 }
 0x36d   : > { %v3496_v8 = vmax.f32 %v3480_v5, 0.0  ;;  %v3448_v9 = vadd.f32 %v5816_v29, %v3425_v47 }
 0x36e   : > { %3513 = vst.msk [vmem:[%s4735_s11 + $0x68] sm:$0xff] %vm1125_vm3, %v3497_v42  ;;  %v3483_v10 = vadd.f32 %v3467_v44, %v3449_v58 }
 0x36f   : > { %3512 = vst.msk [vmem:[%s4735_s11 + $0x60] sm:$0xff] %vm1125_vm3, %v3496_v8  ;;  %v3482_v20 = vadd.f32 %v3466_v59, %v3448_v9 }
 0x370   : > { %v3499_v27 = vmax.f32 %v3483_v10, 0.0 }
 0x371   : > { %v3498_v35 = vmax.f32 %v3482_v20, 0.0 }
 0x372   : > { %3515 = vst.msk [vmem:[%s4735_s11 + $0x78] sm:$0xff] %vm1125_vm3, %v3499_v27 }
 0x373   : > { %3514 = vst.msk [vmem:[%s4735_s11 + $0x70] sm:$0xff] %vm1125_vm3, %v3498_v35 }
 0x374 PF: > { %s20_s17 = sadd.s32 1, %s4636_s17   ;;  %s6013_s25 = sld [smem:[#allocation3_spill]] }
 0x375   : > { %p17_p8 = scmp.ge.s32.totalorder %s20_s17, 6   ;;  %s6014_s13 = smov %s4628_s15 }
 0x376   : > { %s6015_s14 = smov %s4632_s16  ;;  %s6016_s15 = smov %s6019_s18 }
 0x377   :  { %19 = sbr.rel (!%p17_p8) target bundleno = 3 (0x3), region = 109 }
 0x37a   : > { %s6017_s16 = smov %s6013_s25 }

</bundles_post_ra>
